<compile_context>
chip_gen: v6e
topology: v6e:2x2x1
jax: 0.10.0
libtpu: 0.0.40
codegen_flags: <defaults>
</compile_context>

<pallas_src>
import functools

import jax
import jax.numpy as jnp
from jax.experimental import pallas as pl
from jax.experimental.pallas import tpu as pltpu


# -----------------------------------------------------------------------------
# Kernel 1: fused fc_stn MLP + closed-form 2x2 symeig (smallest-eigenvalue vector)
# -----------------------------------------------------------------------------
def _stn_kernel(x_ref, u_ref, w1x_ref, w1u_ref, b1_ref, w2_ref, b2_ref,
                w3_ref, b3_ref, cos_ref, sin_ref):
    # Linear(1+784, nh): x part on the MXU, single u column as a VPU rank-1 update.
    h = jnp.dot(x_ref[...], w1x_ref[...], preferred_element_type=jnp.float32)
    h = h + u_ref[...] * w1u_ref[...] + b1_ref[...]
    h = jnp.where(h >= 0.0, h, 0.2 * h)          # LeakyReLU(0.2); Dropout = identity (eval)
    # Linear(nh, nh) with eval-mode BatchNorm1d folded into w2/b2.
    h = jnp.dot(h, w2_ref[...], preferred_element_type=jnp.float32) + b2_ref[...]
    h = jnp.where(h >= 0.0, h, 0.2 * h)
    # Linear(nh, 3) -> A_vec = [a, b, c] of the symmetric 2x2 matrix [[a, b], [b, c]].
    av = jnp.dot(h, w3_ref[...], preferred_element_type=jnp.float32) + b3_ref[...]
    col = jax.lax.broadcasted_iota(jnp.int32, av.shape, 1)
    a = jnp.sum(jnp.where(col == 0, av, 0.0), axis=1, keepdims=True)
    b = jnp.sum(jnp.where(col == 1, av, 0.0), axis=1, keepdims=True)
    c = jnp.sum(jnp.where(col == 2, av, 0.0), axis=1, keepdims=True)
    # Eigenvector of the smallest eigenvalue (torch.symeig ascending, evs[:, :, 0]).
    disc = jnp.sqrt(((a - c) * 0.5) ** 2 + b * b)
    lam0 = (a + c) * 0.5 - disc
    use_b = jnp.abs(b) > 1e-12
    v0 = jnp.where(use_b, b, jnp.where(a <= c, 1.0, 0.0))
    v1 = jnp.where(use_b, lam0 - a, jnp.where(a <= c, 0.0, 1.0))
    inv_n = jax.lax.rsqrt(v0 * v0 + v1 * v1)
    cos_ref[...] = v0 * inv_n     # NOTE: eigenvector sign is arbitrary (as with LAPACK).
    sin_ref[...] = v1 * inv_n


def stn_pallas(x_flat, u2, q):
    B = x_flat.shape[0]
    return pl.pallas_call(
        _stn_kernel,
        out_shape=(jax.ShapeDtypeStruct((B, 1), jnp.float32),
                   jax.ShapeDtypeStruct((B, 1), jnp.float32)),
    )(x_flat, u2, q['stn_w1x'], q['stn_w1u'], q['stn_b1'],
      q['stn_w2'], q['stn_b2'], q['stn_w3'], q['stn_b3'])


# -----------------------------------------------------------------------------
# Kernel 2/3: conv-as-GEMM with bias (folded BN) + ReLU epilogue
# -----------------------------------------------------------------------------
def _gemm_bias_relu_kernel(x_ref, w_ref, b_ref, o_ref):
    acc = jnp.dot(x_ref[...], w_ref[...], preferred_element_type=jnp.float32)
    o_ref[...] = jnp.maximum(acc + b_ref[...], 0.0)


def conv_gemm_relu(col, w, b):
    """relu(col @ w + b); b already carries the folded eval-mode BatchNorm."""
    M, K = col.shape
    _, N = w.shape
    # Split rows into 2 blocks when it divides cleanly so v7x's two TensorCores
    # can share the grid; otherwise run one full block (no host padding either way).
    tile_m = M // 2 if (M % 2 == 0 and (M // 2) % 8 == 0) else M
    return pl.pallas_call(
        _gemm_bias_relu_kernel,
        out_shape=jax.ShapeDtypeStruct((M, N), jnp.float32),
        grid=(M // tile_m,),
        in_specs=[
            pl.BlockSpec((tile_m, K), lambda i: (i, 0)),
            pl.BlockSpec((K, N), lambda i: (0, 0)),
            pl.BlockSpec((1, N), lambda i: (0, 0)),
        ],
        out_specs=pl.BlockSpec((tile_m, N), lambda i: (i, 0)),
        compiler_params=pltpu.CompilerParams(dimension_semantics=("parallel",)),
    )(col, w, b)


# -----------------------------------------------------------------------------
# Kernel 4: conv3 + conv4 + fc_pred + log_softmax + argmax, fully fused
# -----------------------------------------------------------------------------
def _head_kernel(col_ref, w3_ref, b3_ref, w4_ref, b4_ref,
                 pw1_ref, pb1_ref, pw2_ref, pb2_ref, pw3_ref, pb3_ref,
                 f_ref, g_ref, z_ref, h3_scr):
    B = z_ref.shape[0]
    P = w4_ref.shape[0]                      # 16 taps of the 4x4 conv4
    # conv3 (3x3 s2 p1 over the 4x4 output grid) as one GEMM over all 16*B patches.
    h3_scr[...] = jnp.maximum(
        jnp.dot(col_ref[...], w3_ref[...], preferred_element_type=jnp.float32) + b3_ref[...],
        0.0)
    # conv4 (4x4, valid -> 1x1): rows are (tap, batch) ordered, so each spatial tap
    # is a contiguous (B, nh) slab of the scratch buffer -> 16 accumulating matmuls.
    z = jnp.zeros((B, w4_ref.shape[2]), jnp.float32)
    for p in range(P):
        z = z + jnp.dot(h3_scr[p * B:(p + 1) * B, :], w4_ref[p],
                        preferred_element_type=jnp.float32)
    z = jnp.maximum(z + b4_ref[...], 0.0)
    z_ref[...] = z
    # fc_pred: two 1x1 convs on 1x1 spatial (GEMMs with folded BN) + Linear head.
    h = jnp.maximum(jnp.dot(z, pw1_ref[...], preferred_element_type=jnp.float32) + pb1_ref[...], 0.0)
    h = jnp.maximum(jnp.dot(h, pw2_ref[...], preferred_element_type=jnp.float32) + pb2_ref[...], 0.0)
    y = jnp.dot(h, pw3_ref[...], preferred_element_type=jnp.float32) + pb3_ref[...]
    # log_softmax(dim=1) + argmax(dim=1) fused epilogue.
    m = jnp.max(y, axis=1, keepdims=True)
    lse = jnp.log(jnp.sum(jnp.exp(y - m), axis=1, keepdims=True)) + m
    f = y - lse
    f_ref[...] = f
    mx = jnp.max(f, axis=1, keepdims=True)
    idx = jax.lax.broadcasted_iota(jnp.int32, f.shape, 1)
    g_ref[...] = jnp.min(jnp.where(f >= mx, idx, f.shape[1]), axis=1, keepdims=True)


def head_pallas(col3, q, nh, nz):
    R = col3.shape[0]
    B = R // 16
    return pl.pallas_call(
        _head_kernel,
        out_shape=(jax.ShapeDtypeStruct((B, 10), jnp.float32),
                   jax.ShapeDtypeStruct((B, 1), jnp.int32),
                   jax.ShapeDtypeStruct((B, nz), jnp.float32)),
        scratch_shapes=[pltpu.VMEM((R, nh), jnp.float32)],
    )(col3, q['cw3'], q['cb3'], q['cw4'], q['cb4'],
      q['pw1'], q['pb1'], q['pw2'], q['pb2'], q['pw3'], q['pb3'])


# -----------------------------------------------------------------------------
# JAX glue: BN folding, NHWC im2col, affine_grid + grid_sample
# -----------------------------------------------------------------------------
def fold_bn(bn, eps=1e-5):
    gamma, beta, mean, var = bn
    scale = gamma / jnp.sqrt(var + eps)
    shift = beta - mean * scale
    return scale, shift


def im2col_nhwc(x, kh, kw, stride, pad, row_order="bhw"):
    """x: (B, H, W, C) -> (rows, KH*KW*C); column order = (tap, channel).

    row_order 'bhw': rows are (b, oh, ow)  -> output reshapes to NHWC for free.
    row_order 'hwb': rows are (oh, ow, b)  -> each spatial tap is a contiguous
                     batch-sized slab (consumed by the fused conv3/conv4 head).
    """
    # TODO(synk): spatial re-windowing between conv layers stays in XLA; an
    # in-kernel im2col would need strided value slices with no clean BlockSpec form.
    B, H, W, C = x.shape
    xp = jnp.pad(x, ((0, 0), (pad, pad), (pad, pad), (0, 0)))
    OH = (H + 2 * pad - kh) // stride + 1
    OW = (W + 2 * pad - kw) // stride + 1
    taps = [xp[:, i:i + stride * OH:stride, j:j + stride * OW:stride, :]
            for i in range(kh) for j in range(kw)]
    col = jnp.stack(taps, axis=3)                        # (B, OH, OW, KH*KW, C)
    if row_order == "bhw":
        col = col.reshape(B * OH * OW, kh * kw * C)
    else:
        col = col.transpose(1, 2, 0, 3, 4).reshape(OH * OW * B, kh * kw * C)
    return col, OH, OW


def grid_sample_rot(x, tcos, tsin):
    """F.affine_grid + F.grid_sample (bilinear, zeros padding, align_corners=False)
    with theta = [[cos, sin, 0], [-sin, cos, 0]]."""
    # TODO(synk): data-dependent bilinear gather kept in plain JAX (no clean BlockSpec form).
    B, C, H, W = x.shape
    xs = (2.0 * jnp.arange(W, dtype=jnp.float32) + 1.0) / W - 1.0
    ys = (2.0 * jnp.arange(H, dtype=jnp.float32) + 1.0) / H - 1.0
    GX, GY = jnp.meshgrid(xs, ys)
    cos = tcos[:, None, None]
    sin = tsin[:, None, None]
    sx = cos * GX[None] + sin * GY[None]
    sy = -sin * GX[None] + cos * GY[None]
    ix = ((sx + 1.0) * W - 1.0) * 0.5
    iy = ((sy + 1.0) * H - 1.0) * 0.5
    ix0 = jnp.floor(ix)
    iy0 = jnp.floor(iy)
    wx1 = ix - ix0
    wx0 = 1.0 - wx1
    wy1 = iy - iy0
    wy0 = 1.0 - wy1
    imgs = x.reshape(B, H * W)

    def corner(yy, xx):
        valid = (xx >= 0) & (xx <= W - 1) & (yy >= 0) & (yy <= H - 1)
        xi = jnp.clip(xx, 0, W - 1).astype(jnp.int32)
        yi = jnp.clip(yy, 0, H - 1).astype(jnp.int32)
        flat = (yi * W + xi).reshape(B, -1)
        vals = jnp.take_along_axis(imgs, flat, axis=1).reshape(B, H, W)
        return jnp.where(valid, vals, 0.0)

    out = (corner(iy0, ix0) * wy0 * wx0
           + corner(iy0, ix0 + 1) * wy0 * wx1
           + corner(iy0 + 1, ix0) * wy1 * wx0
           + corner(iy0 + 1, ix0 + 1) * wy1 * wx1)
    return out.reshape(B, C, H, W)


# -----------------------------------------------------------------------------
# Deterministic parameter init (matches DANN.__init__ incl. init_weight_STN)
# -----------------------------------------------------------------------------
def init_params(key, nh=64, nz=32):
    ks = jax.random.split(key, 24)

    def w(k, shape, s=0.05):
        return s * jax.random.normal(k, shape, jnp.float32)

    def bn(k, n):
        k1, k2, k3, k4 = jax.random.split(k, 4)
        return (1.0 + 0.1 * jax.random.normal(k1, (n,), jnp.float32),   # gamma
                0.1 * jax.random.normal(k2, (n,), jnp.float32),          # beta
                0.1 * jax.random.normal(k3, (n,), jnp.float32),          # running_mean
                1.0 + 0.1 * jnp.abs(jax.random.normal(k4, (n,), jnp.float32)))  # running_var

    p = {}
    # fc_stn: Linear(1+784, nh) / LReLU(0.2) / Drop / Linear(nh, nh) / BN1d / LReLU(0.2) / Drop / Linear(nh, 3)
    p['stn_w1'] = w(ks[0], (1 + 28 * 28, nh))
    p['stn_b1'] = w(ks[1], (nh,))
    # init_weight_STN: stn[-5].weight[:, -784:] = 0 (nh < 784 => whole weight), bias = 0
    p['stn_w2'] = jnp.zeros((nh, nh), jnp.float32)
    p['stn_b2'] = jnp.zeros((nh,), jnp.float32)
    p['stn_bn'] = bn(ks[2], nh)
    # init_weight_STN: stn[-1].weight = 0, bias = [0.99, 0.01, 0.99]
    p['stn_w3'] = jnp.zeros((nh, 3), jnp.float32)
    p['stn_b3'] = jnp.array([1 - 0.01, 0.01, 1 - 0.01], jnp.float32)
    # conv trunk
    p['cw1'] = w(ks[3], (nh, 1, 3, 3)); p['cb1'] = w(ks[4], (nh,)); p['cbn1'] = bn(ks[5], nh)
    p['cw2'] = w(ks[6], (nh, nh, 3, 3)); p['cb2'] = w(ks[7], (nh,)); p['cbn2'] = bn(ks[8], nh)
    p['cw3'] = w(ks[9], (nh, nh, 3, 3)); p['cb3'] = w(ks[10], (nh,)); p['cbn3'] = bn(ks[11], nh)
    p['cw4'] = w(ks[12], (nz, nh, 4, 4)); p['cb4'] = w(ks[13], (nz,))
    # fc_pred: Conv1x1(nz,nh)+BN+ReLU, Conv1x1(nh,nh)+BN+ReLU, Squeeze, Linear(nh,10)
    p['pw1'] = w(ks[14], (nh, nz, 1, 1)); p['pb1'] = w(ks[15], (nh,)); p['pbn1'] = bn(ks[16], nh)
    p['pw2'] = w(ks[17], (nh, nh, 1, 1)); p['pb2'] = w(ks[18], (nh,)); p['pbn2'] = bn(ks[19], nh)
    p['pw3'] = w(ks[20], (nh, 10)); p['pb3'] = w(ks[21], (10,))
    return p


def _conv_w2d(w):
    """PyTorch (OC, IC, KH, KW) -> im2col weight (KH*KW*IC, OC) with (tap, chan) rows."""
    OC, IC, KH, KW = w.shape
    return w.transpose(2, 3, 1, 0).reshape(KH * KW * IC, OC)


def prepare_params(p, nh=64, nz=32):
    """One-time host-side prep: fold eval-mode BN + bias into GEMM weights, reshape
    conv weights into NHWC-im2col form, split the u/x rows of the first stn Linear."""
    q = {}
    # fc_stn MLP.
    q['stn_w1u'] = p['stn_w1'][0:1, :]
    q['stn_w1x'] = p['stn_w1'][1:, :]
    q['stn_b1'] = p['stn_b1'].reshape(1, nh)
    s, t = fold_bn(p['stn_bn'])
    q['stn_w2'] = p['stn_w2'] * s[None, :]
    q['stn_b2'] = (p['stn_b2'] * s + t).reshape(1, nh)
    q['stn_w3'] = p['stn_w3']
    q['stn_b3'] = p['stn_b3'].reshape(1, 3)
    # Conv trunk (BN folded into weight/bias).
    for i in (1, 2, 3):
        w2d = _conv_w2d(p[f'cw{i}'])
        s, t = fold_bn(p[f'cbn{i}'])
        q[f'cw{i}'] = w2d * s[None, :]
        q[f'cb{i}'] = (p[f'cb{i}'] * s + t).reshape(1, -1)
    q['cw4'] = p['cw4'].transpose(2, 3, 1, 0).reshape(16, nh, nz)   # (tap, IC, OC)
    q['cb4'] = p['cb4'].reshape(1, nz)
    # fc_pred (1x1 convs == GEMMs, BN folded) + final Linear.
    s, t = fold_bn(p['pbn1'])
    q['pw1'] = p['pw1'].reshape(nh, nz).T * s[None, :]
    q['pb1'] = (p['pb1'] * s + t).reshape(1, nh)
    s, t = fold_bn(p['pbn2'])
    q['pw2'] = p['pw2'].reshape(nh, nh).T * s[None, :]
    q['pb2'] = (p['pb2'] * s + t).reshape(1, nh)
    q['pw3'] = p['pw3']
    q['pb3'] = p['pb3'].reshape(1, 10)
    return q


# -----------------------------------------------------------------------------
# DANN.forward: f = log_softmax(fc_pred(conv(stn(x,u)))), e = z, g = argmax(f)
# -----------------------------------------------------------------------------
def dann_forward(q, x, u, nh=64, nz=32):
    B = x.shape[0]

    # ---- fc_stn (one fused Pallas kernel) + affine grid sampling ----
    cos, sin = stn_pallas(x.reshape(B, 28 * 28), u.reshape(B, 1), q)
    x_align = grid_sample_rot(x, cos[:, 0], sin[:, 0])                 # (B, 1, 28, 28)

    # ---- conv trunk, NHWC end-to-end (windowing in XLA, GEMMs in Pallas) ----
    h = x_align.reshape(B, 28, 28, 1)                                  # C==1: free reshape
    col1, _, _ = im2col_nhwc(h, 3, 3, 2, 1)                            # (B*196, 9)
    h1 = conv_gemm_relu(col1, q['cw1'], q['cb1'])                      # 28x28 -> 14x14
    col2, _, _ = im2col_nhwc(h1.reshape(B, 14, 14, nh), 3, 3, 2, 1)    # (B*49, 9*nh)
    h2 = conv_gemm_relu(col2, q['cw2'], q['cb2'])                      # 14x14 -> 7x7
    col3, _, _ = im2col_nhwc(h2.reshape(B, 7, 7, nh), 3, 3, 2, 1,
                             row_order="hwb")                          # (16*B, 9*nh)

    # ---- conv3 + conv4 + fc_pred + log_softmax + argmax (one fused kernel) ----
    f, g, z = head_pallas(col3, q, nh, nz)
    return f, x_align, z.reshape(B, nz, 1, 1), g[:, 0]


if __name__ == "__main__":
    key = jax.random.PRNGKey(0)
    kx, ku, kp = jax.random.split(key, 3)
    B, NH, NZ = 4, 64, 32
    x = jax.random.normal(kx, (B, 1, 28, 28), jnp.float32)   # B x 1 x 28 x 28 (NCHW)
    u = jax.random.uniform(ku, (B,), jnp.float32)            # domain index in [0, 1)

    params = init_params(kp, nh=NH, nz=NZ)
    qparams = prepare_params(params, nh=NH, nz=NZ)           # fold BN / reshape once (host side)

    fwd = jax.jit(functools.partial(dann_forward, nh=NH, nz=NZ))
    f, x_align, z, g = fwd(qparams, x, u)
    jax.block_until_ready((f, x_align, z, g))

    assert f.shape == (B, 10) and x_align.shape == (B, 1, 28, 28)
    assert z.shape == (B, NZ, 1, 1) and g.shape == (B,)
    print("KERNEL_OK")
</pallas_src>

<mosaic_0001>
module attributes {stable_mosaic.version = 11 : i64} {
  func.func @_stn_kernel(%arg0: memref<4x784xf32, #tpu.memory_space<vmem>>, %arg1: memref<4x1xf32, #tpu.memory_space<vmem>>, %arg2: memref<784x64xf32, #tpu.memory_space<vmem>>, %arg3: memref<1x64xf32, #tpu.memory_space<vmem>>, %arg4: memref<1x64xf32, #tpu.memory_space<vmem>>, %arg5: memref<64x64xf32, #tpu.memory_space<vmem>>, %arg6: memref<1x64xf32, #tpu.memory_space<vmem>>, %arg7: memref<64x3xf32, #tpu.memory_space<vmem>>, %arg8: memref<1x3xf32, #tpu.memory_space<vmem>>, %arg9: memref<4x1xf32, #tpu.memory_space<vmem>>, %arg10: memref<4x1xf32, #tpu.memory_space<vmem>>) attributes {dimension_semantics = [], scalar_prefetch = 0 : i64, scratch_operands = 0 : i64, tpu.core_type = #tpu.core_type<tc>} {
    %c0 = arith.constant 0 : index
    %c0_0 = arith.constant 0 : index
    %0 = vector.load %arg0[%c0, %c0_0] : memref<4x784xf32, #tpu.memory_space<vmem>>, vector<4x784xf32>
    %c0_1 = arith.constant 0 : index
    %c0_2 = arith.constant 0 : index
    %1 = vector.load %arg2[%c0_1, %c0_2] : memref<784x64xf32, #tpu.memory_space<vmem>>, vector<784x64xf32>
    %cst = arith.constant dense<0.000000e+00> : vector<4x64xf32>
    %2 = tpu.matmul %0, %1, %cst {dimension_numbers = #tpu.dot_dimension_numbers<[1], [0], [0], [1], [0, 0, 1, 1], [], []>} : vector<4x784xf32>, vector<784x64xf32>, vector<4x64xf32> -> vector<4x64xf32>
    %c0_3 = arith.constant 0 : index
    %c0_4 = arith.constant 0 : index
    %3 = vector.load %arg1[%c0_3, %c0_4] : memref<4x1xf32, #tpu.memory_space<vmem>>, vector<4x1xf32>
    %c0_5 = arith.constant 0 : index
    %c0_6 = arith.constant 0 : index
    %4 = vector.load %arg3[%c0_5, %c0_6] : memref<1x64xf32, #tpu.memory_space<vmem>>, vector<1x64xf32>
    %5 = vector.broadcast %3 : vector<4x1xf32> to vector<4x64xf32>
    %6 = vector.broadcast %4 : vector<1x64xf32> to vector<4x64xf32>
    %7 = arith.mulf %5, %6 : vector<4x64xf32>
    %8 = arith.addf %2, %7 : vector<4x64xf32>
    %c0_7 = arith.constant 0 : index
    %c0_8 = arith.constant 0 : index
    %9 = vector.load %arg4[%c0_7, %c0_8] : memref<1x64xf32, #tpu.memory_space<vmem>>, vector<1x64xf32>
    %10 = vector.broadcast %9 : vector<1x64xf32> to vector<4x64xf32>
    %11 = arith.addf %8, %10 : vector<4x64xf32>
    %cst_9 = arith.constant 0.000000e+00 : f32
    %12 = vector.broadcast %cst_9 : f32 to vector<4x64xf32>
    %13 = arith.cmpf oge, %11, %12 : vector<4x64xf32>
    %cst_10 = arith.constant 2.000000e-01 : f32
    %14 = vector.broadcast %cst_10 : f32 to vector<4x64xf32>
    %15 = arith.mulf %14, %11 : vector<4x64xf32>
    %16 = arith.select %13, %11, %15 : vector<4x64xi1>, vector<4x64xf32>
    %c0_11 = arith.constant 0 : index
    %c0_12 = arith.constant 0 : index
    %17 = vector.load %arg5[%c0_11, %c0_12] : memref<64x64xf32, #tpu.memory_space<vmem>>, vector<64x64xf32>
    %cst_13 = arith.constant dense<0.000000e+00> : vector<4x64xf32>
    %18 = tpu.matmul %16, %17, %cst_13 {dimension_numbers = #tpu.dot_dimension_numbers<[1], [0], [0], [1], [0, 0, 1, 1], [], []>} : vector<4x64xf32>, vector<64x64xf32>, vector<4x64xf32> -> vector<4x64xf32>
    %c0_14 = arith.constant 0 : index
    %c0_15 = arith.constant 0 : index
    %19 = vector.load %arg6[%c0_14, %c0_15] : memref<1x64xf32, #tpu.memory_space<vmem>>, vector<1x64xf32>
    %20 = vector.broadcast %19 : vector<1x64xf32> to vector<4x64xf32>
    %21 = arith.addf %18, %20 : vector<4x64xf32>
    %cst_16 = arith.constant 0.000000e+00 : f32
    %22 = vector.broadcast %cst_16 : f32 to vector<4x64xf32>
    %23 = arith.cmpf oge, %21, %22 : vector<4x64xf32>
    %cst_17 = arith.constant 2.000000e-01 : f32
    %24 = vector.broadcast %cst_17 : f32 to vector<4x64xf32>
    %25 = arith.mulf %24, %21 : vector<4x64xf32>
    %26 = arith.select %23, %21, %25 : vector<4x64xi1>, vector<4x64xf32>
    %c0_18 = arith.constant 0 : index
    %c0_19 = arith.constant 0 : index
    %27 = vector.load %arg7[%c0_18, %c0_19] : memref<64x3xf32, #tpu.memory_space<vmem>>, vector<64x3xf32>
    %cst_20 = arith.constant dense<0.000000e+00> : vector<4x3xf32>
    %28 = tpu.matmul %26, %27, %cst_20 {dimension_numbers = #tpu.dot_dimension_numbers<[1], [0], [0], [1], [0, 0, 1, 1], [], []>} : vector<4x64xf32>, vector<64x3xf32>, vector<4x3xf32> -> vector<4x3xf32>
    %c0_21 = arith.constant 0 : index
    %c0_22 = arith.constant 0 : index
    %29 = vector.load %arg8[%c0_21, %c0_22] : memref<1x3xf32, #tpu.memory_space<vmem>>, vector<1x3xf32>
    %30 = vector.broadcast %29 : vector<1x3xf32> to vector<4x3xf32>
    %31 = arith.addf %28, %30 : vector<4x3xf32>
    %32 = tpu.iota {dimensions = array<i32: 1>} : vector<4x3xi32>
    %c0_i32 = arith.constant 0 : i32
    %33 = vector.broadcast %c0_i32 : i32 to vector<4x3xi32>
    %34 = arith.cmpi eq, %32, %33 : vector<4x3xi32>
    %cst_23 = arith.constant 0.000000e+00 : f32
    %35 = vector.broadcast %cst_23 : f32 to vector<4x3xf32>
    %36 = arith.select %34, %31, %35 : vector<4x3xi1>, vector<4x3xf32>
    %cst_24 = arith.constant dense<0.000000e+00> : vector<4xf32>
    %37 = vector.multi_reduction <add>, %36, %cst_24 [1] : vector<4x3xf32> to vector<4xf32>
    %38 = vector.shape_cast %37 : vector<4xf32> to vector<4x1xf32>
    %c1_i32 = arith.constant 1 : i32
    %39 = vector.broadcast %c1_i32 : i32 to vector<4x3xi32>
    %40 = arith.cmpi eq, %32, %39 : vector<4x3xi32>
    %cst_25 = arith.constant 0.000000e+00 : f32
    %41 = vector.broadcast %cst_25 : f32 to vector<4x3xf32>
    %42 = arith.select %40, %31, %41 : vector<4x3xi1>, vector<4x3xf32>
    %cst_26 = arith.constant dense<0.000000e+00> : vector<4xf32>
    %43 = vector.multi_reduction <add>, %42, %cst_26 [1] : vector<4x3xf32> to vector<4xf32>
    %44 = vector.shape_cast %43 : vector<4xf32> to vector<4x1xf32>
    %c2_i32 = arith.constant 2 : i32
    %45 = vector.broadcast %c2_i32 : i32 to vector<4x3xi32>
    %46 = arith.cmpi eq, %32, %45 : vector<4x3xi32>
    %cst_27 = arith.constant 0.000000e+00 : f32
    %47 = vector.broadcast %cst_27 : f32 to vector<4x3xf32>
    %48 = arith.select %46, %31, %47 : vector<4x3xi1>, vector<4x3xf32>
    %cst_28 = arith.constant dense<0.000000e+00> : vector<4xf32>
    %49 = vector.multi_reduction <add>, %48, %cst_28 [1] : vector<4x3xf32> to vector<4xf32>
    %50 = vector.shape_cast %49 : vector<4xf32> to vector<4x1xf32>
    %51 = arith.subf %38, %50 : vector<4x1xf32>
    %cst_29 = arith.constant 5.000000e-01 : f32
    %52 = vector.broadcast %cst_29 : f32 to vector<4x1xf32>
    %53 = arith.mulf %51, %52 : vector<4x1xf32>
    %54 = arith.mulf %53, %53 : vector<4x1xf32>
    %55 = arith.mulf %44, %44 : vector<4x1xf32>
    %56 = arith.addf %54, %55 : vector<4x1xf32>
    %57 = math.sqrt %56 : vector<4x1xf32>
    %58 = arith.addf %38, %50 : vector<4x1xf32>
    %cst_30 = arith.constant 5.000000e-01 : f32
    %59 = vector.broadcast %cst_30 : f32 to vector<4x1xf32>
    %60 = arith.mulf %58, %59 : vector<4x1xf32>
    %61 = arith.subf %60, %57 : vector<4x1xf32>
    %62 = math.absf %44 : vector<4x1xf32>
    %cst_31 = arith.constant 9.99999996E-13 : f32
    %63 = vector.broadcast %cst_31 : f32 to vector<4x1xf32>
    %64 = arith.cmpf ogt, %62, %63 : vector<4x1xf32>
    %65 = arith.cmpf ole, %38, %50 : vector<4x1xf32>
    %cst_32 = arith.constant 1.000000e+00 : f32
    %cst_33 = arith.constant 0.000000e+00 : f32
    %66 = vector.broadcast %cst_32 : f32 to vector<4x1xf32>
    %67 = vector.broadcast %cst_33 : f32 to vector<4x1xf32>
    %68 = arith.select %65, %66, %67 : vector<4x1xi1>, vector<4x1xf32>
    %69 = arith.select %64, %44, %68 : vector<4x1xi1>, vector<4x1xf32>
    %70 = arith.subf %61, %38 : vector<4x1xf32>
    %71 = arith.cmpf ole, %38, %50 : vector<4x1xf32>
    %cst_34 = arith.constant 0.000000e+00 : f32
    %cst_35 = arith.constant 1.000000e+00 : f32
    %72 = vector.broadcast %cst_34 : f32 to vector<4x1xf32>
    %73 = vector.broadcast %cst_35 : f32 to vector<4x1xf32>
    %74 = arith.select %71, %72, %73 : vector<4x1xi1>, vector<4x1xf32>
    %75 = arith.select %64, %70, %74 : vector<4x1xi1>, vector<4x1xf32>
    %76 = arith.mulf %69, %69 : vector<4x1xf32>
    %77 = arith.mulf %75, %75 : vector<4x1xf32>
    %78 = arith.addf %76, %77 : vector<4x1xf32>
    %79 = math.rsqrt %78 : vector<4x1xf32>
    %80 = arith.mulf %69, %79 : vector<4x1xf32>
    %c0_36 = arith.constant 0 : index
    %c0_37 = arith.constant 0 : index
    %81 = vector.load %arg9[%c0_36, %c0_37] : memref<4x1xf32, #tpu.memory_space<vmem>>, vector<4x1xf32>
    tpu.vector_store %arg9[%c0_36, %c0_37], %80 {strides = array<i32>} : memref<4x1xf32, #tpu.memory_space<vmem>>, vector<4x1xf32>,
    %82 = arith.mulf %75, %79 : vector<4x1xf32>
    %c0_38 = arith.constant 0 : index
    %c0_39 = arith.constant 0 : index
    %83 = vector.load %arg10[%c0_38, %c0_39] : memref<4x1xf32, #tpu.memory_space<vmem>>, vector<4x1xf32>
    tpu.vector_store %arg10[%c0_38, %c0_39], %82 {strides = array<i32>} : memref<4x1xf32, #tpu.memory_space<vmem>>, vector<4x1xf32>,
    return
  }
}

module attributes {stable_mosaic.version = 11 : i64} {
  func.func @_gemm_bias_relu_kernel(%arg0: i32, %arg1: memref<392x9xf32, #tpu.memory_space<vmem>>, %arg2: memref<9x64xf32, #tpu.memory_space<vmem>>, %arg3: memref<1x64xf32, #tpu.memory_space<vmem>>, %arg4: memref<392x64xf32, #tpu.memory_space<vmem>>) attributes {dimension_semantics = [#tpu.dimension_semantics<parallel>], iteration_bounds = array<i64: 2>, scalar_prefetch = 0 : i64, scratch_operands = 0 : i64, tpu.core_type = #tpu.core_type<tc>, window_params = [{transform_indices = @transform_0, window_bounds = array<i64: 392, 9>}, {pipeline_mode = #tpu.pipeline_mode<synchronous>, transform_indices = @transform_1, window_bounds = array<i64: 9, 64>}, {pipeline_mode = #tpu.pipeline_mode<synchronous>, transform_indices = @transform_2, window_bounds = array<i64: 1, 64>}, {transform_indices = @transform_3, window_bounds = array<i64: 392, 64>}]} {
    %c0 = arith.constant 0 : index
    %c0_0 = arith.constant 0 : index
    %0 = vector.load %arg1[%c0, %c0_0] : memref<392x9xf32, #tpu.memory_space<vmem>>, vector<392x9xf32>
    %c0_1 = arith.constant 0 : index
    %c0_2 = arith.constant 0 : index
    %1 = vector.load %arg2[%c0_1, %c0_2] : memref<9x64xf32, #tpu.memory_space<vmem>>, vector<9x64xf32>
    %cst = arith.constant dense<0.000000e+00> : vector<392x64xf32>
    %2 = tpu.matmul %0, %1, %cst {dimension_numbers = #tpu.dot_dimension_numbers<[1], [0], [0], [1], [0, 0, 1, 1], [], []>} : vector<392x9xf32>, vector<9x64xf32>, vector<392x64xf32> -> vector<392x64xf32>
    %c0_3 = arith.constant 0 : index
    %c0_4 = arith.constant 0 : index
    %3 = vector.load %arg3[%c0_3, %c0_4] : memref<1x64xf32, #tpu.memory_space<vmem>>, vector<1x64xf32>
    %4 = vector.broadcast %3 : vector<1x64xf32> to vector<392x64xf32>
    %5 = arith.addf %2, %4 : vector<392x64xf32>
    %cst_5 = arith.constant 0.000000e+00 : f32
    %6 = vector.broadcast %cst_5 : f32 to vector<392x64xf32>
    %7 = arith.maximumf %5, %6 : vector<392x64xf32>
    %c0_6 = arith.constant 0 : index
    %c0_7 = arith.constant 0 : index
    %8 = vector.load %arg4[%c0_6, %c0_7] : memref<392x64xf32, #tpu.memory_space<vmem>>, vector<392x64xf32>
    tpu.vector_store %arg4[%c0_6, %c0_7], %7 {strides = array<i32>} : memref<392x64xf32, #tpu.memory_space<vmem>>, vector<392x64xf32>,
    return
  }
  func.func @transform_0(%arg0: i32) -> (i32, i32) {
    %c0_i32 = arith.constant 0 : i32
    %c0_i32_0 = arith.constant 0 : i32
    return %arg0, %c0_i32 : i32, i32
  }
  func.func @transform_1(%arg0: i32) -> (i32, i32) {
    %c0_i32 = arith.constant 0 : i32
    %c0_i32_0 = arith.constant 0 : i32
    %c0_i32_1 = arith.constant 0 : i32
    return %c0_i32, %c0_i32_0 : i32, i32
  }
  func.func @transform_2(%arg0: i32) -> (i32, i32) {
    %c0_i32 = arith.constant 0 : i32
    %c0_i32_0 = arith.constant 0 : i32
    %c0_i32_1 = arith.constant 0 : i32
    return %c0_i32, %c0_i32_0 : i32, i32
  }
  func.func @transform_3(%arg0: i32) -> (i32, i32) {
    %c0_i32 = arith.constant 0 : i32
    %c0_i32_0 = arith.constant 0 : i32
    return %arg0, %c0_i32 : i32, i32
  }
}

module attributes {stable_mosaic.version = 11 : i64} {
  func.func @_gemm_bias_relu_kernel(%arg0: i32, %arg1: memref<196x576xf32, #tpu.memory_space<vmem>>, %arg2: memref<576x64xf32, #tpu.memory_space<vmem>>, %arg3: memref<1x64xf32, #tpu.memory_space<vmem>>, %arg4: memref<196x64xf32, #tpu.memory_space<vmem>>) attributes {dimension_semantics = [#tpu.dimension_semantics<parallel>], iteration_bounds = array<i64: 1>, scalar_prefetch = 0 : i64, scratch_operands = 0 : i64, tpu.core_type = #tpu.core_type<tc>, window_params = [{transform_indices = @transform_0, window_bounds = array<i64: 196, 576>}, {pipeline_mode = #tpu.pipeline_mode<synchronous>, transform_indices = @transform_1, window_bounds = array<i64: 576, 64>}, {pipeline_mode = #tpu.pipeline_mode<synchronous>, transform_indices = @transform_2, window_bounds = array<i64: 1, 64>}, {transform_indices = @transform_3, window_bounds = array<i64: 196, 64>}]} {
    %c0 = arith.constant 0 : index
    %c0_0 = arith.constant 0 : index
    %0 = vector.load %arg1[%c0, %c0_0] : memref<196x576xf32, #tpu.memory_space<vmem>>, vector<196x576xf32>
    %c0_1 = arith.constant 0 : index
    %c0_2 = arith.constant 0 : index
    %1 = vector.load %arg2[%c0_1, %c0_2] : memref<576x64xf32, #tpu.memory_space<vmem>>, vector<576x64xf32>
    %cst = arith.constant dense<0.000000e+00> : vector<196x64xf32>
    %2 = tpu.matmul %0, %1, %cst {dimension_numbers = #tpu.dot_dimension_numbers<[1], [0], [0], [1], [0, 0, 1, 1], [], []>} : vector<196x576xf32>, vector<576x64xf32>, vector<196x64xf32> -> vector<196x64xf32>
    %c0_3 = arith.constant 0 : index
    %c0_4 = arith.constant 0 : index
    %3 = vector.load %arg3[%c0_3, %c0_4] : memref<1x64xf32, #tpu.memory_space<vmem>>, vector<1x64xf32>
    %4 = vector.broadcast %3 : vector<1x64xf32> to vector<196x64xf32>
    %5 = arith.addf %2, %4 : vector<196x64xf32>
    %cst_5 = arith.constant 0.000000e+00 : f32
    %6 = vector.broadcast %cst_5 : f32 to vector<196x64xf32>
    %7 = arith.maximumf %5, %6 : vector<196x64xf32>
    %c0_6 = arith.constant 0 : index
    %c0_7 = arith.constant 0 : index
    %8 = vector.load %arg4[%c0_6, %c0_7] : memref<196x64xf32, #tpu.memory_space<vmem>>, vector<196x64xf32>
    tpu.vector_store %arg4[%c0_6, %c0_7], %7 {strides = array<i32>} : memref<196x64xf32, #tpu.memory_space<vmem>>, vector<196x64xf32>,
    return
  }
  func.func @transform_0(%arg0: i32) -> (i32, i32) {
    %c0_i32 = arith.constant 0 : i32
    %c0_i32_0 = arith.constant 0 : i32
    return %arg0, %c0_i32 : i32, i32
  }
  func.func @transform_1(%arg0: i32) -> (i32, i32) {
    %c0_i32 = arith.constant 0 : i32
    %c0_i32_0 = arith.constant 0 : i32
    %c0_i32_1 = arith.constant 0 : i32
    return %c0_i32, %c0_i32_0 : i32, i32
  }
  func.func @transform_2(%arg0: i32) -> (i32, i32) {
    %c0_i32 = arith.constant 0 : i32
    %c0_i32_0 = arith.constant 0 : i32
    %c0_i32_1 = arith.constant 0 : i32
    return %c0_i32, %c0_i32_0 : i32, i32
  }
  func.func @transform_3(%arg0: i32) -> (i32, i32) {
    %c0_i32 = arith.constant 0 : i32
    %c0_i32_0 = arith.constant 0 : i32
    return %arg0, %c0_i32 : i32, i32
  }
}

module attributes {stable_mosaic.version = 11 : i64} {
  func.func @_head_kernel(%arg0: memref<64x576xf32, #tpu.memory_space<vmem>>, %arg1: memref<576x64xf32, #tpu.memory_space<vmem>>, %arg2: memref<1x64xf32, #tpu.memory_space<vmem>>, %arg3: memref<16x64x32xf32, #tpu.memory_space<vmem>>, %arg4: memref<1x32xf32, #tpu.memory_space<vmem>>, %arg5: memref<32x64xf32, #tpu.memory_space<vmem>>, %arg6: memref<1x64xf32, #tpu.memory_space<vmem>>, %arg7: memref<64x64xf32, #tpu.memory_space<vmem>>, %arg8: memref<1x64xf32, #tpu.memory_space<vmem>>, %arg9: memref<64x10xf32, #tpu.memory_space<vmem>>, %arg10: memref<1x10xf32, #tpu.memory_space<vmem>>, %arg11: memref<4x10xf32, #tpu.memory_space<vmem>>, %arg12: memref<4x1xi32, #tpu.memory_space<vmem>>, %arg13: memref<4x32xf32, #tpu.memory_space<vmem>>, %arg14: memref<64x64xf32, #tpu.memory_space<vmem>>) attributes {dimension_semantics = [], scalar_prefetch = 0 : i64, scratch_operands = 1 : i64, tpu.core_type = #tpu.core_type<tc>} {
    %c0 = arith.constant 0 : index
    %c0_0 = arith.constant 0 : index
    %0 = vector.load %arg0[%c0, %c0_0] : memref<64x576xf32, #tpu.memory_space<vmem>>, vector<64x576xf32>
    %c0_1 = arith.constant 0 : index
    %c0_2 = arith.constant 0 : index
    %1 = vector.load %arg1[%c0_1, %c0_2] : memref<576x64xf32, #tpu.memory_space<vmem>>, vector<576x64xf32>
    %cst = arith.constant dense<0.000000e+00> : vector<64x64xf32>
    %2 = tpu.matmul %0, %1, %cst {dimension_numbers = #tpu.dot_dimension_numbers<[1], [0], [0], [1], [0, 0, 1, 1], [], []>} : vector<64x576xf32>, vector<576x64xf32>, vector<64x64xf32> -> vector<64x64xf32>
    %c0_3 = arith.constant 0 : index
    %c0_4 = arith.constant 0 : index
    %3 = vector.load %arg2[%c0_3, %c0_4] : memref<1x64xf32, #tpu.memory_space<vmem>>, vector<1x64xf32>
    %4 = vector.broadcast %3 : vector<1x64xf32> to vector<64x64xf32>
    %5 = arith.addf %2, %4 : vector<64x64xf32>
    %cst_5 = arith.constant 0.000000e+00 : f32
    %6 = vector.broadcast %cst_5 : f32 to vector<64x64xf32>
    %7 = arith.maximumf %5, %6 : vector<64x64xf32>
    %c0_6 = arith.constant 0 : index
    %c0_7 = arith.constant 0 : index
    %8 = vector.load %arg14[%c0_6, %c0_7] : memref<64x64xf32, #tpu.memory_space<vmem>>, vector<64x64xf32>
    tpu.vector_store %arg14[%c0_6, %c0_7], %7 {strides = array<i32>} : memref<64x64xf32, #tpu.memory_space<vmem>>, vector<64x64xf32>,
    %cst_8 = arith.constant 0.000000e+00 : f32
    %9 = vector.broadcast %cst_8 : f32 to vector<4x32xf32>
    %c0_9 = arith.constant 0 : index
    %c0_10 = arith.constant 0 : index
    %10 = vector.load %arg14[%c0_9, %c0_10] : memref<64x64xf32, #tpu.memory_space<vmem>>, vector<4x64xf32>
    %c0_11 = arith.constant 0 : index
    %c0_12 = arith.constant 0 : index
    %c0_13 = arith.constant 0 : index
    %11 = vector.load %arg3[%c0_11, %c0_12, %c0_13] : memref<16x64x32xf32, #tpu.memory_space<vmem>>, vector<1x64x32xf32>
    %12 = vector.shape_cast %11 : vector<1x64x32xf32> to vector<64x32xf32>
    %cst_14 = arith.constant dense<0.000000e+00> : vector<4x32xf32>
    %13 = tpu.matmul %10, %12, %cst_14 {dimension_numbers = #tpu.dot_dimension_numbers<[1], [0], [0], [1], [0, 0, 1, 1], [], []>} : vector<4x64xf32>, vector<64x32xf32>, vector<4x32xf32> -> vector<4x32xf32>
    %14 = arith.addf %9, %13 : vector<4x32xf32>
    %c4 = arith.constant 4 : index
    %c0_15 = arith.constant 0 : index
    %15 = vector.load %arg14[%c4, %c0_15] : memref<64x64xf32, #tpu.memory_space<vmem>>, vector<4x64xf32>
    %c1 = arith.constant 1 : index
    %c0_16 = arith.constant 0 : index
    %c0_17 = arith.constant 0 : index
    %16 = vector.load %arg3[%c1, %c0_16, %c0_17] : memref<16x64x32xf32, #tpu.memory_space<vmem>>, vector<1x64x32xf32>
    %17 = vector.shape_cast %16 : vector<1x64x32xf32> to vector<64x32xf32>
    %cst_18 = arith.constant dense<0.000000e+00> : vector<4x32xf32>
    %18 = tpu.matmul %15, %17, %cst_18 {dimension_numbers = #tpu.dot_dimension_numbers<[1], [0], [0], [1], [0, 0, 1, 1], [], []>} : vector<4x64xf32>, vector<64x32xf32>, vector<4x32xf32> -> vector<4x32xf32>
    %19 = arith.addf %14, %18 : vector<4x32xf32>
    %c8 = arith.constant 8 : index
    %c0_19 = arith.constant 0 : index
    %20 = vector.load %arg14[%c8, %c0_19] : memref<64x64xf32, #tpu.memory_space<vmem>>, vector<4x64xf32>
    %c2 = arith.constant 2 : index
    %c0_20 = arith.constant 0 : index
    %c0_21 = arith.constant 0 : index
    %21 = vector.load %arg3[%c2, %c0_20, %c0_21] : memref<16x64x32xf32, #tpu.memory_space<vmem>>, vector<1x64x32xf32>
    %22 = vector.shape_cast %21 : vector<1x64x32xf32> to vector<64x32xf32>
    %cst_22 = arith.constant dense<0.000000e+00> : vector<4x32xf32>
    %23 = tpu.matmul %20, %22, %cst_22 {dimension_numbers = #tpu.dot_dimension_numbers<[1], [0], [0], [1], [0, 0, 1, 1], [], []>} : vector<4x64xf32>, vector<64x32xf32>, vector<4x32xf32> -> vector<4x32xf32>
    %24 = arith.addf %19, %23 : vector<4x32xf32>
    %c12 = arith.constant 12 : index
    %c0_23 = arith.constant 0 : index
    %25 = vector.load %arg14[%c12, %c0_23] : memref<64x64xf32, #tpu.memory_space<vmem>>, vector<4x64xf32>
    %c3 = arith.constant 3 : index
    %c0_24 = arith.constant 0 : index
    %c0_25 = arith.constant 0 : index
    %26 = vector.load %arg3[%c3, %c0_24, %c0_25] : memref<16x64x32xf32, #tpu.memory_space<vmem>>, vector<1x64x32xf32>
    %27 = vector.shape_cast %26 : vector<1x64x32xf32> to vector<64x32xf32>
    %cst_26 = arith.constant dense<0.000000e+00> : vector<4x32xf32>
    %28 = tpu.matmul %25, %27, %cst_26 {dimension_numbers = #tpu.dot_dimension_numbers<[1], [0], [0], [1], [0, 0, 1, 1], [], []>} : vector<4x64xf32>, vector<64x32xf32>, vector<4x32xf32> -> vector<4x32xf32>
    %29 = arith.addf %24, %28 : vector<4x32xf32>
    %c16 = arith.constant 16 : index
    %c0_27 = arith.constant 0 : index
    %30 = vector.load %arg14[%c16, %c0_27] : memref<64x64xf32, #tpu.memory_space<vmem>>, vector<4x64xf32>
    %c4_28 = arith.constant 4 : index
    %c0_29 = arith.constant 0 : index
    %c0_30 = arith.constant 0 : index
    %31 = vector.load %arg3[%c4_28, %c0_29, %c0_30] : memref<16x64x32xf32, #tpu.memory_space<vmem>>, vector<1x64x32xf32>
    %32 = vector.shape_cast %31 : vector<1x64x32xf32> to vector<64x32xf32>
    %cst_31 = arith.constant dense<0.000000e+00> : vector<4x32xf32>
    %33 = tpu.matmul %30, %32, %cst_31 {dimension_numbers = #tpu.dot_dimension_numbers<[1], [0], [0], [1], [0, 0, 1, 1], [], []>} : vector<4x64xf32>, vector<64x32xf32>, vector<4x32xf32> -> vector<4x32xf32>
    %34 = arith.addf %29, %33 : vector<4x32xf32>
    %c20 = arith.constant 20 : index
    %c0_32 = arith.constant 0 : index
    %35 = vector.load %arg14[%c20, %c0_32] : memref<64x64xf32, #tpu.memory_space<vmem>>, vector<4x64xf32>
    %c5 = arith.constant 5 : index
    %c0_33 = arith.constant 0 : index
    %c0_34 = arith.constant 0 : index
    %36 = vector.load %arg3[%c5, %c0_33, %c0_34] : memref<16x64x32xf32, #tpu.memory_space<vmem>>, vector<1x64x32xf32>
    %37 = vector.shape_cast %36 : vector<1x64x32xf32> to vector<64x32xf32>
    %cst_35 = arith.constant dense<0.000000e+00> : vector<4x32xf32>
    %38 = tpu.matmul %35, %37, %cst_35 {dimension_numbers = #tpu.dot_dimension_numbers<[1], [0], [0], [1], [0, 0, 1, 1], [], []>} : vector<4x64xf32>, vector<64x32xf32>, vector<4x32xf32> -> vector<4x32xf32>
    %39 = arith.addf %34, %38 : vector<4x32xf32>
    %c24 = arith.constant 24 : index
    %c0_36 = arith.constant 0 : index
    %40 = vector.load %arg14[%c24, %c0_36] : memref<64x64xf32, #tpu.memory_space<vmem>>, vector<4x64xf32>
    %c6 = arith.constant 6 : index
    %c0_37 = arith.constant 0 : index
    %c0_38 = arith.constant 0 : index
    %41 = vector.load %arg3[%c6, %c0_37, %c0_38] : memref<16x64x32xf32, #tpu.memory_space<vmem>>, vector<1x64x32xf32>
    %42 = vector.shape_cast %41 : vector<1x64x32xf32> to vector<64x32xf32>
    %cst_39 = arith.constant dense<0.000000e+00> : vector<4x32xf32>
    %43 = tpu.matmul %40, %42, %cst_39 {dimension_numbers = #tpu.dot_dimension_numbers<[1], [0], [0], [1], [0, 0, 1, 1], [], []>} : vector<4x64xf32>, vector<64x32xf32>, vector<4x32xf32> -> vector<4x32xf32>
    %44 = arith.addf %39, %43 : vector<4x32xf32>
    %c28 = arith.constant 28 : index
    %c0_40 = arith.constant 0 : index
    %45 = vector.load %arg14[%c28, %c0_40] : memref<64x64xf32, #tpu.memory_space<vmem>>, vector<4x64xf32>
    %c7 = arith.constant 7 : index
    %c0_41 = arith.constant 0 : index
    %c0_42 = arith.constant 0 : index
    %46 = vector.load %arg3[%c7, %c0_41, %c0_42] : memref<16x64x32xf32, #tpu.memory_space<vmem>>, vector<1x64x32xf32>
    %47 = vector.shape_cast %46 : vector<1x64x32xf32> to vector<64x32xf32>
    %cst_43 = arith.constant dense<0.000000e+00> : vector<4x32xf32>
    %48 = tpu.matmul %45, %47, %cst_43 {dimension_numbers = #tpu.dot_dimension_numbers<[1], [0], [0], [1], [0, 0, 1, 1], [], []>} : vector<4x64xf32>, vector<64x32xf32>, vector<4x32xf32> -> vector<4x32xf32>
    %49 = arith.addf %44, %48 : vector<4x32xf32>
    %c32 = arith.constant 32 : index
    %c0_44 = arith.constant 0 : index
    %50 = vector.load %arg14[%c32, %c0_44] : memref<64x64xf32, #tpu.memory_space<vmem>>, vector<4x64xf32>
    %c8_45 = arith.constant 8 : index
    %c0_46 = arith.constant 0 : index
    %c0_47 = arith.constant 0 : index
    %51 = vector.load %arg3[%c8_45, %c0_46, %c0_47] : memref<16x64x32xf32, #tpu.memory_space<vmem>>, vector<1x64x32xf32>
    %52 = vector.shape_cast %51 : vector<1x64x32xf32> to vector<64x32xf32>
    %cst_48 = arith.constant dense<0.000000e+00> : vector<4x32xf32>
    %53 = tpu.matmul %50, %52, %cst_48 {dimension_numbers = #tpu.dot_dimension_numbers<[1], [0], [0], [1], [0, 0, 1, 1], [], []>} : vector<4x64xf32>, vector<64x32xf32>, vector<4x32xf32> -> vector<4x32xf32>
    %54 = arith.addf %49, %53 : vector<4x32xf32>
    %c36 = arith.constant 36 : index
    %c0_49 = arith.constant 0 : index
    %55 = vector.load %arg14[%c36, %c0_49] : memref<64x64xf32, #tpu.memory_space<vmem>>, vector<4x64xf32>
    %c9 = arith.constant 9 : index
    %c0_50 = arith.constant 0 : index
    %c0_51 = arith.constant 0 : index
    %56 = vector.load %arg3[%c9, %c0_50, %c0_51] : memref<16x64x32xf32, #tpu.memory_space<vmem>>, vector<1x64x32xf32>
    %57 = vector.shape_cast %56 : vector<1x64x32xf32> to vector<64x32xf32>
    %cst_52 = arith.constant dense<0.000000e+00> : vector<4x32xf32>
    %58 = tpu.matmul %55, %57, %cst_52 {dimension_numbers = #tpu.dot_dimension_numbers<[1], [0], [0], [1], [0, 0, 1, 1], [], []>} : vector<4x64xf32>, vector<64x32xf32>, vector<4x32xf32> -> vector<4x32xf32>
    %59 = arith.addf %54, %58 : vector<4x32xf32>
    %c40 = arith.constant 40 : index
    %c0_53 = arith.constant 0 : index
    %60 = vector.load %arg14[%c40, %c0_53] : memref<64x64xf32, #tpu.memory_space<vmem>>, vector<4x64xf32>
    %c10 = arith.constant 10 : index
    %c0_54 = arith.constant 0 : index
    %c0_55 = arith.constant 0 : index
    %61 = vector.load %arg3[%c10, %c0_54, %c0_55] : memref<16x64x32xf32, #tpu.memory_space<vmem>>, vector<1x64x32xf32>
    %62 = vector.shape_cast %61 : vector<1x64x32xf32> to vector<64x32xf32>
    %cst_56 = arith.constant dense<0.000000e+00> : vector<4x32xf32>
    %63 = tpu.matmul %60, %62, %cst_56 {dimension_numbers = #tpu.dot_dimension_numbers<[1], [0], [0], [1], [0, 0, 1, 1], [], []>} : vector<4x64xf32>, vector<64x32xf32>, vector<4x32xf32> -> vector<4x32xf32>
    %64 = arith.addf %59, %63 : vector<4x32xf32>
    %c44 = arith.constant 44 : index
    %c0_57 = arith.constant 0 : index
    %65 = vector.load %arg14[%c44, %c0_57] : memref<64x64xf32, #tpu.memory_space<vmem>>, vector<4x64xf32>
    %c11 = arith.constant 11 : index
    %c0_58 = arith.constant 0 : index
    %c0_59 = arith.constant 0 : index
    %66 = vector.load %arg3[%c11, %c0_58, %c0_59] : memref<16x64x32xf32, #tpu.memory_space<vmem>>, vector<1x64x32xf32>
    %67 = vector.shape_cast %66 : vector<1x64x32xf32> to vector<64x32xf32>
    %cst_60 = arith.constant dense<0.000000e+00> : vector<4x32xf32>
    %68 = tpu.matmul %65, %67, %cst_60 {dimension_numbers = #tpu.dot_dimension_numbers<[1], [0], [0], [1], [0, 0, 1, 1], [], []>} : vector<4x64xf32>, vector<64x32xf32>, vector<4x32xf32> -> vector<4x32xf32>
    %69 = arith.addf %64, %68 : vector<4x32xf32>
    %c48 = arith.constant 48 : index
    %c0_61 = arith.constant 0 : index
    %70 = vector.load %arg14[%c48, %c0_61] : memref<64x64xf32, #tpu.memory_space<vmem>>, vector<4x64xf32>
    %c12_62 = arith.constant 12 : index
    %c0_63 = arith.constant 0 : index
    %c0_64 = arith.constant 0 : index
    %71 = vector.load %arg3[%c12_62, %c0_63, %c0_64] : memref<16x64x32xf32, #tpu.memory_space<vmem>>, vector<1x64x32xf32>
    %72 = vector.shape_cast %71 : vector<1x64x32xf32> to vector<64x32xf32>
    %cst_65 = arith.constant dense<0.000000e+00> : vector<4x32xf32>
    %73 = tpu.matmul %70, %72, %cst_65 {dimension_numbers = #tpu.dot_dimension_numbers<[1], [0], [0], [1], [0, 0, 1, 1], [], []>} : vector<4x64xf32>, vector<64x32xf32>, vector<4x32xf32> -> vector<4x32xf32>
    %74 = arith.addf %69, %73 : vector<4x32xf32>
    %c52 = arith.constant 52 : index
    %c0_66 = arith.constant 0 : index
    %75 = vector.load %arg14[%c52, %c0_66] : memref<64x64xf32, #tpu.memory_space<vmem>>, vector<4x64xf32>
    %c13 = arith.constant 13 : index
    %c0_67 = arith.constant 0 : index
    %c0_68 = arith.constant 0 : index
    %76 = vector.load %arg3[%c13, %c0_67, %c0_68] : memref<16x64x32xf32, #tpu.memory_space<vmem>>, vector<1x64x32xf32>
    %77 = vector.shape_cast %76 : vector<1x64x32xf32> to vector<64x32xf32>
    %cst_69 = arith.constant dense<0.000000e+00> : vector<4x32xf32>
    %78 = tpu.matmul %75, %77, %cst_69 {dimension_numbers = #tpu.dot_dimension_numbers<[1], [0], [0], [1], [0, 0, 1, 1], [], []>} : vector<4x64xf32>, vector<64x32xf32>, vector<4x32xf32> -> vector<4x32xf32>
    %79 = arith.addf %74, %78 : vector<4x32xf32>
    %c56 = arith.constant 56 : index
    %c0_70 = arith.constant 0 : index
    %80 = vector.load %arg14[%c56, %c0_70] : memref<64x64xf32, #tpu.memory_space<vmem>>, vector<4x64xf32>
    %c14 = arith.constant 14 : index
    %c0_71 = arith.constant 0 : index
    %c0_72 = arith.constant 0 : index
    %81 = vector.load %arg3[%c14, %c0_71, %c0_72] : memref<16x64x32xf32, #tpu.memory_space<vmem>>, vector<1x64x32xf32>
    %82 = vector.shape_cast %81 : vector<1x64x32xf32> to vector<64x32xf32>
    %cst_73 = arith.constant dense<0.000000e+00> : vector<4x32xf32>
    %83 = tpu.matmul %80, %82, %cst_73 {dimension_numbers = #tpu.dot_dimension_numbers<[1], [0], [0], [1], [0, 0, 1, 1], [], []>} : vector<4x64xf32>, vector<64x32xf32>, vector<4x32xf32> -> vector<4x32xf32>
    %84 = arith.addf %79, %83 : vector<4x32xf32>
    %c60 = arith.constant 60 : index
    %c0_74 = arith.constant 0 : index
    %85 = vector.load %arg14[%c60, %c0_74] : memref<64x64xf32, #tpu.memory_space<vmem>>, vector<4x64xf32>
    %c15 = arith.constant 15 : index
    %c0_75 = arith.constant 0 : index
    %c0_76 = arith.constant 0 : index
    %86 = vector.load %arg3[%c15, %c0_75, %c0_76] : memref<16x64x32xf32, #tpu.memory_space<vmem>>, vector<1x64x32xf32>
    %87 = vector.shape_cast %86 : vector<1x64x32xf32> to vector<64x32xf32>
    %cst_77 = arith.constant dense<0.000000e+00> : vector<4x32xf32>
    %88 = tpu.matmul %85, %87, %cst_77 {dimension_numbers = #tpu.dot_dimension_numbers<[1], [0], [0], [1], [0, 0, 1, 1], [], []>} : vector<4x64xf32>, vector<64x32xf32>, vector<4x32xf32> -> vector<4x32xf32>
    %89 = arith.addf %84, %88 : vector<4x32xf32>
    %c0_78 = arith.constant 0 : index
    %c0_79 = arith.constant 0 : index
    %90 = vector.load %arg4[%c0_78, %c0_79] : memref<1x32xf32, #tpu.memory_space<vmem>>, vector<1x32xf32>
    %91 = vector.broadcast %90 : vector<1x32xf32> to vector<4x32xf32>
    %92 = arith.addf %89, %91 : vector<4x32xf32>
    %cst_80 = arith.constant 0.000000e+00 : f32
    %93 = vector.broadcast %cst_80 : f32 to vector<4x32xf32>
    %94 = arith.maximumf %92, %93 : vector<4x32xf32>
    %c0_81 = arith.constant 0 : index
    %c0_82 = arith.constant 0 : index
    %95 = vector.load %arg13[%c0_81, %c0_82] : memref<4x32xf32, #tpu.memory_space<vmem>>, vector<4x32xf32>
    tpu.vector_store %arg13[%c0_81, %c0_82], %94 {strides = array<i32>} : memref<4x32xf32, #tpu.memory_space<vmem>>, vector<4x32xf32>,
    %c0_83 = arith.constant 0 : index
    %c0_84 = arith.constant 0 : index
    %96 = vector.load %arg5[%c0_83, %c0_84] : memref<32x64xf32, #tpu.memory_space<vmem>>, vector<32x64xf32>
    %cst_85 = arith.constant dense<0.000000e+00> : vector<4x64xf32>
    %97 = tpu.matmul %94, %96, %cst_85 {dimension_numbers = #tpu.dot_dimension_numbers<[1], [0], [0], [1], [0, 0, 1, 1], [], []>} : vector<4x32xf32>, vector<32x64xf32>, vector<4x64xf32> -> vector<4x64xf32>
    %c0_86 = arith.constant 0 : index
    %c0_87 = arith.constant 0 : index
    %98 = vector.load %arg6[%c0_86, %c0_87] : memref<1x64xf32, #tpu.memory_space<vmem>>, vector<1x64xf32>
    %99 = vector.broadcast %98 : vector<1x64xf32> to vector<4x64xf32>
    %100 = arith.addf %97, %99 : vector<4x64xf32>
    %cst_88 = arith.constant 0.000000e+00 : f32
    %101 = vector.broadcast %cst_88 : f32 to vector<4x64xf32>
    %102 = arith.maximumf %100, %101 : vector<4x64xf32>
    %c0_89 = arith.constant 0 : index
    %c0_90 = arith.constant 0 : index
    %103 = vector.load %arg7[%c0_89, %c0_90] : memref<64x64xf32, #tpu.memory_space<vmem>>, vector<64x64xf32>
    %cst_91 = arith.constant dense<0.000000e+00> : vector<4x64xf32>
    %104 = tpu.matmul %102, %103, %cst_91 {dimension_numbers = #tpu.dot_dimension_numbers<[1], [0], [0], [1], [0, 0, 1, 1], [], []>} : vector<4x64xf32>, vector<64x64xf32>, vector<4x64xf32> -> vector<4x64xf32>
    %c0_92 = arith.constant 0 : index
    %c0_93 = arith.constant 0 : index
    %105 = vector.load %arg8[%c0_92, %c0_93] : memref<1x64xf32, #tpu.memory_space<vmem>>, vector<1x64xf32>
    %106 = vector.broadcast %105 : vector<1x64xf32> to vector<4x64xf32>
    %107 = arith.addf %104, %106 : vector<4x64xf32>
    %cst_94 = arith.constant 0.000000e+00 : f32
    %108 = vector.broadcast %cst_94 : f32 to vector<4x64xf32>
    %109 = arith.maximumf %107, %108 : vector<4x64xf32>
    %c0_95 = arith.constant 0 : index
    %c0_96 = arith.constant 0 : index
    %110 = vector.load %arg9[%c0_95, %c0_96] : memref<64x10xf32, #tpu.memory_space<vmem>>, vector<64x10xf32>
    %cst_97 = arith.constant dense<0.000000e+00> : vector<4x10xf32>
    %111 = tpu.matmul %109, %110, %cst_97 {dimension_numbers = #tpu.dot_dimension_numbers<[1], [0], [0], [1], [0, 0, 1, 1], [], []>} : vector<4x64xf32>, vector<64x10xf32>, vector<4x10xf32> -> vector<4x10xf32>
    %c0_98 = arith.constant 0 : index
    %c0_99 = arith.constant 0 : index
    %112 = vector.load %arg10[%c0_98, %c0_99] : memref<1x10xf32, #tpu.memory_space<vmem>>, vector<1x10xf32>
    %113 = vector.broadcast %112 : vector<1x10xf32> to vector<4x10xf32>
    %114 = arith.addf %111, %113 : vector<4x10xf32>
    %cst_100 = arith.constant dense<0xFF800000> : vector<4xf32>
    %115 = vector.multi_reduction <maximumf>, %114, %cst_100 [1] : vector<4x10xf32> to vector<4xf32>
    %116 = vector.shape_cast %115 : vector<4xf32> to vector<4x1xf32>
    %117 = vector.broadcast %116 : vector<4x1xf32> to vector<4x10xf32>
    %118 = arith.subf %114, %117 : vector<4x10xf32>
    %119 = math.exp %118 : vector<4x10xf32>
    %cst_101 = arith.constant dense<0.000000e+00> : vector<4xf32>
    %120 = vector.multi_reduction <add>, %119, %cst_101 [1] : vector<4x10xf32> to vector<4xf32>
    %121 = vector.shape_cast %120 : vector<4xf32> to vector<4x1xf32>
    %122 = math.log %121 : vector<4x1xf32>
    %123 = arith.addf %122, %116 : vector<4x1xf32>
    %124 = vector.broadcast %123 : vector<4x1xf32> to vector<4x10xf32>
    %125 = arith.subf %114, %124 : vector<4x10xf32>
    %c0_102 = arith.constant 0 : index
    %c0_103 = arith.constant 0 : index
    %126 = vector.load %arg11[%c0_102, %c0_103] : memref<4x10xf32, #tpu.memory_space<vmem>>, vector<4x10xf32>
    tpu.vector_store %arg11[%c0_102, %c0_103], %125 {strides = array<i32>} : memref<4x10xf32, #tpu.memory_space<vmem>>, vector<4x10xf32>,
    %cst_104 = arith.constant dense<0xFF800000> : vector<4xf32>
    %127 = vector.multi_reduction <maximumf>, %125, %cst_104 [1] : vector<4x10xf32> to vector<4xf32>
    %128 = vector.shape_cast %127 : vector<4xf32> to vector<4x1xf32>
    %129 = tpu.iota {dimensions = array<i32: 1>} : vector<4x10xi32>
    %130 = vector.broadcast %128 : vector<4x1xf32> to vector<4x10xf32>
    %131 = arith.cmpf oge, %125, %130 : vector<4x10xf32>
    %c10_i32 = arith.constant 10 : i32
    %132 = vector.broadcast %c10_i32 : i32 to vector<4x10xi32>
    %133 = arith.select %131, %129, %132 : vector<4x10xi1>, vector<4x10xi32>
    %cst_105 = arith.constant dense<2147483647> : vector<4xi32>
    %134 = vector.multi_reduction <minsi>, %133, %cst_105 [1] : vector<4x10xi32> to vector<4xi32>
    %135 = vector.shape_cast %134 : vector<4xi32> to vector<4x1xi32>
    %c0_106 = arith.constant 0 : index
    %c0_107 = arith.constant 0 : index
    %136 = vector.load %arg12[%c0_106, %c0_107] : memref<4x1xi32, #tpu.memory_space<vmem>>, vector<4x1xi32>
    tpu.vector_store %arg12[%c0_106, %c0_107], %135 {strides = array<i32>} : memref<4x1xi32, #tpu.memory_space<vmem>>, vector<4x1xi32>,
    return
  }
}

</mosaic_0001>

<bundles_post_ra>
// kernel: neg.5
= control target key start
LH: loop header
LB: loop body
LE: loop exit
PB: predicated region body
PF: predicated region fallthrough
CT: control target
= control target key end

     0   :  { %s24_s0 = inlined_call_operand.vmem [shape: f32[4], index: 0, kind: input, shape index: {}]   ;;  %s25_s1 = inlined_call_operand.vmem [shape: f32[4], index: 1, kind: output, shape index: {}]  }
   0x1   :  { %v2_v0 = vld [vmem:[%s24_s0] sm:$0x1] }
   0x2   :  { %v5_v1 = vxor.u32 2147483648, %v2_v0 }
   0x4   :  { %7 = vst [vmem:[%s25_s1] sm:$0x1] %v5_v1 }

// kernel: dann_forward.4
= control target key start
LH: loop header
LB: loop body
LE: loop exit
PB: predicated region body
PF: predicated region fallthrough
CT: control target
= control target key end

     0   :  { %16 = vsyncpa [#allocation3], 0  ;;  %s1510_s0 = inlined_call_operand.vmem [shape: f32[4,784], index: 0, kind: input, shape index: {}]   ;;  %s1511_s1 = inlined_call_operand.vmem [shape: f32[4,1], index: 1, kind: input, shape index: {}]   ;;  %s1512_s2 = inlined_call_operand.vmem [shape: f32[784,64], index: 2, kind: input, shape index: {}]   ;;  %s1513_s3 = inlined_call_operand.hbm [shape: f32[1,64], index: 3, kind: input, shape index: {}]   ;;  %s1514_s4 = inlined_call_operand.hbm [shape: f32[1,64], index: 4, kind: input, shape index: {}]   ;;  %s1515_s5 = inlined_call_operand.hbm [shape: f32[64,64], index: 5, kind: input, shape index: {}]   ;;  %s1516_s6 = inlined_call_operand.hbm [shape: f32[1,64], index: 6, kind: input, shape index: {}]   ;;  %s1517_s7 = inlined_call_operand.vmem [shape: f32[64,3], index: 7, kind: input, shape index: {}]   ;;  %s1518_s8 = inlined_call_operand.hbm [shape: f32[1,3], index: 8, kind: input, shape index: {}]   ;;  %s1519_s9 = inlined_call_operand.vmem [shape: f32[4,1], index: 9, kind: output, shape index: {0}]   ;;  %s1520_s10 = inlined_call_operand.vmem [shape: f32[4,1], index: 10, kind: output, shape index: {1}]  }
   0x1   :  { %17 = vsyncpa [#allocation5], 0 }
   0x2   :  { %18 = vsyncpa [#allocation8], 0  ;;  %s1058_s13 = smov [#allocation4]   ;;  %s1059_s15 = smov [#allocation7]  }
   0x3   :  { %s41_s14 = sshll.u32 %s1058_s13, 4  ;;  %s63_s16 = sshll.u32 %s1059_s15, 4  ;;  %s42_s14 = int_to_ptr.vmem [resolvable:$true] %s41_s14  ;;  %s64_s16 = int_to_ptr.vmem [resolvable:$true] %s63_s16 }
   0x4   :  { %s960_s17 = scalar_lea.vmem %s42_s14, 16  ;;  %s964_s18 = scalar_lea.vmem %s42_s14, 32 }
   0x5   :  { %p961_p0 = scmp.ne.s32.totalorder %s42_s14, %s960_s17  ;;  %p965_p1 = scmp.lt.s32.totalorder %s42_s14, %s42_s14 }
   0x6   :  { %p966_p2 = scmp.lt.s32.totalorder %s964_s18, %s960_s17 }
   0x8   :  { %p967_p3 = por %p966_p2, %p965_p1 }
   0xa   :  { %p968_p4 = pnand %p967_p3, %p961_p0 }
   0xc   :  { %971 = shalt.err (!%p968_p4)
}
   0xd   :  { %44 = dma.hbm_to_vmem [thread:$0]  %s1514_s4, 16, %s42_s14, [#allocation5]  }
   0xe   :  { %s980_s21 = scalar_lea.vmem %s64_s16, 16  ;;  %s984_s22 = scalar_lea.vmem %s64_s16, 32 }
   0xf   :  { %p981_p5 = scmp.ne.s32.totalorder %s64_s16, %s980_s21  ;;  %p985_p6 = scmp.lt.s32.totalorder %s64_s16, %s64_s16 }
  0x10   :  { %p986_p7 = scmp.lt.s32.totalorder %s984_s22, %s980_s21 }
  0x12   :  { %p987_p8 = por %p986_p7, %p985_p6 }
  0x14   :  { %p988_p9 = pnand %p987_p8, %p981_p5 }
  0x16   :  { %991 = shalt.err (!%p988_p9)
}
  0x17   :  { %66 = dma.hbm_to_vmem [thread:$0]  %s1516_s6, 16, %s64_s16, [#allocation8]  }
  0x18   :  { %s1060_s25 = smov [#allocation2]   ;;  %s1061_s27 = smov [#allocation6]  }
  0x19   :  { %s31_s26 = sshll.u32 %s1060_s25, 4  ;;  %s50_s28 = sshll.u32 %s1061_s27, 4  ;;  %s32_s26 = int_to_ptr.vmem [resolvable:$true] %s31_s26  ;;  %s51_s28 = int_to_ptr.vmem [resolvable:$true] %s50_s28 }
  0x1a   :  { %s1000_s29 = scalar_lea.vmem %s32_s26, 16  ;;  %s1004_s4 = scalar_lea.vmem %s32_s26, 32 }
  0x1b   :  { %p1001_p10 = scmp.ne.s32.totalorder %s32_s26, %s1000_s29  ;;  %p1005_p11 = scmp.lt.s32.totalorder %s32_s26, %s32_s26 }
  0x1c   :  { %p1006_p12 = scmp.lt.s32.totalorder %s1004_s4, %s1000_s29 }
  0x1e   :  { %p1007_p13 = por %p1006_p12, %p1005_p11 }
  0x20   :  { %p1008_p0 = pnand %p1007_p13, %p1001_p10 }
  0x22   :  { %1011 = shalt.err (!%p1008_p0)
}
  0x23   :  { %34 = dma.hbm_to_vmem [thread:$0]  %s1513_s3, 16, %s32_s26, [#allocation3]  }
  0x24   :  { %s1020_s12 = scalar_lea.vmem %s51_s28, 1024  ;;  %p1025_p2 = scmp.lt.s32.totalorder %s51_s28, %s51_s28 }
  0x25   :  { %p1021_p1 = scmp.ne.s32.totalorder %s51_s28, %s1020_s12  ;;  %p1026_p3 = scmp.lt.s32.totalorder %s1020_s12, %s1020_s12 }
  0x27   :  { %p1027_p4 = por %p1026_p3, %p1025_p2 }
  0x29   :  { %p1028_p5 = pnand %p1027_p4, %p1021_p1 }
  0x2b   :  { %1031 = shalt.err (!%p1028_p5)
}
  0x2c   :  { %s1062_s6 = smov 128   ;;  %s1063_s13 = smov 8  }
  0x2d   :  { %56 = dma.hbm_to_vmem [thread:$0]  %s1515_s5, 1024, %s51_s28, [#allocation5], %s1062_s6, %s1062_s6, %s1063_s13  }
  0x2e   :  { %s1064_s16 = smov [#allocation9]  }
  0x2f   :  { %s75_s17 = sshll.u32 %s1064_s16, 4  ;;  %s76_s17 = int_to_ptr.vmem [resolvable:$true] %s75_s17 }
  0x30   :  { %s1040_s18 = scalar_lea.vmem %s76_s17, 16  ;;  %s1044_s19 = scalar_lea.vmem %s76_s17, 32 }
  0x31   :  { %p1041_p6 = scmp.ne.s32.totalorder %s76_s17, %s1040_s18  ;;  %p1045_p7 = scmp.lt.s32.totalorder %s76_s17, %s76_s17 }
  0x32   :  { %p1046_p8 = scmp.lt.s32.totalorder %s1044_s19, %s1040_s18 }
  0x34   :  { %p1047_p9 = por %p1046_p8, %p1045_p7 }
  0x36   :  { %p1048_p10 = pnand %p1047_p9, %p1041_p6 }
  0x38   :  { %1051 = shalt.err (!%p1048_p10)
}
  0x39   :  { %78 = dma.hbm_to_vmem [thread:$0]  %s1518_s8, 16, %s76_s17, [#allocation8]  }
  0x3a   :  { %1052 = dma.done.wait [#allocation3], 16  }
  0x3b   :  { %1053 = vsyncadd [#allocation3], 4294967280 }
  0x3c   :  { %1054 = dma.done.wait [#allocation5], 1040  }
  0x3d   :  { %1055 = vsyncadd [#allocation5], 4294966256 }
  0x3e   :  { %1056 = dma.done.wait [#allocation8], 32  }
  0x3f   :  { %1057 = vsyncadd [#allocation8], 4294967264  ;;  %v1065_v0 = vmov 0   ;;  %v129_v1 = vld [vmem:[%s1512_s2 + $0xf8] sm:$0xff]  ;;  %v128_v3 = vld [vmem:[%s1512_s2 + $0xf0] sm:$0xff]  ;;  %vm220_vm0 = vcmask 130048  }
  0x40   :  { %944 = vset.pattern.permute.xlu0 %v1065_v0  ;;  %v113_v2 = vld [vmem:[%s1512_s2 + $0x78] sm:$0xff]  ;;  %762 = vmatprep.subr.mxu0 %v129_v1  ;;  %v112_v5 = vld [vmem:[%s1512_s2 + $0x70] sm:$0xff]  ;;  %v127_v7 = vld [vmem:[%s1512_s2 + $0xe8] sm:$0xff]  ;;  %vm1067_vm1 = vmmov 0   ;;  %vm529_vm3 = vcmask 523264   ;;  %vm698_vm7 = vcmask 19456  }
  0x41   :  { %v161_v4 = vld [vmem:[%s1512_s2 + $0x1f8] sm:$0xff]  ;;  %763 = vmatpush3.msra.mxu0 %v113_v2  ;;  %v160_v8 = vld [vmem:[%s1512_s2 + $0x1f0] sm:$0xff]  ;;  %v111_v9 = vld [vmem:[%s1512_s2 + $0x68] sm:$0xff]  ;;  %vm740_vm13 = vcmask 3072  }
  0x42   :  { %v145_v6 = vld [vmem:[%s1512_s2 + $0x178] sm:$0xff]  ;;  %797 = vmatprep.subr.mxu1 %v161_v4  ;;  %764 = vmatprep.subr.mxu0 %v128_v3  ;;  %v144_v10 = vld [vmem:[%s1512_s2 + $0x170] sm:$0xff]  ;;  %v159_v11 = vld [vmem:[%s1512_s2 + $0x1e8] sm:$0xff] }
  0x43   :  { %798 = vmatpush3.msra.mxu1 %v145_v6  ;;  %765 = vmatpush3.msra.mxu0 %v112_v5  ;;  %v126_v12 = vld [vmem:[%s1512_s2 + $0xe0] sm:$0xff]  ;;  %v143_v13 = vld [vmem:[%s1512_s2 + $0x168] sm:$0xff]  ;;  %v125_v16 = vld [vmem:[%s1512_s2 + $0xd8] sm:$0xff] }
  0x44   :  { %799 = vmatprep.subr.mxu1 %v160_v8  ;;  %766 = vmatprep.subr.mxu0 %v127_v7  ;;  %v110_v14 = vld [vmem:[%s1512_s2 + $0x60] sm:$0xff]  ;;  %v109_v18 = vld [vmem:[%s1512_s2 + $0x58] sm:$0xff]  ;;  %v124_v20 = vld [vmem:[%s1512_s2 + $0xd0] sm:$0xff] }
  0x45   :  { %800 = vmatpush3.msra.mxu1 %v144_v10  ;;  %v158_v15 = vld [vmem:[%s1512_s2 + $0x1e0] sm:$0xff]  ;;  %767 = vmatpush3.msra.mxu0 %v111_v9  ;;  %v157_v19 = vld [vmem:[%s1512_s2 + $0x1d8] sm:$0xff]  ;;  %v108_v22 = vld [vmem:[%s1512_s2 + $0x50] sm:$0xff] }
  0x46   :  { %801 = vmatprep.subr.mxu1 %v159_v11  ;;  %v142_v17 = vld [vmem:[%s1512_s2 + $0x160] sm:$0xff]  ;;  %768 = vmatprep.subr.mxu0 %v126_v12  ;;  %v141_v21 = vld [vmem:[%s1512_s2 + $0x158] sm:$0xff]  ;;  %v156_v23 = vld [vmem:[%s1512_s2 + $0x1d0] sm:$0xff] }
  0x47   :  { %802 = vmatpush3.msra.mxu1 %v143_v13  ;;  %769 = vmatpush3.msra.mxu0 %v110_v14  ;;  %v123_v24 = vld [vmem:[%s1512_s2 + $0xc8] sm:$0xff]  ;;  %v140_v25 = vld [vmem:[%s1512_s2 + $0x150] sm:$0xff]  ;;  %v122_v28 = vld [vmem:[%s1512_s2 + $0xc0] sm:$0xff] }
  0x48   :  { %803 = vmatprep.subr.mxu1 %v158_v15  ;;  %770 = vmatprep.subr.mxu0 %v125_v16  ;;  %v107_v26 = vld [vmem:[%s1512_s2 + $0x48] sm:$0xff]  ;;  %v106_v30 = vld [vmem:[%s1512_s2 + $0x40] sm:$0xff]  ;;  %v121_v32 = vld [vmem:[%s1512_s2 + $0xb8] sm:$0xff]  ;;  %v1066_v16 = vmov 0.0  }
  0x49   :  { %804 = vmatpush3.msra.mxu1 %v142_v17  ;;  %771 = vmatpush3.msra.mxu0 %v109_v18  ;;  %v155_v27 = vld [vmem:[%s1512_s2 + $0x1c8] sm:$0xff]  ;;  %v154_v31 = vld [vmem:[%s1512_s2 + $0x1c0] sm:$0xff]  ;;  %v105_v34 = vld [vmem:[%s1512_s2 + $0x38] sm:$0xff] }
  0x4a   :  { %805 = vmatprep.subr.mxu1 %v157_v19  ;;  %772 = vmatprep.subr.mxu0 %v124_v20  ;;  %v139_v29 = vld [vmem:[%s1512_s2 + $0x148] sm:$0xff]  ;;  %v138_v33 = vld [vmem:[%s1512_s2 + $0x140] sm:$0xff]  ;;  %v153_v35 = vld [vmem:[%s1512_s2 + $0x1b8] sm:$0xff] }
  0x4b   :  { %806 = vmatpush3.msra.mxu1 %v141_v21  ;;  %773 = vmatpush3.msra.mxu0 %v108_v22  ;;  %v120_v36 = vld [vmem:[%s1512_s2 + $0xb0] sm:$0xff]  ;;  %v137_v37 = vld [vmem:[%s1512_s2 + $0x138] sm:$0xff]  ;;  %v119_v40 = vld [vmem:[%s1512_s2 + $0xa8] sm:$0xff] }
  0x4c   :  { %807 = vmatprep.subr.mxu1 %v156_v23  ;;  %774 = vmatprep.subr.mxu0 %v123_v24  ;;  %v104_v38 = vld [vmem:[%s1512_s2 + $0x30] sm:$0xff]  ;;  %v103_v42 = vld [vmem:[%s1512_s2 + $0x28] sm:$0xff]  ;;  %v118_v44 = vld [vmem:[%s1512_s2 + $0xa0] sm:$0xff] }
  0x4d   :  { %808 = vmatpush3.msra.mxu1 %v140_v25  ;;  %775 = vmatpush3.msra.mxu0 %v107_v26  ;;  %v152_v39 = vld [vmem:[%s1512_s2 + $0x1b0] sm:$0xff]  ;;  %v151_v43 = vld [vmem:[%s1512_s2 + $0x1a8] sm:$0xff]  ;;  %v102_v46 = vld [vmem:[%s1512_s2 + $0x20] sm:$0xff] }
  0x4e   :  { %809 = vmatprep.subr.mxu1 %v155_v27  ;;  %776 = vmatprep.subr.mxu0 %v122_v28  ;;  %v136_v41 = vld [vmem:[%s1512_s2 + $0x130] sm:$0xff]  ;;  %v135_v45 = vld [vmem:[%s1512_s2 + $0x128] sm:$0xff]  ;;  %v150_v47 = vld [vmem:[%s1512_s2 + $0x1a0] sm:$0xff] }
  0x4f   :  { %810 = vmatpush3.msra.mxu1 %v139_v29  ;;  %777 = vmatpush3.msra.mxu0 %v106_v30  ;;  %v117_v48 = vld [vmem:[%s1512_s2 + $0x98] sm:$0xff]  ;;  %v134_v49 = vld [vmem:[%s1512_s2 + $0x120] sm:$0xff]  ;;  %v116_v52 = vld [vmem:[%s1512_s2 + $0x90] sm:$0xff] }
  0x50   :  { %811 = vmatprep.subr.mxu1 %v154_v31  ;;  %778 = vmatprep.subr.mxu0 %v121_v32  ;;  %v101_v50 = vld [vmem:[%s1512_s2 + $0x18] sm:$0xff]  ;;  %v94_v54 = vld [vmem:[%s1510_s0] sm:$0xff]  ;;  %v100_v55 = vld [vmem:[%s1512_s2 + $0x10] sm:$0xff] }
  0x51   :  { %812 = vmatpush3.msra.mxu1 %v138_v33  ;;  %779 = vmatpush3.msra.mxu0 %v105_v34  ;;  %v149_v51 = vld [vmem:[%s1512_s2 + $0x198] sm:$0xff]  ;;  %v148_v56 = vld [vmem:[%s1512_s2 + $0x190] sm:$0xff]  ;;  %v115_v57 = vld [vmem:[%s1512_s2 + $0x88] sm:$0xff]  ;;  %v214_v61 = vcombine.high %v94_v54, %v94_v54 }
  0x52   :  { %813 = vmatprep.subr.mxu1 %v153_v35  ;;  %780 = vmatprep.subr.mxu0 %v120_v36  ;;  %v133_v53 = vld [vmem:[%s1512_s2 + $0x118] sm:$0xff]  ;;  %v132_v58 = vld [vmem:[%s1512_s2 + $0x110] sm:$0xff]  ;;  %v99_v59 = vld [vmem:[%s1512_s2 + $0x8] sm:$0xff] }
  0x53   :  { %814 = vmatpush3.msra.mxu1 %v137_v37  ;;  %781 = vmatpush3.msra.mxu0 %v104_v38  ;;  %v147_v60 = vld [vmem:[%s1512_s2 + $0x188] sm:$0xff]  ;;  %v114_v62 = vld [vmem:[%s1512_s2 + $0x80] sm:$0xff]  ;;  %v193_v3 = vld [vmem:[%s1512_s2 + $0x2f8] sm:$0xff] }
  0x54   :  { %815 = vmatprep.subr.mxu1 %v152_v39  ;;  %782 = vmatprep.subr.mxu0 %v119_v40  ;;  %v95_v63 = vld [vmem:[%s1510_s0 + $0x8] sm:$0xff]  ;;  %v98_v0 = vld [vmem:[%s1512_s2] sm:$0xff]  ;;  %v177_v6 = vld [vmem:[%s1512_s2 + $0x278] sm:$0xff] }
  0x55   :  { %816 = vmatpush3.msra.mxu1 %v136_v41  ;;  %783 = vmatpush3.msra.mxu0 %v103_v42  ;;  %v131_v1 = vld [vmem:[%s1512_s2 + $0x108] sm:$0xff]  ;;  %v146_v2 = vld [vmem:[%s1512_s2 + $0x180] sm:$0xff]  ;;  %v215_v5 = vcombine.high %v95_v63, %v95_v63  ;;  %v1346_v7 = vld [vmem:[%s1510_s0 + $0x10] sm:$0xff] }
  0x56   :  { %817 = vmatprep.subr.mxu1 %v151_v43  ;;  %784 = vmatprep.subr.mxu0 %v118_v44  ;;  %v130_v4 = vld [vmem:[%s1512_s2 + $0x100] sm:$0xff]  ;;  %v192_v8 = vld [vmem:[%s1512_s2 + $0x2f0] sm:$0xff]  ;;  %v216_v9 = vcombine.high %v1346_v7, %v1346_v7  ;;  %v191_v11 = vld [vmem:[%s1512_s2 + $0x2e8] sm:$0xff] }
  0x57   :  { %818 = vmatpush3.msra.mxu1 %v135_v45  ;;  %785 = vmatpush3.msra.mxu0 %v102_v46  ;;  %v176_v10 = vld [vmem:[%s1512_s2 + $0x270] sm:$0xff]  ;;  %v175_v12 = vld [vmem:[%s1512_s2 + $0x268] sm:$0xff]  ;;  %v190_v14 = vld [vmem:[%s1512_s2 + $0x2e0] sm:$0xff] }
  0x58   :  { %819 = vmatprep.subr.mxu1 %v150_v47  ;;  %786 = vmatprep.subr.mxu0 %v117_v48  ;;  %v195_v13 = vld [vmem:[%s1512_s2 + $0x308] sm:$0xff]  ;;  %v174_v15 = vld [vmem:[%s1512_s2 + $0x260] sm:$0xff]  ;;  %v189_v18 = vld [vmem:[%s1512_s2 + $0x2d8] sm:$0xff] }
  0x59   :  { %820 = vmatpush3.msra.mxu1 %v134_v49  ;;  %787 = vmatpush3.msra.mxu0 %v101_v50  ;;  %v194_v17 = vld [vmem:[%s1512_s2 + $0x300] sm:$0xff]  ;;  %v173_v19 = vld [vmem:[%s1512_s2 + $0x258] sm:$0xff]  ;;  %v188_v21 = vld [vmem:[%s1512_s2 + $0x2d0] sm:$0xff] }
  0x5a   :  { %821 = vmatprep.subr.mxu1 %v149_v51  ;;  %788 = vmatprep.subr.mxu0 %v116_v52  ;;  %v97_v20 = vld [vmem:[%s1510_s0 + $0x18] sm:$0xf]  ;;  %v196_v22 = vld [vmem:[%s1511_s1] sm:$0xf]  ;;  %v172_v23 = vld [vmem:[%s1512_s2 + $0x250] sm:$0xff] }
  0x5b   :  { %822 = vmatpush3.msra.mxu1 %v133_v53  ;;  %789 = vmatpush3.msra.mxu0 %v100_v55  ;;  %v187_v24 = vld [vmem:[%s1512_s2 + $0x2c8] sm:$0xff]  ;;  %v186_v26 = vld [vmem:[%s1512_s2 + $0x2c0] sm:$0xff]  ;;  %v185_v28 = vld [vmem:[%s1512_s2 + $0x2b8] sm:$0xff] }
  0x5c   :  { %823 = vmatprep.subr.mxu1 %v148_v56  ;;  %790 = vmatprep.subr.mxu0 %v115_v57  ;;  %v171_v25 = vld [vmem:[%s1512_s2 + $0x248] sm:$0xff]  ;;  %v170_v27 = vld [vmem:[%s1512_s2 + $0x240] sm:$0xff]  ;;  %v169_v29 = vld [vmem:[%s1512_s2 + $0x238] sm:$0xff] }
  0x5d   :  { %824 = vmatpush3.msra.mxu1 %v132_v58  ;;  %791 = vmatpush3.msra.mxu0 %v99_v59  ;;  %v184_v30 = vld [vmem:[%s1512_s2 + $0x2b0] sm:$0xff]  ;;  %v183_v32 = vld [vmem:[%s1512_s2 + $0x2a8] sm:$0xff]  ;;  %v182_v34 = vld [vmem:[%s1512_s2 + $0x2a0] sm:$0xff] }
  0x5e   :  { %825 = vmatprep.subr.mxu1 %v147_v60  ;;  %792 = vmatprep.subr.mxu0 %v114_v62  ;;  %v168_v31 = vld [vmem:[%s1512_s2 + $0x230] sm:$0xff]  ;;  %v167_v33 = vld [vmem:[%s1512_s2 + $0x228] sm:$0xff]  ;;  %v166_v35 = vld [vmem:[%s1512_s2 + $0x220] sm:$0xff] }
  0x5f   :  { %287 = vmatprep.mubr.f32.mxu0 %v214_v61  ;;  %793 = vmatpush3.msra.mxu0 %v98_v0  ;;  %v181_v36 = vld [vmem:[%s1512_s2 + $0x298] sm:$0xff]  ;;  %v180_v38 = vld [vmem:[%s1512_s2 + $0x290] sm:$0xff]  ;;  %v179_v40 = vld [vmem:[%s1512_s2 + $0x288] sm:$0xff] }
  0x60   :  { %826 = vmatpush3.msra.mxu1 %v131_v1  ;;  %288 = vmatmul.mubr.f32.vlgmr.msra.gmra.mxu0 %v94_v54  ;;  %v165_v37 = vld [vmem:[%s1512_s2 + $0x218] sm:$0xff]  ;;  %v164_v39 = vld [vmem:[%s1512_s2 + $0x210] sm:$0xff]  ;;  %v163_v41 = vld [vmem:[%s1512_s2 + $0x208] sm:$0xff] }
  0x61   :  { %827 = vmatprep.subr.mxu1 %v146_v2  ;;  %832 = vmatprep.subr.mxu0 %v193_v3  ;;  %v178_v42 = vld [vmem:[%s1512_s2 + $0x280] sm:$0xff]  ;;  %v520_v45 = vld [vmem:[#allocation6 + $0x30] sm:$0xff]  ;;  %v519_v46 = vld [vmem:[#allocation6 + $0x28] sm:$0xff] }
  0x62   :  { %828 = vmatpush3.msra.mxu1 %v130_v4  ;;  %357 = vmatprep.mubr.f32.mxu1 %v215_v5  ;;  %v162_v43 = vld [vmem:[%s1512_s2 + $0x200] sm:$0xff]  ;;  %v516_v49 = vld [vmem:[#allocation6 + $0x10] sm:$0xff]  ;;  %v515_v50 = vld [vmem:[#allocation6 + $0x8] sm:$0xff] }
  0x63   :  { %833 = vmatpush3.msra.mxu0 %v177_v6  ;;  %358 = vmatmul.mubr.f32.vlgmr.msra.gmra.mxu1 %v95_v63  ;;  %v521_v44 = vld [vmem:[#allocation6 + $0x38] sm:$0xff]  ;;  %v518_v47 = vld [vmem:[#allocation6 + $0x20] sm:$0xff] }
  0x64   :  { %834 = vmatprep.subr.mxu0 %v192_v8  ;;  %427 = vmatprep.mubr.f32.mxu0 %v216_v9  ;;  %v517_v48 = vld [vmem:[#allocation6 + $0x18] sm:$0xff]  ;;  %v514_v51 = vld [vmem:[#allocation6] sm:$0xff] }
  0x65   :  { %835 = vmatpush3.msra.mxu0 %v176_v10  ;;  %888 = vmatprep.subr.mxu1 %v1066_v16  ;;  %v755_v57 = vld [vmem:[#allocation2] ss:$0 sm:$0xff]  ;;  %v757_v5 = vld [vmem:[#allocation4] ss:$0 sm:$0xff]  ;;  %v613_v9 = vld [vmem:[%s1517_s7 + $0x38] sm:$0xff] }
  0x66   :  { %836 = vmatprep.subr.mxu0 %v191_v11  ;;  %889 = vmatpush3.msra.mxu1 %v195_v13  ;;  %v612_v11 = vld [vmem:[%s1517_s7 + $0x30] sm:$0xff]  ;;  %v610_v13 = vld [vmem:[%s1517_s7 + $0x20] sm:$0xff] }
  0x67   :  { %837 = vmatpush3.msra.mxu0 %v175_v12  ;;  %890 = vmatprep.subr.mxu1 %v1066_v16  ;;  %v611_v12 = vld [vmem:[%s1517_s7 + $0x28] sm:$0xff] }
  0x68   :  { %838 = vmatprep.subr.mxu0 %v190_v14  ;;  %891 = vmatpush3.msra.mxu1 %v194_v17  ;;  %v609_v14 = vld [vmem:[%s1517_s7 + $0x18] sm:$0xff]  ;;  %v607_v17 = vld [vmem:[%s1517_s7 + $0x8] sm:$0xff] }
  0x69   :  { %839 = vmatpush3.msra.mxu0 %v174_v15  ;;  %892 = vmatprep.mubr.msk.f32.mxu1 %vm1067_vm1, %v1066_v16  ;;  %v608_v15 = vld [vmem:[%s1517_s7 + $0x10] sm:$0xff] }
  0x6a   :  { %840 = vmatprep.subr.mxu0 %v189_v18  ;;  %893 = vmatmul.mubr.msk.f32.vlgmr.msra.gmra.mxu1 %vm220_vm0, %v97_v20  ;;  %v606_v18 = vld [vmem:[%s1517_s7] sm:$0xff] }
  0x6b   :  { %841 = vmatpush3.msra.mxu0 %v173_v19  ;;  %200 = vperm.xlu0 %944, %v196_v22   ;;  %v758_v19 = vld [vmem:[#allocation7] ss:$0 sm:$0xff] }
  0x6c   :  { %842 = vmatprep.subr.mxu0 %v188_v21  ;;  %895 = vmatprep.subr.mxu1 %v1066_v16 }
  0x6d   :  { %843 = vmatpush3.msra.mxu0 %v172_v23  ;;  %911 = vmatprep.mubr.msk.f32.mxu1 %vm1067_vm1, %v1066_v16 }
  0x6e   :  { %844 = vmatprep.subr.mxu0 %v187_v24  ;;  %896 = vmatpush3.msra.mxu1 %v521_v44 }
  0x6f   :  { %845 = vmatpush3.msra.mxu0 %v171_v25  ;;  %897 = vmatprep.subr.mxu1 %v1066_v16  ;;  %v694_v25 = vlaneseq }
  0x70   :  { %846 = vmatprep.subr.mxu0 %v186_v26  ;;  %898 = vmatpush3.msra.mxu1 %v520_v45 }
  0x71   :  { %847 = vmatpush3.msra.mxu0 %v170_v27  ;;  %899 = vmatprep.subr.mxu1 %v1066_v16  ;;  %v695_v26 = vand.u32 127, %v694_v25  ;;  %v760_v27 = vld [vmem:[#allocation9] ss:$0 sm:$0xff] }
  0x72   :  { %848 = vmatprep.subr.mxu0 %v185_v28  ;;  %900 = vmatpush3.msra.mxu1 %v519_v46 }
  0x73   :  { %849 = vmatpush3.msra.mxu0 %v169_v29  ;;  %901 = vmatprep.subr.mxu1 %v1066_v16  ;;  %vm707_vm5 = vcmp.eq.s32.totalorder %v695_v26, 2  ;;  %vm696_vm6 = vcmp.eq.s32.totalorder %v695_v26, 0  ;;  %vm702_vm8 = vcmp.eq.s32.totalorder %v695_v26, 1 }
  0x74   :  { %850 = vmatprep.subr.mxu0 %v184_v30  ;;  %902 = vmatpush3.msra.mxu1 %v518_v47 }
  0x75   :  { %851 = vmatpush3.msra.mxu0 %v168_v31  ;;  %903 = vmatprep.subr.mxu1 %v1066_v16 }
  0x76   :  { %852 = vmatprep.subr.mxu0 %v183_v32  ;;  %904 = vmatpush3.msra.mxu1 %v517_v48 }
  0x77   :  { %853 = vmatpush3.msra.mxu0 %v167_v33  ;;  %905 = vmatprep.subr.mxu1 %v1066_v16 }
  0x78   :  { %854 = vmatprep.subr.mxu0 %v182_v34  ;;  %906 = vmatpush3.msra.mxu1 %v516_v49 }
  0x79   :  { %855 = vmatpush3.msra.mxu0 %v166_v35  ;;  %907 = vmatprep.subr.mxu1 %v1066_v16 }
  0x7a   :  { %856 = vmatprep.subr.mxu0 %v181_v36  ;;  %908 = vmatpush3.msra.mxu1 %v515_v50 }
  0x7b   :  { %857 = vmatpush3.msra.mxu0 %v165_v37  ;;  %909 = vmatprep.subr.mxu1 %v1066_v16 }
  0x7c   :  { %858 = vmatprep.subr.mxu0 %v180_v38  ;;  %910 = vmatpush3.msra.mxu1 %v514_v51 }
  0x7d   :  { %859 = vmatpush3.msra.mxu0 %v164_v39  ;;  %914 = vmatprep.subr.mxu1 %v1066_v16 }
  0x7e   :  { %860 = vmatprep.subr.mxu0 %v179_v40 }
  0x7f   :  { %861 = vmatpush3.msra.mxu0 %v163_v41 }
  0x80   :  { %862 = vmatprep.subr.mxu0 %v178_v42 }
  0x81   :  { %863 = vmatpush3.msra.mxu0 %v162_v43 }
  0x82   :  { %428 = vmatmul.mubr.f32.vlgmr.msra.gmra.mxu0 %v1346_v7 }
  0xe6   :  { %v201_v58 = vpop.permute.xlu0 %200 }
  0xe7   :  { %v209_v60 = vmul.f32 %v755_v57, %v201_v58  ;;  %v1068_v57 = vmov 1.0  }
 0x120   :  { %v794_v56 = vpop.f32.mrf.mxu0 }
 0x122   :  { %v795_v59 = vpop.f32.mrf.mxu0 }
 0x123   :  { %v829_v52 = vpop.f32.mrf.mxu1  ;;  %v796_v61 = vadd.f32 %v795_v59, %v794_v56 }
 0x125   :  { %v830_v53 = vpop.f32.mrf.mxu1  ;;  %v290_v62 = vadd.f32 %v796_v61, %v209_v60 }
 0x126   :  { %v831_v63 = vadd.f32 %v830_v53, %v829_v52 }
 0x128   :  { %v360_v2 = vadd.f32 %v831_v63, %v290_v62 }
 0x12a   :  { %v499_v54 = vpop.f32.mrf.mxu1 }
 0x12c   :  { %v894_v55 = vpop.f32.mrf.mxu1 }
 0x142   :  { %v864_v0 = vpop.f32.mrf.mxu0 }
 0x144   :  { %v865_v1 = vpop.f32.mrf.mxu0 }
 0x145   :  { %v866_v3 = vadd.f32 %v865_v1, %v864_v0 }
 0x147   :  { %v430_v4 = vadd.f32 %v866_v3, %v360_v2 }
 0x149   :  { %v500_v6 = vadd.f32 %v499_v54, %v430_v4 }
 0x14b   :  { %v510_v7 = vadd.f32 %v757_v5, %v500_v6 }
 0x14d   :  { %vm511_vm2 = vcmp.ge.f32.partialorder %v510_v7, 0.0  ;;  %v512_v8 = vmul.f32 0.2, %v510_v7 }
 0x14f   :  { %v513_v10 = vsel %vm511_vm2, %v510_v7, %v512_v8 }
 0x150   :  { %912 = vmatmul.mubr.msk.f32.vlgmr.msra.gmra.mxu1 %vm529_vm3, %v513_v10 }
 0x151   :  { %915 = vmatpush3.msra.mxu1 %v613_v9  ;;  %930 = vmatprep.mubr.msk.f32.mxu1 %vm1067_vm1, %v1066_v16 }
 0x152   :  { %916 = vmatprep.subr.mxu1 %v1066_v16 }
 0x153   :  { %917 = vmatpush3.msra.mxu1 %v612_v11 }
 0x154   :  { %918 = vmatprep.subr.mxu1 %v1066_v16 }
 0x155   :  { %919 = vmatpush3.msra.mxu1 %v611_v12 }
 0x156   :  { %920 = vmatprep.subr.mxu1 %v1066_v16 }
 0x157   :  { %921 = vmatpush3.msra.mxu1 %v610_v13 }
 0x158   :  { %922 = vmatprep.subr.mxu1 %v1066_v16 }
 0x159   :  { %923 = vmatpush3.msra.mxu1 %v609_v14 }
 0x15a   :  { %924 = vmatprep.subr.mxu1 %v1066_v16 }
 0x15b   :  { %925 = vmatpush3.msra.mxu1 %v608_v15 }
 0x15c   :  { %926 = vmatprep.subr.mxu1 %v1066_v16 }
 0x15d   :  { %927 = vmatpush3.msra.mxu1 %v607_v17 }
 0x15e   :  { %928 = vmatprep.subr.mxu1 %v1066_v16 }
 0x15f   :  { %929 = vmatpush3.msra.mxu1 %v606_v18 }
 0x210   :  { %v599_v20 = vpop.f32.mrf.mxu1 }
 0x211   :  { %v600_v21 = vadd.f32 %v758_v19, %v599_v20 }
 0x212   :  { %v913_v22 = vpop.f32.mrf.mxu1 }
 0x213   :  { %vm603_vm4 = vcmp.ge.f32.partialorder %v600_v21, 0.0  ;;  %v604_v23 = vmul.f32 0.2, %v600_v21 }
 0x215   :  { %v605_v24 = vsel %vm603_vm4, %v600_v21, %v604_v23 }
 0x216   :  { %931 = vmatmul.mubr.msk.f32.vlgmr.msra.gmra.mxu1 %vm529_vm3, %v605_v24 }
 0x2d6   :  { %v690_v28 = vpop.f32.mrf.mxu1 }
 0x2d7   :  { %v691_v29 = vadd.f32 %v760_v27, %v690_v28 }
 0x2d8   :  { %v932_v30 = vpop.f32.mrf.mxu1 }
 0x2d9   :  { %v708_v31 = vsel %vm707_vm5, %v691_v29, 0.0  ;;  %v697_v32 = vsel %vm696_vm6, %v691_v29, 0.0  ;;  %v703_v35 = vsel %vm702_vm8, %v691_v29, 0.0 }
 0x2da   :  { %v709_v33 = vsel %vm698_vm7, %v708_v31, 0.0  ;;  %v699_v34 = vsel %vm698_vm7, %v697_v32, 0.0  ;;  %v704_v36 = vsel %vm698_vm7, %v703_v35, 0.0 }
 0x2db   :  { %710 = vadd.xlane.f32.xlu1 %v709_v33  ;;  %700 = vadd.xlane.f32.xlu0 %v699_v34 }
 0x2df   :  { %705 = vadd.xlane.f32.xlu1 %v704_v36 }
 0x364   :  { %v711_v37 = vpop.xlane.xlu1 %710  ;;  %v701_v38 = vpop.xlane.xlu0 %700 }
 0x365   :  { %v712_v39 = vsub.f32 %v701_v38, %v711_v37  ;;  %v724_v45 = vadd.f32 %v711_v37, %v701_v38  ;;  %vm729_vm10 = vcmp.le.f32.partialorder %v701_v38, %v711_v37 }
 0x366   :  { %v730_v54 = vsel %vm729_vm10, 1.0, %v1066_v16  ;;  %v733_v58 = vsel %vm729_vm10, 0.0, %v1068_v57 }
 0x367   :  { %v713_v40 = vmul.f32 0.5, %v712_v39  ;;  %v725_v50 = vmul.f32 0.5, %v724_v45 }
 0x368   :  { %v706_v41 = vpop.xlane.xlu1 %705 }
 0x369   :  { %v714_v42 = vmul.f32 %v713_v40, %v713_v40  ;;  %v715_v43 = vmul.f32 %v706_v41, %v706_v41  ;;  %v727_v47 = vand.u32 2147483647, %v706_v41 }
 0x36b   :  { %v716_v44 = vadd.f32 %v715_v43, %v714_v42  ;;  %vm728_vm12 = vcmp.gt.f32.partialorder %v727_v47, 1e-12 }
 0x36c   :  { %v731_v55 = vsel %vm728_vm12, %v706_v41, %v730_v54 }
 0x36d   :  { %948 = vrsqrt.f32 %v716_v44  ;;  %vm719_vm9 = vcmp.eq.f32.partialorder %v716_v44, inf  ;;  %v722_v49 = vand.u32 2147483648, %v716_v44  ;;  %vm721_vm11 = vcmp.eq.f32.partialorder %v716_v44, 0.0 }
 0x36e   :  { %v735_v60 = vmul.f32 %v731_v55, %v731_v55 }
 0x37a   :  { %v949_v46 = vpop.eup %948 }
 0x37b   :  { %v718_v48 = vmul.f32 %v949_v46, %v716_v44 }
 0x37d   :  { %v720_v51 = vsel %vm719_vm9, %v716_v44, %v718_v48 }
 0x37e   :  { %v723_v52 = vsel %vm721_vm11, %v722_v49, %v720_v51 }
 0x37f   :  { %v726_v53 = vsub.f32 %v725_v50, %v723_v52 }
 0x381   :  { %v732_v56 = vsub.f32 %v726_v53, %v701_v38 }
 0x383   :  { %v734_v59 = vsel %vm728_vm12, %v732_v56, %v733_v58 }
 0x384   :  { %v736_v61 = vmul.f32 %v734_v59, %v734_v59 }
 0x386   :  { %v737_v62 = vadd.f32 %v736_v61, %v735_v60 }
 0x388   :  { %950 = vrsqrt.f32 %v737_v62 }
 0x395   :  { %v951_v63 = vpop.eup %950 }
 0x396   :  { %v739_v0 = vmul.f32 %v951_v63, %v731_v55  ;;  %v742_v1 = vmul.f32 %v951_v63, %v734_v59 }
 0x398   :  { %741 = vst.msk [vmem:[%s1519_s9] sm:$0xf] %vm740_vm13, %v739_v0  ;;  %743 = vst.msk [vmem:[%s1520_s10] sm:$0xf] %vm740_vm13, %v742_v1 }
 0x399   :  { %752 = vsyncpa [#allocation3], 1 }
 0x39a   :  { %753 = vsyncpa [#allocation5], 1 }
 0x39b   :  { %754 = vsyncpa [#allocation8], 1 }

// kernel: dann_forward.5
= control target key start
LH: loop header
LB: loop body
LE: loop exit
PB: predicated region body
PF: predicated region fallthrough
CT: control target
= control target key end

     0   :  { %s1155_s12 = smov 0   ;;  %s1541_s0 = inlined_call_operand.vmem [shape: f32[784,9], index: 0, kind: input, shape index: {}]   ;;  %s1542_s1 = inlined_call_operand.vmem [shape: f32[9,64], index: 1, kind: input, shape index: {}]   ;;  %s1543_s2 = inlined_call_operand.vmem [shape: f32[1,64], index: 2, kind: input, shape index: {}]   ;;  %s1544_s3 = inlined_call_operand.vmem [shape: f32[784,64], index: 3, kind: output, shape index: {}]  }
   0x1 LB: > { %s849_s13 = sadd.s32 4294967295, %s1131_s12   ;;  %p853_p0 = scmp.ge.s32.totalorder %s1131_s12, 1  ;;  %s1131_s12 = sphi %s1155_s12, %s13_s12  }
   0x2   : > { %p138_p1 = scmp.lt.s32.totalorder %s1131_s12, 3 }
   0x4   : > { %p139_p2 = pnand %p853_p0, %p138_p1 }
   0x5   : > { %s162_s18 = smul.u32 (!%p139_p2), 49, %s849_s13 }
   0x6   : > { %142 = sbr.rel (%p139_p2) target bundleno = 311 (0x137), region = 32 }
   0x7   : > { %p163_p3 = scmp.lt.s32.totalorder (!%p139_p2), %s162_s18, 97 }
   0xb   : > { %v224_v0 = vld [vmem:[%s1542_s1 + $0x8] sm:$0x1]  ;;  %vm380_vm0 = vcmask 1040384   ;;  %v1133_v1 = vmov 0.0   ;;  %v223_v2 = vld [vmem:[%s1542_s1] sm:$0xff]  ;;  %vm1134_vm1 = vmmov 0  }
   0xc   : > { %960 = vmatprep.subr.mxu0 %v1133_v1  ;;  %1111 = vmatprep.subr.mxu1 %v1133_v1  ;;  %s1546_s18 = smov (!%p163_p3, %s162_s18), 97  ;;  %vm232_vm2 = vcmask 72704   ;;  %v1382_v52 = vld [vmem:[%s1543_s2] ss:$0 sm:$0xff]  ;;  %vm743_vm3 = vcmask 523264  }
   0xd   : > { %961 = vmatpush3.msk.msra.mxu0 %vm380_vm0, %v224_v0  ;;  %1113 = vmatpush3.msk.msra.mxu1 %vm380_vm0, %v224_v0  ;;  %s854_s19 = sshll.u32 %s1546_s18, 3 }
   0xe   : > { %962 = vmatprep.subr.mxu0 %v1133_v1  ;;  %964 = vmatprep.mubr.msk.f32.mxu0 %vm1134_vm1, %v1133_v1  ;;  %s1185_s22 = scalar_lea.vmem %s1541_s0, %s854_s19  ;;  %s1391_s27 = scalar_lea.vmem %s1544_s3, %s854_s19 }
   0xf   : > { %963 = vmatpush3.msra.mxu0 %v223_v2  ;;  %1112 = vmatprep.subr.mxu1 %v1133_v1  ;;  %v174_v3 = vld [vmem:[%s1185_s22] sm:$0xff]  ;;  %v199_v4 = vld [vmem:[%s1185_s22 + $0xc8] sm:$0xff]  ;;  %v200_v6 = vld [vmem:[%s1185_s22 + $0xd0] sm:$0xff] }
  0x10   : > { %1114 = vmatpush3.msra.mxu1 %v223_v2  ;;  %1039 = vmatprep.mubr.msk.f32.mxu1 %vm1134_vm1, %v1133_v1  ;;  %v175_v5 = vld [vmem:[%s1185_s22 + $0x8] sm:$0xff]  ;;  %v176_v7 = vld [vmem:[%s1185_s22 + $0x10] sm:$0xff]  ;;  %v201_v8 = vld [vmem:[%s1185_s22 + $0xd8] sm:$0xff] }
  0x11   : > { %965 = vmatmul.mubr.msk.f32.vlgmr.msra.gmra.mxu0 %vm232_vm2, %v174_v3  ;;  %1040 = vmatmul.mubr.msk.f32.vlgmr.msra.gmra.mxu1 %vm232_vm2, %v199_v4  ;;  %v177_v9 = vld [vmem:[%s1185_s22 + $0x18] sm:$0xff]  ;;  %v202_v10 = vld [vmem:[%s1185_s22 + $0xe0] sm:$0xff]  ;;  %v203_v12 = vld [vmem:[%s1185_s22 + $0xe8] sm:$0xff] }
  0x12   : > { %967 = vmatprep.mubr.msk.f32.mxu0 %vm1134_vm1, %v1133_v1  ;;  %1042 = vmatprep.mubr.msk.f32.mxu1 %vm1134_vm1, %v1133_v1  ;;  %v178_v11 = vld [vmem:[%s1185_s22 + $0x20] sm:$0xff]  ;;  %v179_v13 = vld [vmem:[%s1185_s22 + $0x28] sm:$0xff]  ;;  %v204_v14 = vld [vmem:[%s1185_s22 + $0xf0] sm:$0xff] }
  0x13   : > { %v180_v15 = vld [vmem:[%s1185_s22 + $0x30] sm:$0xff]  ;;  %v205_v16 = vld [vmem:[%s1185_s22 + $0xf8] sm:$0xff]  ;;  %v206_v18 = vld [vmem:[%s1185_s22 + $0x100] sm:$0xff] }
  0x14   : > { %v181_v17 = vld [vmem:[%s1185_s22 + $0x38] sm:$0xff]  ;;  %v182_v19 = vld [vmem:[%s1185_s22 + $0x40] sm:$0xff]  ;;  %v207_v20 = vld [vmem:[%s1185_s22 + $0x108] sm:$0xff] }
  0x15   : > { %968 = vmatmul.mubr.msk.f32.gmra.mxu0 %vm232_vm2, %v175_v5  ;;  %1043 = vmatmul.mubr.msk.f32.gmra.mxu1 %vm232_vm2, %v200_v6  ;;  %v183_v21 = vld [vmem:[%s1185_s22 + $0x48] sm:$0xff]  ;;  %v208_v22 = vld [vmem:[%s1185_s22 + $0x110] sm:$0xff]  ;;  %v209_v24 = vld [vmem:[%s1185_s22 + $0x118] sm:$0xff] }
  0x16   : > { %970 = vmatprep.mubr.msk.f32.mxu0 %vm1134_vm1, %v1133_v1  ;;  %1045 = vmatprep.mubr.msk.f32.mxu1 %vm1134_vm1, %v1133_v1  ;;  %v184_v23 = vld [vmem:[%s1185_s22 + $0x50] sm:$0xff]  ;;  %v185_v25 = vld [vmem:[%s1185_s22 + $0x58] sm:$0xff]  ;;  %v210_v26 = vld [vmem:[%s1185_s22 + $0x120] sm:$0xff] }
  0x17   : > { %v186_v27 = vld [vmem:[%s1185_s22 + $0x60] sm:$0xff]  ;;  %v211_v28 = vld [vmem:[%s1185_s22 + $0x128] sm:$0xff]  ;;  %v212_v30 = vld [vmem:[%s1185_s22 + $0x130] sm:$0xff] }
  0x18   : > { %v187_v29 = vld [vmem:[%s1185_s22 + $0x68] sm:$0xff]  ;;  %v188_v31 = vld [vmem:[%s1185_s22 + $0x70] sm:$0xff]  ;;  %v213_v32 = vld [vmem:[%s1185_s22 + $0x138] sm:$0xff] }
  0x19   : > { %971 = vmatmul.mubr.msk.f32.gmra.mxu0 %vm232_vm2, %v176_v7  ;;  %1046 = vmatmul.mubr.msk.f32.gmra.mxu1 %vm232_vm2, %v201_v8  ;;  %v189_v33 = vld [vmem:[%s1185_s22 + $0x78] sm:$0xff]  ;;  %v214_v34 = vld [vmem:[%s1185_s22 + $0x140] sm:$0xff]  ;;  %v215_v36 = vld [vmem:[%s1185_s22 + $0x148] sm:$0xff] }
  0x1a   : > { %973 = vmatprep.mubr.msk.f32.mxu0 %vm1134_vm1, %v1133_v1  ;;  %1048 = vmatprep.mubr.msk.f32.mxu1 %vm1134_vm1, %v1133_v1  ;;  %v190_v35 = vld [vmem:[%s1185_s22 + $0x80] sm:$0xff]  ;;  %v191_v37 = vld [vmem:[%s1185_s22 + $0x88] sm:$0xff]  ;;  %v216_v38 = vld [vmem:[%s1185_s22 + $0x150] sm:$0xff] }
  0x1b   : > { %v192_v39 = vld [vmem:[%s1185_s22 + $0x90] sm:$0xff]  ;;  %v217_v40 = vld [vmem:[%s1185_s22 + $0x158] sm:$0xff]  ;;  %v218_v42 = vld [vmem:[%s1185_s22 + $0x160] sm:$0xff] }
  0x1c   : > { %v193_v41 = vld [vmem:[%s1185_s22 + $0x98] sm:$0xff]  ;;  %v194_v43 = vld [vmem:[%s1185_s22 + $0xa0] sm:$0xff]  ;;  %v219_v44 = vld [vmem:[%s1185_s22 + $0x168] sm:$0xff] }
  0x1d   : > { %974 = vmatmul.mubr.msk.f32.gmra.mxu0 %vm232_vm2, %v177_v9  ;;  %1049 = vmatmul.mubr.msk.f32.gmra.mxu1 %vm232_vm2, %v202_v10  ;;  %v195_v45 = vld [vmem:[%s1185_s22 + $0xa8] sm:$0xff]  ;;  %v220_v46 = vld [vmem:[%s1185_s22 + $0x170] sm:$0xff]  ;;  %v221_v48 = vld [vmem:[%s1185_s22 + $0x178] sm:$0xff] }
  0x1e   : > { %976 = vmatprep.mubr.msk.f32.mxu0 %vm1134_vm1, %v1133_v1  ;;  %1051 = vmatprep.mubr.msk.f32.mxu1 %vm1134_vm1, %v1133_v1  ;;  %v196_v47 = vld [vmem:[%s1185_s22 + $0xb0] sm:$0xff]  ;;  %v197_v49 = vld [vmem:[%s1185_s22 + $0xb8] sm:$0xff]  ;;  %v222_v50 = vld [vmem:[%s1185_s22 + $0x180] sm:$0xff] }
  0x1f   : > { %v198_v51 = vld [vmem:[%s1185_s22 + $0xc0] sm:$0xff] }
  0x21   : > { %977 = vmatmul.mubr.msk.f32.gmra.mxu0 %vm232_vm2, %v178_v11  ;;  %1052 = vmatmul.mubr.msk.f32.gmra.mxu1 %vm232_vm2, %v203_v12 }
  0x22   : > { %979 = vmatprep.mubr.msk.f32.mxu0 %vm1134_vm1, %v1133_v1  ;;  %1054 = vmatprep.mubr.msk.f32.mxu1 %vm1134_vm1, %v1133_v1 }
  0x25   : > { %980 = vmatmul.mubr.msk.f32.gmra.mxu0 %vm232_vm2, %v179_v13  ;;  %1055 = vmatmul.mubr.msk.f32.gmra.mxu1 %vm232_vm2, %v204_v14 }
  0x26   : > { %982 = vmatprep.mubr.msk.f32.mxu0 %vm1134_vm1, %v1133_v1  ;;  %1057 = vmatprep.mubr.msk.f32.mxu1 %vm1134_vm1, %v1133_v1 }
  0x29   : > { %983 = vmatmul.mubr.msk.f32.gmra.mxu0 %vm232_vm2, %v180_v15  ;;  %1058 = vmatmul.mubr.msk.f32.gmra.mxu1 %vm232_vm2, %v205_v16 }
  0x2a   : > { %985 = vmatprep.mubr.msk.f32.mxu0 %vm1134_vm1, %v1133_v1  ;;  %1060 = vmatprep.mubr.msk.f32.mxu1 %vm1134_vm1, %v1133_v1 }
  0x2d   : > { %986 = vmatmul.mubr.msk.f32.gmra.mxu0 %vm232_vm2, %v181_v17  ;;  %1061 = vmatmul.mubr.msk.f32.gmra.mxu1 %vm232_vm2, %v206_v18 }
  0x2e   : > { %988 = vmatprep.mubr.msk.f32.mxu0 %vm1134_vm1, %v1133_v1  ;;  %1063 = vmatprep.mubr.msk.f32.mxu1 %vm1134_vm1, %v1133_v1 }
  0x31   : > { %989 = vmatmul.mubr.msk.f32.gmra.mxu0 %vm232_vm2, %v182_v19  ;;  %1064 = vmatmul.mubr.msk.f32.gmra.mxu1 %vm232_vm2, %v207_v20 }
  0x32   : > { %991 = vmatprep.mubr.msk.f32.mxu0 %vm1134_vm1, %v1133_v1  ;;  %1066 = vmatprep.mubr.msk.f32.mxu1 %vm1134_vm1, %v1133_v1 }
  0x35   : > { %992 = vmatmul.mubr.msk.f32.gmra.mxu0 %vm232_vm2, %v183_v21  ;;  %1067 = vmatmul.mubr.msk.f32.gmra.mxu1 %vm232_vm2, %v208_v22 }
  0x36   : > { %994 = vmatprep.mubr.msk.f32.mxu0 %vm1134_vm1, %v1133_v1  ;;  %1069 = vmatprep.mubr.msk.f32.mxu1 %vm1134_vm1, %v1133_v1 }
  0x39   : > { %995 = vmatmul.mubr.msk.f32.gmra.mxu0 %vm232_vm2, %v184_v23  ;;  %1070 = vmatmul.mubr.msk.f32.gmra.mxu1 %vm232_vm2, %v209_v24 }
  0x3a   : > { %997 = vmatprep.mubr.msk.f32.mxu0 %vm1134_vm1, %v1133_v1  ;;  %1072 = vmatprep.mubr.msk.f32.mxu1 %vm1134_vm1, %v1133_v1 }
  0x3d   : > { %998 = vmatmul.mubr.msk.f32.gmra.mxu0 %vm232_vm2, %v185_v25  ;;  %1073 = vmatmul.mubr.msk.f32.gmra.mxu1 %vm232_vm2, %v210_v26 }
  0x3e   : > { %1000 = vmatprep.mubr.msk.f32.mxu0 %vm1134_vm1, %v1133_v1  ;;  %1075 = vmatprep.mubr.msk.f32.mxu1 %vm1134_vm1, %v1133_v1 }
  0x41   : > { %1001 = vmatmul.mubr.msk.f32.gmra.mxu0 %vm232_vm2, %v186_v27  ;;  %1076 = vmatmul.mubr.msk.f32.gmra.mxu1 %vm232_vm2, %v211_v28 }
  0x42   : > { %1003 = vmatprep.mubr.msk.f32.mxu0 %vm1134_vm1, %v1133_v1  ;;  %1078 = vmatprep.mubr.msk.f32.mxu1 %vm1134_vm1, %v1133_v1 }
  0x45   : > { %1004 = vmatmul.mubr.msk.f32.gmra.mxu0 %vm232_vm2, %v187_v29  ;;  %1079 = vmatmul.mubr.msk.f32.gmra.mxu1 %vm232_vm2, %v212_v30 }
  0x46   : > { %1006 = vmatprep.mubr.msk.f32.mxu0 %vm1134_vm1, %v1133_v1  ;;  %1081 = vmatprep.mubr.msk.f32.mxu1 %vm1134_vm1, %v1133_v1 }
  0x49   : > { %1007 = vmatmul.mubr.msk.f32.gmra.mxu0 %vm232_vm2, %v188_v31  ;;  %1082 = vmatmul.mubr.msk.f32.gmra.mxu1 %vm232_vm2, %v213_v32 }
  0x4a   : > { %1009 = vmatprep.mubr.msk.f32.mxu0 %vm1134_vm1, %v1133_v1  ;;  %1084 = vmatprep.mubr.msk.f32.mxu1 %vm1134_vm1, %v1133_v1 }
  0x4d   : > { %1010 = vmatmul.mubr.msk.f32.gmra.mxu0 %vm232_vm2, %v189_v33  ;;  %1085 = vmatmul.mubr.msk.f32.gmra.mxu1 %vm232_vm2, %v214_v34 }
  0x4e   : > { %1012 = vmatprep.mubr.msk.f32.mxu0 %vm1134_vm1, %v1133_v1  ;;  %1087 = vmatprep.mubr.msk.f32.mxu1 %vm1134_vm1, %v1133_v1 }
  0x51   : > { %1013 = vmatmul.mubr.msk.f32.gmra.mxu0 %vm232_vm2, %v190_v35  ;;  %1088 = vmatmul.mubr.msk.f32.gmra.mxu1 %vm232_vm2, %v215_v36 }
  0x52   : > { %1015 = vmatprep.mubr.msk.f32.mxu0 %vm1134_vm1, %v1133_v1  ;;  %1090 = vmatprep.mubr.msk.f32.mxu1 %vm1134_vm1, %v1133_v1 }
  0x55   : > { %1016 = vmatmul.mubr.msk.f32.gmra.mxu0 %vm232_vm2, %v191_v37  ;;  %1091 = vmatmul.mubr.msk.f32.gmra.mxu1 %vm232_vm2, %v216_v38 }
  0x56   : > { %1018 = vmatprep.mubr.msk.f32.mxu0 %vm1134_vm1, %v1133_v1  ;;  %1093 = vmatprep.mubr.msk.f32.mxu1 %vm1134_vm1, %v1133_v1 }
  0x59   : > { %1019 = vmatmul.mubr.msk.f32.gmra.mxu0 %vm232_vm2, %v192_v39  ;;  %1094 = vmatmul.mubr.msk.f32.gmra.mxu1 %vm232_vm2, %v217_v40 }
  0x5a   : > { %1021 = vmatprep.mubr.msk.f32.mxu0 %vm1134_vm1, %v1133_v1  ;;  %1096 = vmatprep.mubr.msk.f32.mxu1 %vm1134_vm1, %v1133_v1 }
  0x5d   : > { %1022 = vmatmul.mubr.msk.f32.gmra.mxu0 %vm232_vm2, %v193_v41  ;;  %1097 = vmatmul.mubr.msk.f32.gmra.mxu1 %vm232_vm2, %v218_v42 }
  0x5e   : > { %1024 = vmatprep.mubr.msk.f32.mxu0 %vm1134_vm1, %v1133_v1  ;;  %1099 = vmatprep.mubr.msk.f32.mxu1 %vm1134_vm1, %v1133_v1 }
  0x61   : > { %1025 = vmatmul.mubr.msk.f32.gmra.mxu0 %vm232_vm2, %v194_v43  ;;  %1100 = vmatmul.mubr.msk.f32.gmra.mxu1 %vm232_vm2, %v219_v44 }
  0x62   : > { %1027 = vmatprep.mubr.msk.f32.mxu0 %vm1134_vm1, %v1133_v1  ;;  %1102 = vmatprep.mubr.msk.f32.mxu1 %vm1134_vm1, %v1133_v1 }
  0x65   : > { %1028 = vmatmul.mubr.msk.f32.gmra.mxu0 %vm232_vm2, %v195_v45  ;;  %1103 = vmatmul.mubr.msk.f32.gmra.mxu1 %vm232_vm2, %v220_v46 }
  0x66   : > { %1030 = vmatprep.mubr.msk.f32.mxu0 %vm1134_vm1, %v1133_v1  ;;  %1105 = vmatprep.mubr.msk.f32.mxu1 %vm1134_vm1, %v1133_v1 }
  0x69   : > { %1031 = vmatmul.mubr.msk.f32.gmra.mxu0 %vm232_vm2, %v196_v47  ;;  %1106 = vmatmul.mubr.msk.f32.gmra.mxu1 %vm232_vm2, %v221_v48 }
  0x6a   : > { %1033 = vmatprep.mubr.msk.f32.mxu0 %vm1134_vm1, %v1133_v1  ;;  %1108 = vmatprep.mubr.msk.f32.mxu1 %vm1134_vm1, %v1133_v1 }
  0x6d   : > { %1034 = vmatmul.mubr.msk.f32.gmra.mxu0 %vm232_vm2, %v197_v49  ;;  %1109 = vmatmul.mubr.msk.f32.gmra.mxu1 %vm232_vm2, %v222_v50 }
  0x6e   : > { %1036 = vmatprep.mubr.msk.f32.mxu0 %vm1134_vm1, %v1133_v1 }
  0x71   : > { %1037 = vmatmul.mubr.msk.f32.gmra.mxu0 %vm232_vm2, %v198_v51 }
  0xd1   : > { %v450_v53 = vpop.f32.mrf.mxu0  ;;  %v575_v54 = vpop.f32.mrf.mxu1 }
  0xd2   : > { %v451_v55 = vadd.f32 %v1382_v52, %v450_v53  ;;  %v576_v56 = vadd.f32 %v1382_v52, %v575_v54 }
  0xd3   : > { %v966_v57 = vpop.f32.mrf.mxu0  ;;  %v1041_v58 = vpop.f32.mrf.mxu1 }
  0xd4   : > { %v694_v59 = vmax.f32 %v451_v55, 0.0  ;;  %v719_v60 = vmax.f32 %v576_v56, 0.0 }
  0xd5   : > { %v455_v61 = vpop.f32.mrf.mxu0  ;;  %v580_v62 = vpop.f32.mrf.mxu1 }
  0xd6   : > { %744 = vst.msk [vmem:[%s1391_s27] sm:$0xff] %vm743_vm3, %v694_v59  ;;  %769 = vst.msk [vmem:[%s1391_s27 + $0xc8] sm:$0xff] %vm743_vm3, %v719_v60  ;;  %v456_v63 = vadd.f32 %v1382_v52, %v455_v61  ;;  %v581_v0 = vadd.f32 %v1382_v52, %v580_v62 }
  0xd7   : > { %v969_v1 = vpop.f32.mrf.mxu0  ;;  %v1044_v2 = vpop.f32.mrf.mxu1 }
  0xd8   : > { %v695_v3 = vmax.f32 %v456_v63, 0.0  ;;  %v720_v4 = vmax.f32 %v581_v0, 0.0 }
  0xd9   : > { %v460_v5 = vpop.f32.mrf.mxu0  ;;  %v585_v6 = vpop.f32.mrf.mxu1 }
  0xda   : > { %745 = vst.msk [vmem:[%s1391_s27 + $0x8] sm:$0xff] %vm743_vm3, %v695_v3  ;;  %770 = vst.msk [vmem:[%s1391_s27 + $0xd0] sm:$0xff] %vm743_vm3, %v720_v4  ;;  %v461_v7 = vadd.f32 %v1382_v52, %v460_v5  ;;  %v586_v8 = vadd.f32 %v1382_v52, %v585_v6 }
  0xdb   : > { %v972_v9 = vpop.f32.mrf.mxu0  ;;  %v1047_v10 = vpop.f32.mrf.mxu1 }
  0xdc   : > { %v696_v11 = vmax.f32 %v461_v7, 0.0  ;;  %v721_v12 = vmax.f32 %v586_v8, 0.0 }
  0xdd   : > { %v465_v13 = vpop.f32.mrf.mxu0  ;;  %v590_v14 = vpop.f32.mrf.mxu1 }
  0xde   : > { %746 = vst.msk [vmem:[%s1391_s27 + $0x10] sm:$0xff] %vm743_vm3, %v696_v11  ;;  %771 = vst.msk [vmem:[%s1391_s27 + $0xd8] sm:$0xff] %vm743_vm3, %v721_v12  ;;  %v466_v15 = vadd.f32 %v1382_v52, %v465_v13  ;;  %v591_v16 = vadd.f32 %v1382_v52, %v590_v14 }
  0xdf   : > { %v975_v17 = vpop.f32.mrf.mxu0  ;;  %v1050_v18 = vpop.f32.mrf.mxu1 }
  0xe0   : > { %v697_v19 = vmax.f32 %v466_v15, 0.0  ;;  %v722_v20 = vmax.f32 %v591_v16, 0.0 }
  0xe1   : > { %v470_v21 = vpop.f32.mrf.mxu0  ;;  %v595_v22 = vpop.f32.mrf.mxu1 }
  0xe2   : > { %747 = vst.msk [vmem:[%s1391_s27 + $0x18] sm:$0xff] %vm743_vm3, %v697_v19  ;;  %772 = vst.msk [vmem:[%s1391_s27 + $0xe0] sm:$0xff] %vm743_vm3, %v722_v20  ;;  %v471_v23 = vadd.f32 %v1382_v52, %v470_v21  ;;  %v596_v24 = vadd.f32 %v1382_v52, %v595_v22 }
  0xe3   : > { %v978_v25 = vpop.f32.mrf.mxu0  ;;  %v1053_v26 = vpop.f32.mrf.mxu1 }
  0xe4   : > { %v698_v27 = vmax.f32 %v471_v23, 0.0  ;;  %v723_v28 = vmax.f32 %v596_v24, 0.0 }
  0xe5   : > { %v475_v29 = vpop.f32.mrf.mxu0  ;;  %v600_v30 = vpop.f32.mrf.mxu1 }
  0xe6   : > { %748 = vst.msk [vmem:[%s1391_s27 + $0x20] sm:$0xff] %vm743_vm3, %v698_v27  ;;  %773 = vst.msk [vmem:[%s1391_s27 + $0xe8] sm:$0xff] %vm743_vm3, %v723_v28  ;;  %v476_v31 = vadd.f32 %v1382_v52, %v475_v29  ;;  %v601_v32 = vadd.f32 %v1382_v52, %v600_v30 }
  0xe7   : > { %v981_v33 = vpop.f32.mrf.mxu0  ;;  %v1056_v34 = vpop.f32.mrf.mxu1 }
  0xe8   : > { %v699_v35 = vmax.f32 %v476_v31, 0.0  ;;  %v724_v36 = vmax.f32 %v601_v32, 0.0 }
  0xe9   : > { %v480_v37 = vpop.f32.mrf.mxu0  ;;  %v605_v38 = vpop.f32.mrf.mxu1 }
  0xea   : > { %749 = vst.msk [vmem:[%s1391_s27 + $0x28] sm:$0xff] %vm743_vm3, %v699_v35  ;;  %774 = vst.msk [vmem:[%s1391_s27 + $0xf0] sm:$0xff] %vm743_vm3, %v724_v36  ;;  %v481_v39 = vadd.f32 %v1382_v52, %v480_v37  ;;  %v606_v40 = vadd.f32 %v1382_v52, %v605_v38 }
  0xeb   : > { %v984_v41 = vpop.f32.mrf.mxu0  ;;  %v1059_v42 = vpop.f32.mrf.mxu1 }
  0xec   : > { %v700_v43 = vmax.f32 %v481_v39, 0.0  ;;  %v725_v44 = vmax.f32 %v606_v40, 0.0 }
  0xed   : > { %v485_v45 = vpop.f32.mrf.mxu0  ;;  %v610_v46 = vpop.f32.mrf.mxu1 }
  0xee   : > { %750 = vst.msk [vmem:[%s1391_s27 + $0x30] sm:$0xff] %vm743_vm3, %v700_v43  ;;  %775 = vst.msk [vmem:[%s1391_s27 + $0xf8] sm:$0xff] %vm743_vm3, %v725_v44  ;;  %v486_v47 = vadd.f32 %v1382_v52, %v485_v45  ;;  %v611_v48 = vadd.f32 %v1382_v52, %v610_v46 }
  0xef   : > { %v987_v49 = vpop.f32.mrf.mxu0  ;;  %v1062_v50 = vpop.f32.mrf.mxu1 }
  0xf0   : > { %v701_v51 = vmax.f32 %v486_v47, 0.0  ;;  %v726_v53 = vmax.f32 %v611_v48, 0.0 }
  0xf1   : > { %v490_v54 = vpop.f32.mrf.mxu0  ;;  %v615_v55 = vpop.f32.mrf.mxu1 }
  0xf2   : > { %751 = vst.msk [vmem:[%s1391_s27 + $0x38] sm:$0xff] %vm743_vm3, %v701_v51  ;;  %776 = vst.msk [vmem:[%s1391_s27 + $0x100] sm:$0xff] %vm743_vm3, %v726_v53  ;;  %v491_v56 = vadd.f32 %v1382_v52, %v490_v54  ;;  %v616_v57 = vadd.f32 %v1382_v52, %v615_v55 }
  0xf3   : > { %v990_v58 = vpop.f32.mrf.mxu0  ;;  %v1065_v59 = vpop.f32.mrf.mxu1 }
  0xf4   : > { %v702_v60 = vmax.f32 %v491_v56, 0.0  ;;  %v727_v61 = vmax.f32 %v616_v57, 0.0 }
  0xf5   : > { %v495_v62 = vpop.f32.mrf.mxu0  ;;  %v620_v63 = vpop.f32.mrf.mxu1 }
  0xf6   : > { %752 = vst.msk [vmem:[%s1391_s27 + $0x40] sm:$0xff] %vm743_vm3, %v702_v60  ;;  %777 = vst.msk [vmem:[%s1391_s27 + $0x108] sm:$0xff] %vm743_vm3, %v727_v61  ;;  %v496_v0 = vadd.f32 %v1382_v52, %v495_v62  ;;  %v621_v1 = vadd.f32 %v1382_v52, %v620_v63 }
  0xf7   : > { %v993_v2 = vpop.f32.mrf.mxu0  ;;  %v1068_v3 = vpop.f32.mrf.mxu1 }
  0xf8   : > { %v703_v4 = vmax.f32 %v496_v0, 0.0  ;;  %v728_v5 = vmax.f32 %v621_v1, 0.0 }
  0xf9   : > { %v500_v6 = vpop.f32.mrf.mxu0  ;;  %v625_v7 = vpop.f32.mrf.mxu1 }
  0xfa   : > { %753 = vst.msk [vmem:[%s1391_s27 + $0x48] sm:$0xff] %vm743_vm3, %v703_v4  ;;  %778 = vst.msk [vmem:[%s1391_s27 + $0x110] sm:$0xff] %vm743_vm3, %v728_v5  ;;  %v501_v8 = vadd.f32 %v1382_v52, %v500_v6  ;;  %v626_v9 = vadd.f32 %v1382_v52, %v625_v7 }
  0xfb   : > { %v996_v10 = vpop.f32.mrf.mxu0  ;;  %v1071_v11 = vpop.f32.mrf.mxu1 }
  0xfc   : > { %v704_v12 = vmax.f32 %v501_v8, 0.0  ;;  %v729_v13 = vmax.f32 %v626_v9, 0.0 }
  0xfd   : > { %v505_v14 = vpop.f32.mrf.mxu0  ;;  %v630_v15 = vpop.f32.mrf.mxu1 }
  0xfe   : > { %754 = vst.msk [vmem:[%s1391_s27 + $0x50] sm:$0xff] %vm743_vm3, %v704_v12  ;;  %779 = vst.msk [vmem:[%s1391_s27 + $0x118] sm:$0xff] %vm743_vm3, %v729_v13  ;;  %v506_v16 = vadd.f32 %v1382_v52, %v505_v14  ;;  %v631_v17 = vadd.f32 %v1382_v52, %v630_v15 }
  0xff   : > { %v999_v18 = vpop.f32.mrf.mxu0  ;;  %v1074_v19 = vpop.f32.mrf.mxu1 }
 0x100   : > { %v705_v20 = vmax.f32 %v506_v16, 0.0  ;;  %v730_v21 = vmax.f32 %v631_v17, 0.0 }
 0x101   : > { %v510_v22 = vpop.f32.mrf.mxu0  ;;  %v635_v23 = vpop.f32.mrf.mxu1 }
 0x102   : > { %755 = vst.msk [vmem:[%s1391_s27 + $0x58] sm:$0xff] %vm743_vm3, %v705_v20  ;;  %780 = vst.msk [vmem:[%s1391_s27 + $0x120] sm:$0xff] %vm743_vm3, %v730_v21  ;;  %v511_v24 = vadd.f32 %v1382_v52, %v510_v22  ;;  %v636_v25 = vadd.f32 %v1382_v52, %v635_v23 }
 0x103   : > { %v1002_v26 = vpop.f32.mrf.mxu0  ;;  %v1077_v27 = vpop.f32.mrf.mxu1 }
 0x104   : > { %v706_v28 = vmax.f32 %v511_v24, 0.0  ;;  %v731_v29 = vmax.f32 %v636_v25, 0.0 }
 0x105   : > { %v515_v30 = vpop.f32.mrf.mxu0  ;;  %v640_v31 = vpop.f32.mrf.mxu1 }
 0x106   : > { %756 = vst.msk [vmem:[%s1391_s27 + $0x60] sm:$0xff] %vm743_vm3, %v706_v28  ;;  %781 = vst.msk [vmem:[%s1391_s27 + $0x128] sm:$0xff] %vm743_vm3, %v731_v29  ;;  %v516_v32 = vadd.f32 %v1382_v52, %v515_v30  ;;  %v641_v33 = vadd.f32 %v1382_v52, %v640_v31 }
 0x107   : > { %v1005_v34 = vpop.f32.mrf.mxu0  ;;  %v1080_v35 = vpop.f32.mrf.mxu1 }
 0x108   : > { %v707_v36 = vmax.f32 %v516_v32, 0.0  ;;  %v732_v37 = vmax.f32 %v641_v33, 0.0 }
 0x109   : > { %v520_v38 = vpop.f32.mrf.mxu0  ;;  %v645_v39 = vpop.f32.mrf.mxu1 }
 0x10a   : > { %757 = vst.msk [vmem:[%s1391_s27 + $0x68] sm:$0xff] %vm743_vm3, %v707_v36  ;;  %782 = vst.msk [vmem:[%s1391_s27 + $0x130] sm:$0xff] %vm743_vm3, %v732_v37  ;;  %v521_v40 = vadd.f32 %v1382_v52, %v520_v38  ;;  %v646_v41 = vadd.f32 %v1382_v52, %v645_v39 }
 0x10b   : > { %v1008_v42 = vpop.f32.mrf.mxu0  ;;  %v1083_v43 = vpop.f32.mrf.mxu1 }
 0x10c   : > { %v708_v44 = vmax.f32 %v521_v40, 0.0  ;;  %v733_v45 = vmax.f32 %v646_v41, 0.0 }
 0x10d   : > { %v525_v46 = vpop.f32.mrf.mxu0  ;;  %v650_v47 = vpop.f32.mrf.mxu1 }
 0x10e   : > { %758 = vst.msk [vmem:[%s1391_s27 + $0x70] sm:$0xff] %vm743_vm3, %v708_v44  ;;  %783 = vst.msk [vmem:[%s1391_s27 + $0x138] sm:$0xff] %vm743_vm3, %v733_v45  ;;  %v526_v48 = vadd.f32 %v1382_v52, %v525_v46  ;;  %v651_v49 = vadd.f32 %v1382_v52, %v650_v47 }
 0x10f   : > { %v1011_v50 = vpop.f32.mrf.mxu0  ;;  %v1086_v51 = vpop.f32.mrf.mxu1 }
 0x110   : > { %v709_v53 = vmax.f32 %v526_v48, 0.0  ;;  %v734_v54 = vmax.f32 %v651_v49, 0.0 }
 0x111   : > { %v530_v55 = vpop.f32.mrf.mxu0  ;;  %v655_v56 = vpop.f32.mrf.mxu1 }
 0x112   : > { %759 = vst.msk [vmem:[%s1391_s27 + $0x78] sm:$0xff] %vm743_vm3, %v709_v53  ;;  %784 = vst.msk [vmem:[%s1391_s27 + $0x140] sm:$0xff] %vm743_vm3, %v734_v54  ;;  %v531_v57 = vadd.f32 %v1382_v52, %v530_v55  ;;  %v656_v58 = vadd.f32 %v1382_v52, %v655_v56 }
 0x113   : > { %v1014_v59 = vpop.f32.mrf.mxu0  ;;  %v1089_v60 = vpop.f32.mrf.mxu1 }
 0x114   : > { %v710_v61 = vmax.f32 %v531_v57, 0.0  ;;  %v735_v62 = vmax.f32 %v656_v58, 0.0 }
 0x115   : > { %v535_v63 = vpop.f32.mrf.mxu0  ;;  %v660_v0 = vpop.f32.mrf.mxu1 }
 0x116   : > { %760 = vst.msk [vmem:[%s1391_s27 + $0x80] sm:$0xff] %vm743_vm3, %v710_v61  ;;  %785 = vst.msk [vmem:[%s1391_s27 + $0x148] sm:$0xff] %vm743_vm3, %v735_v62  ;;  %v536_v1 = vadd.f32 %v1382_v52, %v535_v63  ;;  %v661_v2 = vadd.f32 %v1382_v52, %v660_v0 }
 0x117   : > { %v1017_v3 = vpop.f32.mrf.mxu0  ;;  %v1092_v4 = vpop.f32.mrf.mxu1 }
 0x118   : > { %v711_v5 = vmax.f32 %v536_v1, 0.0  ;;  %v736_v6 = vmax.f32 %v661_v2, 0.0 }
 0x119   : > { %v540_v7 = vpop.f32.mrf.mxu0  ;;  %v665_v8 = vpop.f32.mrf.mxu1 }
 0x11a   : > { %761 = vst.msk [vmem:[%s1391_s27 + $0x88] sm:$0xff] %vm743_vm3, %v711_v5  ;;  %786 = vst.msk [vmem:[%s1391_s27 + $0x150] sm:$0xff] %vm743_vm3, %v736_v6  ;;  %v541_v9 = vadd.f32 %v1382_v52, %v540_v7  ;;  %v666_v10 = vadd.f32 %v1382_v52, %v665_v8 }
 0x11b   : > { %v1020_v11 = vpop.f32.mrf.mxu0  ;;  %v1095_v12 = vpop.f32.mrf.mxu1 }
 0x11c   : > { %v712_v13 = vmax.f32 %v541_v9, 0.0  ;;  %v737_v14 = vmax.f32 %v666_v10, 0.0 }
 0x11d   : > { %v545_v15 = vpop.f32.mrf.mxu0  ;;  %v670_v16 = vpop.f32.mrf.mxu1 }
 0x11e   : > { %762 = vst.msk [vmem:[%s1391_s27 + $0x90] sm:$0xff] %vm743_vm3, %v712_v13  ;;  %787 = vst.msk [vmem:[%s1391_s27 + $0x158] sm:$0xff] %vm743_vm3, %v737_v14  ;;  %v546_v17 = vadd.f32 %v1382_v52, %v545_v15  ;;  %v671_v18 = vadd.f32 %v1382_v52, %v670_v16 }
 0x11f   : > { %v1023_v19 = vpop.f32.mrf.mxu0  ;;  %v1098_v20 = vpop.f32.mrf.mxu1 }
 0x120   : > { %v713_v21 = vmax.f32 %v546_v17, 0.0  ;;  %v738_v22 = vmax.f32 %v671_v18, 0.0 }
 0x121   : > { %v550_v23 = vpop.f32.mrf.mxu0  ;;  %v675_v24 = vpop.f32.mrf.mxu1 }
 0x122   : > { %763 = vst.msk [vmem:[%s1391_s27 + $0x98] sm:$0xff] %vm743_vm3, %v713_v21  ;;  %788 = vst.msk [vmem:[%s1391_s27 + $0x160] sm:$0xff] %vm743_vm3, %v738_v22  ;;  %v551_v25 = vadd.f32 %v1382_v52, %v550_v23  ;;  %v676_v26 = vadd.f32 %v1382_v52, %v675_v24 }
 0x123   : > { %v1026_v27 = vpop.f32.mrf.mxu0  ;;  %v1101_v28 = vpop.f32.mrf.mxu1 }
 0x124   : > { %v714_v29 = vmax.f32 %v551_v25, 0.0  ;;  %v739_v30 = vmax.f32 %v676_v26, 0.0 }
 0x125   : > { %v555_v31 = vpop.f32.mrf.mxu0  ;;  %v680_v32 = vpop.f32.mrf.mxu1 }
 0x126   : > { %764 = vst.msk [vmem:[%s1391_s27 + $0xa0] sm:$0xff] %vm743_vm3, %v714_v29  ;;  %789 = vst.msk [vmem:[%s1391_s27 + $0x168] sm:$0xff] %vm743_vm3, %v739_v30  ;;  %v556_v33 = vadd.f32 %v1382_v52, %v555_v31  ;;  %v681_v34 = vadd.f32 %v1382_v52, %v680_v32 }
 0x127   : > { %v1029_v35 = vpop.f32.mrf.mxu0  ;;  %v1104_v36 = vpop.f32.mrf.mxu1 }
 0x128   : > { %v715_v37 = vmax.f32 %v556_v33, 0.0  ;;  %v740_v38 = vmax.f32 %v681_v34, 0.0 }
 0x129   : > { %v560_v39 = vpop.f32.mrf.mxu0  ;;  %v685_v40 = vpop.f32.mrf.mxu1 }
 0x12a   : > { %765 = vst.msk [vmem:[%s1391_s27 + $0xa8] sm:$0xff] %vm743_vm3, %v715_v37  ;;  %790 = vst.msk [vmem:[%s1391_s27 + $0x170] sm:$0xff] %vm743_vm3, %v740_v38  ;;  %v561_v41 = vadd.f32 %v1382_v52, %v560_v39  ;;  %v686_v42 = vadd.f32 %v1382_v52, %v685_v40 }
 0x12b   : > { %v1032_v43 = vpop.f32.mrf.mxu0  ;;  %v1107_v44 = vpop.f32.mrf.mxu1 }
 0x12c   : > { %v716_v45 = vmax.f32 %v561_v41, 0.0  ;;  %v741_v46 = vmax.f32 %v686_v42, 0.0 }
 0x12d   : > { %v565_v47 = vpop.f32.mrf.mxu0  ;;  %v690_v48 = vpop.f32.mrf.mxu1 }
 0x12e   : > { %766 = vst.msk [vmem:[%s1391_s27 + $0xb0] sm:$0xff] %vm743_vm3, %v716_v45  ;;  %791 = vst.msk [vmem:[%s1391_s27 + $0x178] sm:$0xff] %vm743_vm3, %v741_v46  ;;  %v566_v49 = vadd.f32 %v1382_v52, %v565_v47  ;;  %v691_v50 = vadd.f32 %v1382_v52, %v690_v48 }
 0x12f   : > { %v1035_v51 = vpop.f32.mrf.mxu0  ;;  %v1110_v53 = vpop.f32.mrf.mxu1 }
 0x130   : > { %v717_v54 = vmax.f32 %v566_v49, 0.0  ;;  %v742_v55 = vmax.f32 %v691_v50, 0.0 }
 0x131   : > { %v570_v56 = vpop.f32.mrf.mxu0 }
 0x132   : > { %767 = vst.msk [vmem:[%s1391_s27 + $0xb8] sm:$0xff] %vm743_vm3, %v717_v54  ;;  %792 = vst.msk [vmem:[%s1391_s27 + $0x180] sm:$0xff] %vm743_vm3, %v742_v55  ;;  %v571_v57 = vadd.f32 %v1382_v52, %v570_v56 }
 0x133   : > { %v1038_v58 = vpop.f32.mrf.mxu0 }
 0x134   : > { %v718_v59 = vmax.f32 %v571_v57, 0.0 }
 0x136   : > { %768 = vst.msk [vmem:[%s1391_s27 + $0xc0] sm:$0xff] %vm743_vm3, %v718_v59 }
 0x137 PF: > { %s13_s12 = sadd.s32 1, %s1131_s12  }
 0x138   : > { %p10_p4 = scmp.ge.s32.totalorder %s13_s12, 4  }
 0x13a   :  { %12 = sbr.rel (!%p10_p4) target bundleno = 1 (0x1), region = 62 }

// kernel: dann_forward.6
= control target key start
LH: loop header
LB: loop body
LE: loop exit
PB: predicated region body
PF: predicated region fallthrough
CT: control target
= control target key end

     0   :  { %v1087_v0 = vmov 0.0   ;;  %vm1088_vm0 = vmmov 0   ;;  %vm218_vm1 = vcmask 523264   ;;  %vm913_vm2 = vcmask 519168   ;;  %s2074_s1 = inlined_call_operand.vmem [shape: f32[576,64], index: 1, kind: input, shape index: {}]   ;;  %s2075_s0 = inlined_call_operand.vmem [shape: f32[196,576], index: 0, kind: input, shape index: {}]   ;;  %s2076_s2 = inlined_call_operand.vmem [shape: f32[1,64], index: 2, kind: input, shape index: {}]   ;;  %s2077_s3 = inlined_call_operand.vmem [shape: f32[196,64], index: 3, kind: output, shape index: {}]  }
   0x1   :  { %294 = vmatprep.subr.mxu0 %v1087_v0  ;;  %484 = vmatprep.subr.mxu1 %v1087_v0  ;;  %v154_v1 = vld [vmem:[%s2074_s1 + $0x78] sm:$0xff]  ;;  %v153_v3 = vld [vmem:[%s2074_s1 + $0x70] sm:$0xff]  ;;  %v152_v5 = vld [vmem:[%s2074_s1 + $0x68] sm:$0xff] }
   0x2   :  { %v186_v2 = vld [vmem:[%s2074_s1 + $0x178] sm:$0xff]  ;;  %295 = vmatpush1.msra.mxu0 %v154_v1  ;;  %v185_v4 = vld [vmem:[%s2074_s1 + $0x170] sm:$0xff]  ;;  %v184_v6 = vld [vmem:[%s2074_s1 + $0x168] sm:$0xff] }
   0x3   :  { %485 = vmatpush1.msra.mxu1 %v186_v2  ;;  %296 = vmatprep.subr.mxu0 %v1087_v0  ;;  %v151_v7 = vld [vmem:[%s2074_s1 + $0x60] sm:$0xff]  ;;  %v150_v9 = vld [vmem:[%s2074_s1 + $0x58] sm:$0xff]  ;;  %v149_v11 = vld [vmem:[%s2074_s1 + $0x50] sm:$0xff] }
   0x4   :  { %486 = vmatprep.subr.mxu1 %v1087_v0  ;;  %297 = vmatpush1.msra.mxu0 %v153_v3  ;;  %v183_v8 = vld [vmem:[%s2074_s1 + $0x160] sm:$0xff]  ;;  %v182_v10 = vld [vmem:[%s2074_s1 + $0x158] sm:$0xff]  ;;  %v181_v12 = vld [vmem:[%s2074_s1 + $0x150] sm:$0xff] }
   0x5   :  { %487 = vmatpush1.msra.mxu1 %v185_v4  ;;  %298 = vmatprep.subr.mxu0 %v1087_v0  ;;  %v148_v13 = vld [vmem:[%s2074_s1 + $0x48] sm:$0xff]  ;;  %v147_v15 = vld [vmem:[%s2074_s1 + $0x40] sm:$0xff]  ;;  %v146_v17 = vld [vmem:[%s2074_s1 + $0x38] sm:$0xff] }
   0x6   :  { %488 = vmatprep.subr.mxu1 %v1087_v0  ;;  %299 = vmatpush1.msra.mxu0 %v152_v5  ;;  %v180_v14 = vld [vmem:[%s2074_s1 + $0x148] sm:$0xff]  ;;  %v179_v16 = vld [vmem:[%s2074_s1 + $0x140] sm:$0xff]  ;;  %v178_v18 = vld [vmem:[%s2074_s1 + $0x138] sm:$0xff] }
   0x7   :  { %489 = vmatpush1.msra.mxu1 %v184_v6  ;;  %300 = vmatprep.subr.mxu0 %v1087_v0  ;;  %v145_v19 = vld [vmem:[%s2074_s1 + $0x30] sm:$0xff]  ;;  %v144_v21 = vld [vmem:[%s2074_s1 + $0x28] sm:$0xff]  ;;  %v143_v23 = vld [vmem:[%s2074_s1 + $0x20] sm:$0xff] }
   0x8   :  { %490 = vmatprep.subr.mxu1 %v1087_v0  ;;  %301 = vmatpush1.msra.mxu0 %v151_v7  ;;  %v177_v20 = vld [vmem:[%s2074_s1 + $0x130] sm:$0xff]  ;;  %v176_v22 = vld [vmem:[%s2074_s1 + $0x128] sm:$0xff]  ;;  %v175_v24 = vld [vmem:[%s2074_s1 + $0x120] sm:$0xff] }
   0x9   :  { %491 = vmatpush1.msra.mxu1 %v183_v8  ;;  %302 = vmatprep.subr.mxu0 %v1087_v0  ;;  %v142_v25 = vld [vmem:[%s2074_s1 + $0x18] sm:$0xff]  ;;  %v141_v27 = vld [vmem:[%s2074_s1 + $0x10] sm:$0xff]  ;;  %v140_v29 = vld [vmem:[%s2074_s1 + $0x8] sm:$0xff] }
   0xa   :  { %492 = vmatprep.subr.mxu1 %v1087_v0  ;;  %303 = vmatpush1.msra.mxu0 %v150_v9  ;;  %v174_v26 = vld [vmem:[%s2074_s1 + $0x118] sm:$0xff]  ;;  %v173_v28 = vld [vmem:[%s2074_s1 + $0x110] sm:$0xff]  ;;  %v172_v30 = vld [vmem:[%s2074_s1 + $0x108] sm:$0xff] }
   0xb   :  { %493 = vmatpush1.msra.mxu1 %v182_v10  ;;  %304 = vmatprep.subr.mxu0 %v1087_v0  ;;  %v139_v31 = vld [vmem:[%s2074_s1] sm:$0xff]  ;;  %v170_v33 = vld [vmem:[%s2074_s1 + $0xf8] sm:$0xff]  ;;  %v169_v35 = vld [vmem:[%s2074_s1 + $0xf0] sm:$0xff] }
   0xc   :  { %494 = vmatprep.subr.mxu1 %v1087_v0  ;;  %305 = vmatpush1.msra.mxu0 %v149_v11  ;;  %v171_v32 = vld [vmem:[%s2074_s1 + $0x100] sm:$0xff]  ;;  %v202_v34 = vld [vmem:[%s2074_s1 + $0x1f8] sm:$0xff]  ;;  %v201_v36 = vld [vmem:[%s2074_s1 + $0x1f0] sm:$0xff] }
   0xd   :  { %495 = vmatpush1.msra.mxu1 %v181_v12  ;;  %306 = vmatprep.subr.mxu0 %v1087_v0  ;;  %v168_v37 = vld [vmem:[%s2074_s1 + $0xe8] sm:$0xff]  ;;  %v167_v39 = vld [vmem:[%s2074_s1 + $0xe0] sm:$0xff]  ;;  %v166_v41 = vld [vmem:[%s2074_s1 + $0xd8] sm:$0xff] }
   0xe   :  { %496 = vmatprep.subr.mxu1 %v1087_v0  ;;  %307 = vmatpush1.msra.mxu0 %v148_v13  ;;  %v200_v38 = vld [vmem:[%s2074_s1 + $0x1e8] sm:$0xff]  ;;  %v199_v40 = vld [vmem:[%s2074_s1 + $0x1e0] sm:$0xff]  ;;  %v198_v42 = vld [vmem:[%s2074_s1 + $0x1d8] sm:$0xff] }
   0xf   :  { %497 = vmatpush1.msra.mxu1 %v180_v14  ;;  %308 = vmatprep.subr.mxu0 %v1087_v0  ;;  %v165_v43 = vld [vmem:[%s2074_s1 + $0xd0] sm:$0xff]  ;;  %v164_v45 = vld [vmem:[%s2074_s1 + $0xc8] sm:$0xff]  ;;  %v163_v47 = vld [vmem:[%s2074_s1 + $0xc0] sm:$0xff] }
  0x10   :  { %498 = vmatprep.subr.mxu1 %v1087_v0  ;;  %309 = vmatpush1.msra.mxu0 %v147_v15  ;;  %v197_v44 = vld [vmem:[%s2074_s1 + $0x1d0] sm:$0xff]  ;;  %v196_v46 = vld [vmem:[%s2074_s1 + $0x1c8] sm:$0xff]  ;;  %v195_v48 = vld [vmem:[%s2074_s1 + $0x1c0] sm:$0xff] }
  0x11   :  { %499 = vmatpush1.msra.mxu1 %v179_v16  ;;  %310 = vmatprep.subr.mxu0 %v1087_v0  ;;  %v162_v49 = vld [vmem:[%s2074_s1 + $0xb8] sm:$0xff]  ;;  %v161_v51 = vld [vmem:[%s2074_s1 + $0xb0] sm:$0xff]  ;;  %v160_v53 = vld [vmem:[%s2074_s1 + $0xa8] sm:$0xff] }
  0x12   :  { %500 = vmatprep.subr.mxu1 %v1087_v0  ;;  %311 = vmatpush1.msra.mxu0 %v146_v17  ;;  %v194_v50 = vld [vmem:[%s2074_s1 + $0x1b8] sm:$0xff]  ;;  %v193_v52 = vld [vmem:[%s2074_s1 + $0x1b0] sm:$0xff]  ;;  %v192_v54 = vld [vmem:[%s2074_s1 + $0x1a8] sm:$0xff] }
  0x13   :  { %501 = vmatpush1.msra.mxu1 %v178_v18  ;;  %312 = vmatprep.subr.mxu0 %v1087_v0  ;;  %v159_v55 = vld [vmem:[%s2074_s1 + $0xa0] sm:$0xff]  ;;  %v158_v57 = vld [vmem:[%s2074_s1 + $0x98] sm:$0xff]  ;;  %v157_v59 = vld [vmem:[%s2074_s1 + $0x90] sm:$0xff] }
  0x14   :  { %502 = vmatprep.subr.mxu1 %v1087_v0  ;;  %313 = vmatpush1.msra.mxu0 %v145_v19  ;;  %v191_v56 = vld [vmem:[%s2074_s1 + $0x1a0] sm:$0xff]  ;;  %v190_v58 = vld [vmem:[%s2074_s1 + $0x198] sm:$0xff]  ;;  %v189_v60 = vld [vmem:[%s2074_s1 + $0x190] sm:$0xff] }
  0x15   :  { %503 = vmatpush1.msra.mxu1 %v177_v20  ;;  %314 = vmatprep.subr.mxu0 %v1087_v0  ;;  %v156_v61 = vld [vmem:[%s2074_s1 + $0x88] sm:$0xff]  ;;  %v155_v63 = vld [vmem:[%s2074_s1 + $0x80] sm:$0xff]  ;;  %v17_v3 = vld [vmem:[%s2075_s0 + $0x18] sm:$0xff] }
  0x16   :  { %504 = vmatprep.subr.mxu1 %v1087_v0  ;;  %315 = vmatpush1.msra.mxu0 %v144_v21  ;;  %v188_v62 = vld [vmem:[%s2074_s1 + $0x188] sm:$0xff]  ;;  %v187_v2 = vld [vmem:[%s2074_s1 + $0x180] sm:$0xff]  ;;  %v16_v5 = vld [vmem:[%s2075_s0 + $0x10] sm:$0xff] }
  0x17   :  { %505 = vmatpush1.msra.mxu1 %v176_v22  ;;  %316 = vmatprep.subr.mxu0 %v1087_v0  ;;  %v15_v1 = vld [vmem:[%s2075_s0 + $0x8] sm:$0xff]  ;;  %v14_v4 = vld [vmem:[%s2075_s0] sm:$0xff]  ;;  %v20_v6 = vld [vmem:[%s2075_s0 + $0x30] sm:$0xff] }
  0x18   :  { %506 = vmatprep.subr.mxu1 %v1087_v0  ;;  %317 = vmatpush1.msra.mxu0 %v143_v23  ;;  %v210_v7 = vld [vmem:[%s2074_s1 + $0x238] sm:$0xff]  ;;  %v22_v8 = vld [vmem:[%s2075_s0 + $0x40] sm:$0xff]  ;;  %v19_v9 = vld [vmem:[%s2075_s0 + $0x28] sm:$0xff] }
  0x19   :  { %507 = vmatpush1.msra.mxu1 %v175_v24  ;;  %318 = vmatprep.subr.mxu0 %v1087_v0  ;;  %v21_v10 = vld [vmem:[%s2075_s0 + $0x38] sm:$0xff]  ;;  %v27_v12 = vld [vmem:[%s2075_s0 + $0x68] sm:$0xff]  ;;  %v209_v13 = vld [vmem:[%s2074_s1 + $0x230] sm:$0xff] }
  0x1a   :  { %508 = vmatprep.subr.mxu1 %v1087_v0  ;;  %319 = vmatpush1.msra.mxu0 %v142_v25  ;;  %v25_v11 = vld [vmem:[%s2075_s0 + $0x58] sm:$0xff]  ;;  %v24_v14 = vld [vmem:[%s2075_s0 + $0x50] sm:$0xff]  ;;  %v26_v15 = vld [vmem:[%s2075_s0 + $0x60] sm:$0xff] }
  0x1b   :  { %509 = vmatpush1.msra.mxu1 %v174_v26  ;;  %320 = vmatprep.subr.mxu0 %v1087_v0  ;;  %v30_v16 = vld [vmem:[%s2075_s0 + $0x80] sm:$0xff]  ;;  %v32_v17 = vld [vmem:[%s2075_s0 + $0x90] sm:$0xff]  ;;  %v208_v18 = vld [vmem:[%s2074_s1 + $0x228] sm:$0xff] }
  0x1c   :  { %510 = vmatprep.subr.mxu1 %v1087_v0  ;;  %321 = vmatpush1.msra.mxu0 %v141_v27  ;;  %v29_v19 = vld [vmem:[%s2075_s0 + $0x78] sm:$0xff]  ;;  %v31_v20 = vld [vmem:[%s2075_s0 + $0x88] sm:$0xff]  ;;  %v207_v23 = vld [vmem:[%s2074_s1 + $0x220] sm:$0xff] }
  0x1d   :  { %511 = vmatpush1.msra.mxu1 %v173_v28  ;;  %322 = vmatprep.subr.mxu0 %v1087_v0  ;;  %v35_v21 = vld [vmem:[%s2075_s0 + $0xa8] sm:$0xff]  ;;  %v37_v22 = vld [vmem:[%s2075_s0 + $0xb8] sm:$0xff]  ;;  %v34_v24 = vld [vmem:[%s2075_s0 + $0xa0] sm:$0xff] }
  0x1e   :  { %512 = vmatprep.subr.mxu1 %v1087_v0  ;;  %323 = vmatpush1.msra.mxu0 %v140_v29  ;;  %v36_v25 = vld [vmem:[%s2075_s0 + $0xb0] sm:$0xff]  ;;  %v42_v27 = vld [vmem:[%s2075_s0 + $0xe0] sm:$0xff]  ;;  %v206_v28 = vld [vmem:[%s2074_s1 + $0x218] sm:$0xff] }
  0x1f   :  { %513 = vmatpush1.msra.mxu1 %v172_v30  ;;  %324 = vmatprep.subr.mxu0 %v1087_v0  ;;  %v40_v26 = vld [vmem:[%s2075_s0 + $0xd0] sm:$0xff]  ;;  %v39_v29 = vld [vmem:[%s2075_s0 + $0xc8] sm:$0xff]  ;;  %v41_v30 = vld [vmem:[%s2075_s0 + $0xd8] sm:$0xff] }
  0x20   :  { %514 = vmatprep.subr.mxu1 %v1087_v0  ;;  %325 = vmatpush1.msra.mxu0 %v139_v31  ;;  %v45_v31 = vld [vmem:[%s2075_s0 + $0xf8] sm:$0xff] }
  0x21   :  { %515 = vmatpush1.msra.mxu1 %v171_v32  ;;  %326 = vmatprep.subr.mxu0 %v1087_v0  ;;  %v47_v32 = vld [vmem:[%s2075_s0 + $0x108] sm:$0xff] }
  0x22   :  { %516 = vmatprep.subr.mxu1 %v1087_v0  ;;  %327 = vmatpush2.msra.mxu0 %v170_v33  ;;  %v205_v33 = vld [vmem:[%s2074_s1 + $0x210] sm:$0xff] }
  0x23   :  { %517 = vmatpush2.msra.mxu1 %v202_v34  ;;  %328 = vmatprep.subr.mxu0 %v1087_v0  ;;  %v44_v34 = vld [vmem:[%s2075_s0 + $0xf0] sm:$0xff] }
  0x24   :  { %518 = vmatprep.subr.mxu1 %v1087_v0  ;;  %329 = vmatpush2.msra.mxu0 %v169_v35  ;;  %v46_v35 = vld [vmem:[%s2075_s0 + $0x100] sm:$0xff] }
  0x25   :  { %519 = vmatpush2.msra.mxu1 %v201_v36  ;;  %330 = vmatprep.subr.mxu0 %v1087_v0  ;;  %v50_v36 = vld [vmem:[%s2075_s0 + $0x120] sm:$0xff] }
  0x26   :  { %520 = vmatprep.subr.mxu1 %v1087_v0  ;;  %331 = vmatpush2.msra.mxu0 %v168_v37  ;;  %v52_v37 = vld [vmem:[%s2075_s0 + $0x130] sm:$0xff] }
  0x27   :  { %521 = vmatpush2.msra.mxu1 %v200_v38  ;;  %332 = vmatprep.subr.mxu0 %v1087_v0  ;;  %v204_v38 = vld [vmem:[%s2074_s1 + $0x208] sm:$0xff] }
  0x28   :  { %522 = vmatprep.subr.mxu1 %v1087_v0  ;;  %333 = vmatpush2.msra.mxu0 %v167_v39  ;;  %v49_v39 = vld [vmem:[%s2075_s0 + $0x118] sm:$0xff] }
  0x29   :  { %523 = vmatpush2.msra.mxu1 %v199_v40  ;;  %334 = vmatprep.subr.mxu0 %v1087_v0  ;;  %v51_v40 = vld [vmem:[%s2075_s0 + $0x128] sm:$0xff] }
  0x2a   :  { %524 = vmatprep.subr.mxu1 %v1087_v0  ;;  %335 = vmatpush2.msra.mxu0 %v166_v41  ;;  %v55_v41 = vld [vmem:[%s2075_s0 + $0x148] sm:$0xff] }
  0x2b   :  { %525 = vmatpush2.msra.mxu1 %v198_v42  ;;  %336 = vmatprep.subr.mxu0 %v1087_v0  ;;  %v57_v42 = vld [vmem:[%s2075_s0 + $0x158] sm:$0xff] }
  0x2c   :  { %526 = vmatprep.subr.mxu1 %v1087_v0  ;;  %337 = vmatpush2.msra.mxu0 %v165_v43  ;;  %v203_v43 = vld [vmem:[%s2074_s1 + $0x200] sm:$0xff] }
  0x2d   :  { %527 = vmatpush2.msra.mxu1 %v197_v44  ;;  %338 = vmatprep.subr.mxu0 %v1087_v0  ;;  %v54_v44 = vld [vmem:[%s2075_s0 + $0x140] sm:$0xff] }
  0x2e   :  { %528 = vmatprep.subr.mxu1 %v1087_v0  ;;  %339 = vmatpush2.msra.mxu0 %v164_v45  ;;  %v56_v45 = vld [vmem:[%s2075_s0 + $0x150] sm:$0xff] }
  0x2f   :  { %529 = vmatpush2.msra.mxu1 %v196_v46  ;;  %340 = vmatprep.subr.mxu0 %v1087_v0  ;;  %v60_v46 = vld [vmem:[%s2075_s0 + $0x170] sm:$0xff] }
  0x30   :  { %530 = vmatprep.subr.mxu1 %v1087_v0  ;;  %341 = vmatpush2.msra.mxu0 %v163_v47  ;;  %v62_v47 = vld [vmem:[%s2075_s0 + $0x180] sm:$0xff] }
  0x31   :  { %531 = vmatpush2.msra.mxu1 %v195_v48  ;;  %342 = vmatprep.subr.mxu0 %v1087_v0  ;;  %v59_v48 = vld [vmem:[%s2075_s0 + $0x168] sm:$0xff] }
  0x32   :  { %532 = vmatprep.subr.mxu1 %v1087_v0  ;;  %343 = vmatpush2.msra.mxu0 %v162_v49  ;;  %v61_v49 = vld [vmem:[%s2075_s0 + $0x178] sm:$0xff] }
  0x33   :  { %533 = vmatpush2.msra.mxu1 %v194_v50  ;;  %344 = vmatprep.subr.mxu0 %v1087_v0  ;;  %v65_v50 = vld [vmem:[%s2075_s0 + $0x198] sm:$0xff] }
  0x34   :  { %534 = vmatprep.subr.mxu1 %v1087_v0  ;;  %345 = vmatpush2.msra.mxu0 %v161_v51  ;;  %v67_v51 = vld [vmem:[%s2075_s0 + $0x1a8] sm:$0xff] }
  0x35   :  { %535 = vmatpush2.msra.mxu1 %v193_v52  ;;  %346 = vmatprep.subr.mxu0 %v1087_v0  ;;  %v64_v52 = vld [vmem:[%s2075_s0 + $0x190] sm:$0xff] }
  0x36   :  { %536 = vmatprep.subr.mxu1 %v1087_v0  ;;  %347 = vmatpush2.msra.mxu0 %v160_v53  ;;  %v66_v53 = vld [vmem:[%s2075_s0 + $0x1a0] sm:$0xff] }
  0x37   :  { %537 = vmatpush2.msra.mxu1 %v192_v54  ;;  %348 = vmatprep.subr.mxu0 %v1087_v0  ;;  %v70_v54 = vld [vmem:[%s2075_s0 + $0x1c0] sm:$0xff] }
  0x38   :  { %538 = vmatprep.subr.mxu1 %v1087_v0  ;;  %349 = vmatpush2.msra.mxu0 %v159_v55  ;;  %v72_v55 = vld [vmem:[%s2075_s0 + $0x1d0] sm:$0xff] }
  0x39   :  { %539 = vmatpush2.msra.mxu1 %v191_v56  ;;  %350 = vmatprep.subr.mxu0 %v1087_v0  ;;  %v69_v56 = vld [vmem:[%s2075_s0 + $0x1b8] sm:$0xff] }
  0x3a   :  { %540 = vmatprep.subr.mxu1 %v1087_v0  ;;  %351 = vmatpush2.msra.mxu0 %v158_v57  ;;  %v71_v57 = vld [vmem:[%s2075_s0 + $0x1c8] sm:$0xff] }
  0x3b   :  { %541 = vmatpush2.msra.mxu1 %v190_v58  ;;  %352 = vmatprep.subr.mxu0 %v1087_v0  ;;  %v75_v58 = vld [vmem:[%s2075_s0 + $0x1e8] sm:$0xff] }
  0x3c   :  { %542 = vmatprep.subr.mxu1 %v1087_v0  ;;  %353 = vmatpush2.msra.mxu0 %v157_v59  ;;  %v77_v59 = vld [vmem:[%s2075_s0 + $0x1f8] sm:$0xff] }
  0x3d   :  { %543 = vmatpush2.msra.mxu1 %v189_v60  ;;  %354 = vmatprep.subr.mxu0 %v1087_v0  ;;  %v74_v60 = vld [vmem:[%s2075_s0 + $0x1e0] sm:$0xff] }
  0x3e   :  { %544 = vmatprep.subr.mxu1 %v1087_v0  ;;  %355 = vmatpush2.msra.mxu0 %v156_v61  ;;  %v76_v61 = vld [vmem:[%s2075_s0 + $0x1f0] sm:$0xff] }
  0x3f   :  { %545 = vmatpush2.msra.mxu1 %v188_v62  ;;  %356 = vmatprep.subr.mxu0 %v1087_v0  ;;  %v80_v62 = vld [vmem:[%s2075_s0 + $0x210] sm:$0xff] }
  0x40   :  { %546 = vmatprep.subr.mxu1 %v1087_v0  ;;  %357 = vmatpush2.msra.mxu0 %v155_v63  ;;  %v82_v63 = vld [vmem:[%s2075_s0 + $0x220] sm:$0xff] }
  0x41   :  { %358 = vmatprep.mubr.f32.mxu0 %v15_v1  ;;  %547 = vmatpush2.msra.mxu1 %v187_v2  ;;  %v79_v1 = vld [vmem:[%s2075_s0 + $0x208] sm:$0xff]  ;;  %v81_v2 = vld [vmem:[%s2075_s0 + $0x218] sm:$0xff] }
  0x42   :  { %548 = vmatprep.mubr.f32.mxu1 %v17_v3  ;;  %359 = vmatmul.mubr.f32.vlgmr.msra.gmra.mxu0 %v14_v4  ;;  %v85_v3 = vld [vmem:[%s2075_s0 + $0x238] sm:$0xff]  ;;  %v87_v4 = vld [vmem:[%s2075_s0 + $0x248] sm:$0xff] }
  0x43   :  { %549 = vmatmul.mubr.f32.vlgmr.msra.gmra.mxu1 %v16_v5  ;;  %978 = vmatprep.subr.mxu0 %v1087_v0  ;;  %v84_v5 = vld [vmem:[%s2075_s0 + $0x230] sm:$0xff] }
  0x44   :  { %363 = vmatprep.mubr.f32.mxu0 %v20_v6  ;;  %979 = vmatpush3.msra.mxu0 %v210_v7  ;;  %v86_v6 = vld [vmem:[%s2075_s0 + $0x240] sm:$0xff] }
  0x45   :  { %553 = vmatprep.mubr.f32.mxu1 %v22_v8  ;;  %1069 = vmatprep.subr.mxu1 %v1087_v0  ;;  %v92_v8 = vld [vmem:[%s2075_s0 + $0x270] sm:$0xff] }
  0x46   :  { %980 = vmatprep.subr.mxu0 %v1087_v0  ;;  %364 = vmatmul.mubr.f32.gmra.mxu0 %v19_v9  ;;  %v89_v9 = vld [vmem:[%s2075_s0 + $0x258] sm:$0xff] }
  0x47   :  { %554 = vmatmul.mubr.f32.gmra.mxu1 %v21_v10  ;;  %368 = vmatprep.mubr.f32.mxu0 %v25_v11  ;;  %v91_v10 = vld [vmem:[%s2075_s0 + $0x268] sm:$0xff] }
  0x48   :  { %1077 = vmatpush3.msra.mxu1 %v210_v7  ;;  %558 = vmatprep.mubr.f32.mxu1 %v27_v12  ;;  %v90_v7 = vld [vmem:[%s2075_s0 + $0x260] sm:$0xff]  ;;  %v95_v11 = vld [vmem:[%s2075_s0 + $0x288] sm:$0xff]  ;;  %v97_v12 = vld [vmem:[%s2075_s0 + $0x298] sm:$0xff] }
  0x49   :  { %981 = vmatpush3.msra.mxu0 %v209_v13  ;;  %1070 = vmatprep.subr.mxu1 %v1087_v0 }
  0x4a   :  { %982 = vmatprep.subr.mxu0 %v1087_v0  ;;  %369 = vmatmul.mubr.f32.gmra.mxu0 %v24_v14  ;;  %v96_v14 = vld [vmem:[%s2075_s0 + $0x290] sm:$0xff] }
  0x4b   :  { %559 = vmatmul.mubr.f32.gmra.mxu1 %v26_v15  ;;  %373 = vmatprep.mubr.f32.mxu0 %v30_v16  ;;  %v100_v15 = vld [vmem:[%s2075_s0 + $0x2b0] sm:$0xff]  ;;  %v102_v16 = vld [vmem:[%s2075_s0 + $0x2c0] sm:$0xff] }
  0x4c   :  { %563 = vmatprep.mubr.f32.mxu1 %v32_v17  ;;  %1078 = vmatpush3.msra.mxu1 %v209_v13  ;;  %v94_v13 = vld [vmem:[%s2075_s0 + $0x280] sm:$0xff]  ;;  %v99_v17 = vld [vmem:[%s2075_s0 + $0x2a8] sm:$0xff] }
  0x4d   :  { %983 = vmatpush3.msra.mxu0 %v208_v18  ;;  %1071 = vmatprep.subr.mxu1 %v1087_v0 }
  0x4e   :  { %984 = vmatprep.subr.mxu0 %v1087_v0  ;;  %374 = vmatmul.mubr.f32.gmra.mxu0 %v29_v19  ;;  %v105_v19 = vld [vmem:[%s2075_s0 + $0x2d8] sm:$0xff] }
  0x4f   :  { %564 = vmatmul.mubr.f32.gmra.mxu1 %v31_v20  ;;  %378 = vmatprep.mubr.f32.mxu0 %v35_v21  ;;  %v107_v20 = vld [vmem:[%s2075_s0 + $0x2e8] sm:$0xff]  ;;  %v104_v21 = vld [vmem:[%s2075_s0 + $0x2d0] sm:$0xff] }
  0x50   :  { %568 = vmatprep.mubr.f32.mxu1 %v37_v22  ;;  %1079 = vmatpush3.msra.mxu1 %v208_v18  ;;  %v101_v18 = vld [vmem:[%s2075_s0 + $0x2b8] sm:$0xff]  ;;  %v106_v22 = vld [vmem:[%s2075_s0 + $0x2e0] sm:$0xff] }
  0x51   :  { %985 = vmatpush3.msra.mxu0 %v207_v23  ;;  %1072 = vmatprep.subr.mxu1 %v1087_v0 }
  0x52   :  { %986 = vmatprep.subr.mxu0 %v1087_v0  ;;  %379 = vmatmul.mubr.f32.gmra.mxu0 %v34_v24  ;;  %v112_v24 = vld [vmem:[%s2075_s0 + $0x310] sm:$0xff] }
  0x53   :  { %569 = vmatmul.mubr.f32.gmra.mxu1 %v36_v25  ;;  %383 = vmatprep.mubr.f32.mxu0 %v40_v26  ;;  %v109_v25 = vld [vmem:[%s2075_s0 + $0x2f8] sm:$0xff]  ;;  %v111_v26 = vld [vmem:[%s2075_s0 + $0x308] sm:$0xff] }
  0x54   :  { %573 = vmatprep.mubr.f32.mxu1 %v42_v27  ;;  %1080 = vmatpush3.msra.mxu1 %v207_v23  ;;  %v110_v23 = vld [vmem:[%s2075_s0 + $0x300] sm:$0xff]  ;;  %v115_v27 = vld [vmem:[%s2075_s0 + $0x328] sm:$0xff] }
  0x55   :  { %987 = vmatpush3.msra.mxu0 %v206_v28  ;;  %1073 = vmatprep.subr.mxu1 %v1087_v0 }
  0x56   :  { %988 = vmatprep.subr.mxu0 %v1087_v0  ;;  %384 = vmatmul.mubr.f32.gmra.mxu0 %v39_v29  ;;  %v114_v29 = vld [vmem:[%s2075_s0 + $0x320] sm:$0xff] }
  0x57   :  { %574 = vmatmul.mubr.f32.gmra.mxu1 %v41_v30  ;;  %388 = vmatprep.mubr.f32.mxu0 %v45_v31  ;;  %v116_v30 = vld [vmem:[%s2075_s0 + $0x330] sm:$0xff] }
  0x58   :  { %578 = vmatprep.mubr.f32.mxu1 %v47_v32  ;;  %1081 = vmatpush3.msra.mxu1 %v206_v28  ;;  %v117_v28 = vld [vmem:[%s2075_s0 + $0x338] sm:$0xff]  ;;  %v120_v31 = vld [vmem:[%s2075_s0 + $0x350] sm:$0xff]  ;;  %v122_v32 = vld [vmem:[%s2075_s0 + $0x360] sm:$0xff] }
  0x59   :  { %989 = vmatpush3.msra.mxu0 %v205_v33  ;;  %1074 = vmatprep.subr.mxu1 %v1087_v0 }
  0x5a   :  { %990 = vmatprep.subr.mxu0 %v1087_v0  ;;  %389 = vmatmul.mubr.f32.gmra.mxu0 %v44_v34  ;;  %v121_v34 = vld [vmem:[%s2075_s0 + $0x358] sm:$0xff] }
  0x5b   :  { %579 = vmatmul.mubr.f32.gmra.mxu1 %v46_v35  ;;  %393 = vmatprep.mubr.f32.mxu0 %v50_v36  ;;  %v125_v35 = vld [vmem:[%s2075_s0 + $0x378] sm:$0xff]  ;;  %v127_v36 = vld [vmem:[%s2075_s0 + $0x388] sm:$0xff] }
  0x5c   :  { %583 = vmatprep.mubr.f32.mxu1 %v52_v37  ;;  %1082 = vmatpush3.msra.mxu1 %v205_v33  ;;  %v119_v33 = vld [vmem:[%s2075_s0 + $0x348] sm:$0xff]  ;;  %v124_v37 = vld [vmem:[%s2075_s0 + $0x370] sm:$0xff] }
  0x5d   :  { %991 = vmatpush3.msra.mxu0 %v204_v38  ;;  %1075 = vmatprep.subr.mxu1 %v1087_v0 }
  0x5e   :  { %992 = vmatprep.subr.mxu0 %v1087_v0  ;;  %394 = vmatmul.mubr.f32.gmra.mxu0 %v49_v39  ;;  %v130_v39 = vld [vmem:[%s2075_s0 + $0x3a0] sm:$0xff] }
  0x5f   :  { %584 = vmatmul.mubr.f32.gmra.mxu1 %v51_v40  ;;  %398 = vmatprep.mubr.f32.mxu0 %v55_v41  ;;  %v132_v40 = vld [vmem:[%s2075_s0 + $0x3b0] sm:$0xff]  ;;  %v129_v41 = vld [vmem:[%s2075_s0 + $0x398] sm:$0xff] }
  0x60   :  { %588 = vmatprep.mubr.f32.mxu1 %v57_v42  ;;  %1083 = vmatpush3.msra.mxu1 %v204_v38  ;;  %v126_v38 = vld [vmem:[%s2075_s0 + $0x380] sm:$0xff]  ;;  %v131_v42 = vld [vmem:[%s2075_s0 + $0x3a8] sm:$0xff] }
  0x61   :  { %993 = vmatpush3.msra.mxu0 %v203_v43  ;;  %1076 = vmatprep.subr.mxu1 %v1087_v0 }
  0x62   :  { %399 = vmatmul.mubr.f32.gmra.mxu0 %v54_v44  ;;  %1084 = vmatpush3.msra.mxu1 %v203_v43  ;;  %v135_v43 = vld [vmem:[%s2075_s0 + $0x3c8] sm:$0xf]  ;;  %v137_v44 = vld [vmem:[%s2075_s0 + $0x3d8] sm:$0xf] }
  0x63   :  { %589 = vmatmul.mubr.f32.gmra.mxu1 %v56_v45  ;;  %403 = vmatprep.mubr.f32.mxu0 %v60_v46  ;;  %v134_v45 = vld [vmem:[%s2075_s0 + $0x3c0] sm:$0xf]  ;;  %v136_v46 = vld [vmem:[%s2075_s0 + $0x3d0] sm:$0xf] }
  0x64   :  { %593 = vmatprep.mubr.f32.mxu1 %v62_v47  ;;  %v18_v47 = vld [vmem:[%s2075_s0 + $0x20] sm:$0xff] }
  0x66   :  { %404 = vmatmul.mubr.f32.gmra.mxu0 %v59_v48  ;;  %v83_v48 = vld [vmem:[%s2075_s0 + $0x228] sm:$0xff] }
  0x67   :  { %594 = vmatmul.mubr.f32.gmra.mxu1 %v61_v49  ;;  %408 = vmatprep.mubr.f32.mxu0 %v65_v50  ;;  %v23_v49 = vld [vmem:[%s2075_s0 + $0x48] sm:$0xff]  ;;  %v88_v50 = vld [vmem:[%s2075_s0 + $0x250] sm:$0xff] }
  0x68   :  { %598 = vmatprep.mubr.f32.mxu1 %v67_v51  ;;  %v28_v51 = vld [vmem:[%s2075_s0 + $0x70] sm:$0xff] }
  0x6a   :  { %409 = vmatmul.mubr.f32.gmra.mxu0 %v64_v52  ;;  %v93_v52 = vld [vmem:[%s2075_s0 + $0x278] sm:$0xff] }
  0x6b   :  { %599 = vmatmul.mubr.f32.gmra.mxu1 %v66_v53  ;;  %413 = vmatprep.mubr.f32.mxu0 %v70_v54  ;;  %v33_v53 = vld [vmem:[%s2075_s0 + $0x98] sm:$0xff]  ;;  %v98_v54 = vld [vmem:[%s2075_s0 + $0x2a0] sm:$0xff] }
  0x6c   :  { %603 = vmatprep.mubr.f32.mxu1 %v72_v55  ;;  %v38_v55 = vld [vmem:[%s2075_s0 + $0xc0] sm:$0xff] }
  0x6e   :  { %414 = vmatmul.mubr.f32.gmra.mxu0 %v69_v56  ;;  %v103_v56 = vld [vmem:[%s2075_s0 + $0x2c8] sm:$0xff] }
  0x6f   :  { %604 = vmatmul.mubr.f32.gmra.mxu1 %v71_v57  ;;  %418 = vmatprep.mubr.f32.mxu0 %v75_v58  ;;  %v43_v57 = vld [vmem:[%s2075_s0 + $0xe8] sm:$0xff]  ;;  %v108_v58 = vld [vmem:[%s2075_s0 + $0x2f0] sm:$0xff] }
  0x70   :  { %608 = vmatprep.mubr.f32.mxu1 %v77_v59  ;;  %v48_v59 = vld [vmem:[%s2075_s0 + $0x110] sm:$0xff] }
  0x72   :  { %419 = vmatmul.mubr.f32.gmra.mxu0 %v74_v60  ;;  %v113_v60 = vld [vmem:[%s2075_s0 + $0x318] sm:$0xff] }
  0x73   :  { %609 = vmatmul.mubr.f32.gmra.mxu1 %v76_v61  ;;  %423 = vmatprep.mubr.f32.mxu0 %v80_v62  ;;  %v53_v61 = vld [vmem:[%s2075_s0 + $0x138] sm:$0xff]  ;;  %v118_v62 = vld [vmem:[%s2075_s0 + $0x340] sm:$0xff] }
  0x74   :  { %613 = vmatprep.mubr.f32.mxu1 %v82_v63  ;;  %v58_v63 = vld [vmem:[%s2075_s0 + $0x160] sm:$0xff] }
  0x76   :  { %424 = vmatmul.mubr.f32.gmra.mxu0 %v79_v1  ;;  %v123_v1 = vld [vmem:[%s2075_s0 + $0x368] sm:$0xff] }
  0x77   :  { %614 = vmatmul.mubr.f32.gmra.mxu1 %v81_v2  ;;  %428 = vmatprep.mubr.f32.mxu0 %v85_v3  ;;  %v63_v2 = vld [vmem:[%s2075_s0 + $0x188] sm:$0xff]  ;;  %v128_v3 = vld [vmem:[%s2075_s0 + $0x390] sm:$0xff] }
  0x78   :  { %618 = vmatprep.mubr.f32.mxu1 %v87_v4  ;;  %v68_v4 = vld [vmem:[%s2075_s0 + $0x1b0] sm:$0xff] }
  0x7a   :  { %429 = vmatmul.mubr.f32.gmra.mxu0 %v84_v5  ;;  %v133_v5 = vld [vmem:[%s2075_s0 + $0x3b8] sm:$0xff] }
  0x7b   :  { %619 = vmatmul.mubr.f32.gmra.mxu1 %v86_v6  ;;  %433 = vmatprep.mubr.f32.mxu0 %v90_v7  ;;  %v73_v6 = vld [vmem:[%s2075_s0 + $0x1d8] sm:$0xff]  ;;  %v138_v7 = vld [vmem:[%s2075_s0 + $0x3e0] sm:$0xf] }
  0x7c   :  { %623 = vmatprep.mubr.f32.mxu1 %v92_v8  ;;  %v78_v8 = vld [vmem:[%s2075_s0 + $0x200] sm:$0xff] }
  0x7e   :  { %434 = vmatmul.mubr.f32.gmra.mxu0 %v89_v9  ;;  %v1858_v9 = vld [vmem:[%s2076_s2] ss:$0 sm:$0xff] }
  0x7f   :  { %624 = vmatmul.mubr.f32.gmra.mxu1 %v91_v10  ;;  %438 = vmatprep.mubr.f32.mxu0 %v95_v11 }
  0x80   :  { %628 = vmatprep.mubr.f32.mxu1 %v97_v12 }
  0x82   :  { %439 = vmatmul.mubr.f32.gmra.mxu0 %v94_v13 }
  0x83   :  { %629 = vmatmul.mubr.f32.gmra.mxu1 %v96_v14  ;;  %443 = vmatprep.mubr.f32.mxu0 %v100_v15 }
  0x84   :  { %633 = vmatprep.mubr.f32.mxu1 %v102_v16 }
  0x86   :  { %444 = vmatmul.mubr.f32.gmra.mxu0 %v99_v17 }
  0x87   :  { %634 = vmatmul.mubr.f32.gmra.mxu1 %v101_v18  ;;  %448 = vmatprep.mubr.f32.mxu0 %v105_v19 }
  0x88   :  { %638 = vmatprep.mubr.f32.mxu1 %v107_v20 }
  0x8a   :  { %449 = vmatmul.mubr.f32.gmra.mxu0 %v104_v21 }
  0x8b   :  { %639 = vmatmul.mubr.f32.gmra.mxu1 %v106_v22  ;;  %453 = vmatprep.mubr.f32.mxu0 %v110_v23 }
  0x8c   :  { %643 = vmatprep.mubr.f32.mxu1 %v112_v24 }
  0x8e   :  { %454 = vmatmul.mubr.f32.gmra.mxu0 %v109_v25 }
  0x8f   :  { %644 = vmatmul.mubr.f32.gmra.mxu1 %v111_v26  ;;  %458 = vmatprep.mubr.f32.mxu0 %v115_v27 }
  0x90   :  { %648 = vmatprep.mubr.f32.mxu1 %v117_v28 }
  0x92   :  { %459 = vmatmul.mubr.f32.gmra.mxu0 %v114_v29 }
  0x93   :  { %649 = vmatmul.mubr.f32.gmra.mxu1 %v116_v30  ;;  %463 = vmatprep.mubr.f32.mxu0 %v120_v31 }
  0x94   :  { %653 = vmatprep.mubr.f32.mxu1 %v122_v32 }
  0x96   :  { %464 = vmatmul.mubr.f32.gmra.mxu0 %v119_v33 }
  0x97   :  { %654 = vmatmul.mubr.f32.gmra.mxu1 %v121_v34  ;;  %468 = vmatprep.mubr.f32.mxu0 %v125_v35 }
  0x98   :  { %658 = vmatprep.mubr.f32.mxu1 %v127_v36 }
  0x9a   :  { %469 = vmatmul.mubr.f32.gmra.mxu0 %v124_v37 }
  0x9b   :  { %659 = vmatmul.mubr.f32.gmra.mxu1 %v126_v38  ;;  %473 = vmatprep.mubr.f32.mxu0 %v130_v39 }
  0x9c   :  { %663 = vmatprep.mubr.f32.mxu1 %v132_v40 }
  0x9e   :  { %474 = vmatmul.mubr.f32.gmra.mxu0 %v129_v41 }
  0x9f   :  { %664 = vmatmul.mubr.f32.gmra.mxu1 %v131_v42  ;;  %478 = vmatprep.mubr.f32.mxu0 %v135_v43 }
  0xa0   :  { %668 = vmatprep.mubr.f32.mxu1 %v137_v44 }
  0xa2   :  { %479 = vmatmul.mubr.f32.gmra.mxu0 %v134_v45 }
  0xa3   :  { %669 = vmatmul.mubr.f32.gmra.mxu1 %v136_v46  ;;  %994 = vmatprep.mubr.msk.f32.mxu0 %vm1088_vm0, %v1087_v0 }
  0xa4   :  { %1033 = vmatprep.mubr.msk.f32.mxu1 %vm1088_vm0, %v1087_v0 }
  0xa6   :  { %995 = vmatmul.mubr.msk.f32.vlgmr.msra.gmra.mxu0 %vm218_vm1, %v18_v47 }
  0xa7   :  { %1034 = vmatmul.mubr.msk.f32.vlgmr.msra.gmra.mxu1 %vm218_vm1, %v83_v48  ;;  %997 = vmatprep.mubr.msk.f32.mxu0 %vm1088_vm0, %v1087_v0 }
  0xa8   :  { %1036 = vmatprep.mubr.msk.f32.mxu1 %vm1088_vm0, %v1087_v0 }
  0xaa   :  { %998 = vmatmul.mubr.msk.f32.gmra.mxu0 %vm218_vm1, %v23_v49 }
  0xab   :  { %1037 = vmatmul.mubr.msk.f32.gmra.mxu1 %vm218_vm1, %v88_v50  ;;  %1000 = vmatprep.mubr.msk.f32.mxu0 %vm1088_vm0, %v1087_v0 }
  0xac   :  { %1039 = vmatprep.mubr.msk.f32.mxu1 %vm1088_vm0, %v1087_v0 }
  0xae   :  { %1001 = vmatmul.mubr.msk.f32.gmra.mxu0 %vm218_vm1, %v28_v51 }
  0xaf   :  { %1040 = vmatmul.mubr.msk.f32.gmra.mxu1 %vm218_vm1, %v93_v52  ;;  %1003 = vmatprep.mubr.msk.f32.mxu0 %vm1088_vm0, %v1087_v0 }
  0xb0   :  { %1042 = vmatprep.mubr.msk.f32.mxu1 %vm1088_vm0, %v1087_v0 }
  0xb2   :  { %1004 = vmatmul.mubr.msk.f32.gmra.mxu0 %vm218_vm1, %v33_v53 }
  0xb3   :  { %1043 = vmatmul.mubr.msk.f32.gmra.mxu1 %vm218_vm1, %v98_v54  ;;  %1006 = vmatprep.mubr.msk.f32.mxu0 %vm1088_vm0, %v1087_v0 }
  0xb4   :  { %1045 = vmatprep.mubr.msk.f32.mxu1 %vm1088_vm0, %v1087_v0 }
  0xb6   :  { %1007 = vmatmul.mubr.msk.f32.gmra.mxu0 %vm218_vm1, %v38_v55 }
  0xb7   :  { %1046 = vmatmul.mubr.msk.f32.gmra.mxu1 %vm218_vm1, %v103_v56  ;;  %1009 = vmatprep.mubr.msk.f32.mxu0 %vm1088_vm0, %v1087_v0 }
  0xb8   :  { %1048 = vmatprep.mubr.msk.f32.mxu1 %vm1088_vm0, %v1087_v0 }
  0xba   :  { %1010 = vmatmul.mubr.msk.f32.gmra.mxu0 %vm218_vm1, %v43_v57 }
  0xbb   :  { %1049 = vmatmul.mubr.msk.f32.gmra.mxu1 %vm218_vm1, %v108_v58  ;;  %1012 = vmatprep.mubr.msk.f32.mxu0 %vm1088_vm0, %v1087_v0 }
  0xbc   :  { %1051 = vmatprep.mubr.msk.f32.mxu1 %vm1088_vm0, %v1087_v0 }
  0xbe   :  { %1013 = vmatmul.mubr.msk.f32.gmra.mxu0 %vm218_vm1, %v48_v59 }
  0xbf   :  { %1052 = vmatmul.mubr.msk.f32.gmra.mxu1 %vm218_vm1, %v113_v60  ;;  %1015 = vmatprep.mubr.msk.f32.mxu0 %vm1088_vm0, %v1087_v0 }
  0xc0   :  { %1054 = vmatprep.mubr.msk.f32.mxu1 %vm1088_vm0, %v1087_v0 }
  0xc2   :  { %1016 = vmatmul.mubr.msk.f32.gmra.mxu0 %vm218_vm1, %v53_v61 }
  0xc3   :  { %1055 = vmatmul.mubr.msk.f32.gmra.mxu1 %vm218_vm1, %v118_v62  ;;  %1018 = vmatprep.mubr.msk.f32.mxu0 %vm1088_vm0, %v1087_v0 }
  0xc4   :  { %1057 = vmatprep.mubr.msk.f32.mxu1 %vm1088_vm0, %v1087_v0 }
  0xc6   :  { %1019 = vmatmul.mubr.msk.f32.gmra.mxu0 %vm218_vm1, %v58_v63 }
  0xc7   :  { %1058 = vmatmul.mubr.msk.f32.gmra.mxu1 %vm218_vm1, %v123_v1  ;;  %1021 = vmatprep.mubr.msk.f32.mxu0 %vm1088_vm0, %v1087_v0 }
  0xc8   :  { %1060 = vmatprep.mubr.msk.f32.mxu1 %vm1088_vm0, %v1087_v0 }
  0xca   :  { %1022 = vmatmul.mubr.msk.f32.gmra.mxu0 %vm218_vm1, %v63_v2 }
  0xcb   :  { %1061 = vmatmul.mubr.msk.f32.gmra.mxu1 %vm218_vm1, %v128_v3  ;;  %1024 = vmatprep.mubr.msk.f32.mxu0 %vm1088_vm0, %v1087_v0 }
  0xcc   :  { %1063 = vmatprep.mubr.msk.f32.mxu1 %vm1088_vm0, %v1087_v0 }
  0xce   :  { %1025 = vmatmul.mubr.msk.f32.gmra.mxu0 %vm218_vm1, %v68_v4 }
  0xcf   :  { %1064 = vmatmul.mubr.msk.f32.gmra.mxu1 %vm218_vm1, %v133_v5  ;;  %1027 = vmatprep.mubr.msk.f32.mxu0 %vm1088_vm0, %v1087_v0 }
  0xd0   :  { %1066 = vmatprep.mubr.msk.f32.mxu1 %vm1088_vm0, %v1087_v0 }
  0xd2   :  { %1028 = vmatmul.mubr.msk.f32.gmra.mxu0 %vm218_vm1, %v73_v6 }
  0xd3   :  { %1067 = vmatmul.mubr.msk.f32.gmra.mxu1 %vm218_vm1, %v138_v7  ;;  %1030 = vmatprep.mubr.msk.f32.mxu0 %vm1088_vm0, %v1087_v0 }
  0xd6   :  { %1031 = vmatmul.mubr.msk.f32.gmra.mxu0 %vm218_vm1, %v78_v8 }
 0x102   :  { %v360_v10 = vpop.f32.mrf.mxu0 }
 0x103   :  { %v550_v11 = vpop.f32.mrf.mxu1  ;;  %v361_v12 = vadd.f32 %v1858_v9, %v360_v10 }
 0x104   :  { %v362_v13 = vpop.f32.mrf.mxu0 }
 0x105   :  { %v552_v14 = vpop.f32.mrf.mxu1  ;;  %v1861_v15 = vadd.f32 %v550_v11, %v361_v12 }
 0x106   :  { %v365_v0 = vpop.f32.mrf.mxu0 }
 0x107   :  { %v555_v16 = vpop.f32.mrf.mxu1  ;;  %v366_v17 = vadd.f32 %v1858_v9, %v365_v0 }
 0x108   :  { %v367_v18 = vpop.f32.mrf.mxu0 }
 0x109   :  { %v557_v19 = vpop.f32.mrf.mxu1  ;;  %v1864_v20 = vadd.f32 %v555_v16, %v366_v17 }
 0x10a   :  { %v370_v21 = vpop.f32.mrf.mxu0 }
 0x10b   :  { %v560_v22 = vpop.f32.mrf.mxu1  ;;  %v371_v23 = vadd.f32 %v1858_v9, %v370_v21 }
 0x10c   :  { %v372_v24 = vpop.f32.mrf.mxu0 }
 0x10d   :  { %v562_v25 = vpop.f32.mrf.mxu1  ;;  %v1867_v26 = vadd.f32 %v560_v22, %v371_v23 }
 0x10e   :  { %v375_v27 = vpop.f32.mrf.mxu0 }
 0x10f   :  { %v565_v28 = vpop.f32.mrf.mxu1  ;;  %v376_v29 = vadd.f32 %v1858_v9, %v375_v27 }
 0x110   :  { %v377_v30 = vpop.f32.mrf.mxu0 }
 0x111   :  { %v567_v31 = vpop.f32.mrf.mxu1  ;;  %v1870_v32 = vadd.f32 %v565_v28, %v376_v29 }
 0x112   :  { %v380_v33 = vpop.f32.mrf.mxu0 }
 0x113   :  { %v570_v34 = vpop.f32.mrf.mxu1  ;;  %v381_v35 = vadd.f32 %v1858_v9, %v380_v33 }
 0x114   :  { %v382_v36 = vpop.f32.mrf.mxu0 }
 0x115   :  { %v572_v37 = vpop.f32.mrf.mxu1  ;;  %v1873_v38 = vadd.f32 %v570_v34, %v381_v35 }
 0x116   :  { %v385_v39 = vpop.f32.mrf.mxu0 }
 0x117   :  { %v575_v40 = vpop.f32.mrf.mxu1  ;;  %v386_v41 = vadd.f32 %v1858_v9, %v385_v39 }
 0x118   :  { %v387_v42 = vpop.f32.mrf.mxu0 }
 0x119   :  { %v577_v43 = vpop.f32.mrf.mxu1  ;;  %v1876_v44 = vadd.f32 %v575_v40, %v386_v41 }
 0x11a   :  { %v390_v45 = vpop.f32.mrf.mxu0 }
 0x11b   :  { %v580_v46 = vpop.f32.mrf.mxu1  ;;  %v391_v47 = vadd.f32 %v1858_v9, %v390_v45 }
 0x11c   :  { %v392_v48 = vpop.f32.mrf.mxu0 }
 0x11d   :  { %v582_v49 = vpop.f32.mrf.mxu1  ;;  %v1879_v50 = vadd.f32 %v580_v46, %v391_v47 }
 0x11e   :  { %v395_v51 = vpop.f32.mrf.mxu0 }
 0x11f   :  { %v585_v52 = vpop.f32.mrf.mxu1  ;;  %v396_v53 = vadd.f32 %v1858_v9, %v395_v51 }
 0x120   :  { %v397_v54 = vpop.f32.mrf.mxu0 }
 0x121   :  { %v587_v55 = vpop.f32.mrf.mxu1  ;;  %v1882_v56 = vadd.f32 %v585_v52, %v396_v53 }
 0x122   :  { %v400_v57 = vpop.f32.mrf.mxu0 }
 0x123   :  { %v590_v58 = vpop.f32.mrf.mxu1  ;;  %v401_v59 = vadd.f32 %v1858_v9, %v400_v57 }
 0x124   :  { %v402_v60 = vpop.f32.mrf.mxu0 }
 0x125   :  { %v592_v61 = vpop.f32.mrf.mxu1  ;;  %v1885_v62 = vadd.f32 %v590_v58, %v401_v59 }
 0x126   :  { %v405_v63 = vpop.f32.mrf.mxu0 }
 0x127   :  { %v595_v1 = vpop.f32.mrf.mxu1  ;;  %v406_v2 = vadd.f32 %v1858_v9, %v405_v63 }
 0x128   :  { %v407_v3 = vpop.f32.mrf.mxu0 }
 0x129   :  { %v597_v4 = vpop.f32.mrf.mxu1  ;;  %v1888_v5 = vadd.f32 %v595_v1, %v406_v2 }
 0x12a   :  { %v410_v6 = vpop.f32.mrf.mxu0 }
 0x12b   :  { %v600_v7 = vpop.f32.mrf.mxu1  ;;  %v411_v8 = vadd.f32 %v1858_v9, %v410_v6 }
 0x12c   :  { %v412_v10 = vpop.f32.mrf.mxu0 }
 0x12d   :  { %v602_v11 = vpop.f32.mrf.mxu1  ;;  %v1891_v12 = vadd.f32 %v600_v7, %v411_v8 }
 0x12e   :  { %v415_v13 = vpop.f32.mrf.mxu0 }
 0x12f   :  { %v605_v14 = vpop.f32.mrf.mxu1  ;;  %v416_v0 = vadd.f32 %v1858_v9, %v415_v13 }
 0x130   :  { %v417_v16 = vpop.f32.mrf.mxu0 }
 0x131   :  { %v607_v17 = vpop.f32.mrf.mxu1  ;;  %v1894_v18 = vadd.f32 %v605_v14, %v416_v0 }
 0x132   :  { %v420_v19 = vpop.f32.mrf.mxu0 }
 0x133   :  { %v610_v21 = vpop.f32.mrf.mxu1  ;;  %v421_v22 = vadd.f32 %v1858_v9, %v420_v19 }
 0x134   :  { %v422_v23 = vpop.f32.mrf.mxu0 }
 0x135   :  { %v612_v24 = vpop.f32.mrf.mxu1  ;;  %v1897_v25 = vadd.f32 %v610_v21, %v421_v22 }
 0x136   :  { %v425_v27 = vpop.f32.mrf.mxu0 }
 0x137   :  { %v615_v28 = vpop.f32.mrf.mxu1  ;;  %v426_v17 = vadd.f32 %v1858_v9, %v425_v27 }
 0x138   :  { %v427_v29 = vpop.f32.mrf.mxu0 }
 0x139   :  { %v617_v30 = vpop.f32.mrf.mxu1  ;;  %v616_v24 = vadd.f32 %v615_v28, %v426_v17 }
 0x13a   :  { %v430_v31 = vpop.f32.mrf.mxu0 }
 0x13b   :  { %v620_v33 = vpop.f32.mrf.mxu1  ;;  %v431_v29 = vadd.f32 %v1858_v9, %v430_v31 }
 0x13c   :  { %v432_v34 = vpop.f32.mrf.mxu0 }
 0x13d   :  { %v622_v35 = vpop.f32.mrf.mxu1 }
 0x13e   :  { %v435_v36 = vpop.f32.mrf.mxu0 }
 0x13f   :  { %v625_v37 = vpop.f32.mrf.mxu1 }
 0x140   :  { %v437_v39 = vpop.f32.mrf.mxu0 }
 0x141   :  { %v627_v40 = vpop.f32.mrf.mxu1 }
 0x142   :  { %v440_v41 = vpop.f32.mrf.mxu0 }
 0x143   :  { %v1899_v42 = vpop.f32.mrf.mxu1 }
 0x144   :  { %v442_v43 = vpop.f32.mrf.mxu0 }
 0x145   :  { %v632_v45 = vpop.f32.mrf.mxu1 }
 0x146   :  { %v1901_v46 = vpop.f32.mrf.mxu0  ;;  %v621_v45 = vadd.f32 %v620_v33, %v431_v29 }
 0x147   :  { %v1903_v47 = vpop.f32.mrf.mxu1 }
 0x148   :  { %v447_v48 = vpop.f32.mrf.mxu0 }
 0x149   :  { %v637_v49 = vpop.f32.mrf.mxu1  ;;  %v436_v48 = vadd.f32 %v1858_v9, %v435_v36 }
 0x14a   :  { %v1905_v51 = vpop.f32.mrf.mxu0 }
 0x14b   :  { %v1907_v52 = vpop.f32.mrf.mxu1  ;;  %v626_v36 = vadd.f32 %v625_v37, %v436_v48  ;;  %v451_v29 = vadd.f32 %v1858_v9, %v1905_v51 }
 0x14c   :  { %v452_v53 = vpop.f32.mrf.mxu0 }
 0x14d   :  { %v642_v54 = vpop.f32.mrf.mxu1  ;;  %v641_v51 = vadd.f32 %v1907_v52, %v451_v29 }
 0x14e   :  { %v1909_v55 = vpop.f32.mrf.mxu0 }
 0x14f   :  { %v1911_v57 = vpop.f32.mrf.mxu1 }
 0x150   :  { %v457_v58 = vpop.f32.mrf.mxu0 }
 0x151   :  { %v647_v59 = vpop.f32.mrf.mxu1  ;;  %v441_v58 = vadd.f32 %v1858_v9, %v440_v41 }
 0x152   :  { %v1913_v60 = vpop.f32.mrf.mxu0 }
 0x153   :  { %v1915_v61 = vpop.f32.mrf.mxu1  ;;  %v631_v41 = vadd.f32 %v1899_v42, %v441_v58 }
 0x154   :  { %v462_v63 = vpop.f32.mrf.mxu0 }
 0x155   :  { %v652_v1 = vpop.f32.mrf.mxu1 }
 0x156   :  { %v1917_v2 = vpop.f32.mrf.mxu0 }
 0x157   :  { %v1919_v3 = vpop.f32.mrf.mxu1 }
 0x158   :  { %v467_v4 = vpop.f32.mrf.mxu0 }
 0x159   :  { %v657_v6 = vpop.f32.mrf.mxu1 }
 0x15a   :  { %v1921_v7 = vpop.f32.mrf.mxu0 }
 0x15b   :  { %v1923_v8 = vpop.f32.mrf.mxu1 }
 0x15c   :  { %v472_v10 = vpop.f32.mrf.mxu0 }
 0x15d   :  { %v662_v11 = vpop.f32.mrf.mxu1 }
 0x15e   :  { %v1925_v13 = vpop.f32.mrf.mxu0  ;;  %v446_v11 = vadd.f32 %v1858_v9, %v1901_v46 }
 0x15f   :  { %v1927_v14 = vpop.f32.mrf.mxu1 }
 0x160   :  { %v477_v0 = vpop.f32.mrf.mxu0  ;;  %v636_v46 = vadd.f32 %v1903_v47, %v446_v11  ;;  %v471_v11 = vadd.f32 %v1858_v9, %v1921_v7 }
 0x161   :  { %v667_v16 = vpop.f32.mrf.mxu1 }
 0x162   :  { %v1930_v19 = vpop.f32.mrf.mxu0  ;;  %v661_v7 = vadd.f32 %v1923_v8, %v471_v11 }
 0x163   :  { %v1932_v21 = vpop.f32.mrf.mxu1 }
 0x164   :  { %v482_v22 = vpop.f32.mrf.mxu0 }
 0x165   :  { %v672_v23 = vpop.f32.mrf.mxu1 }
 0x166   :  { %v740_v30 = vpop.f32.mrf.mxu0 }
 0x167   :  { %v805_v34 = vpop.f32.mrf.mxu1  ;;  %v741_v35 = vadd.f32 %v740_v30, %v1861_v15 }
 0x168   :  { %v806_v39 = vadd.f32 %v805_v34, %v616_v24  ;;  %v996_v40 = vpop.f32.mrf.mxu0 }
 0x169   :  { %v1035_v43 = vpop.f32.mrf.mxu1  ;;  %v864_v27 = vmax.f32 %v741_v35, 0.0 }
 0x16a   :  { %v877_v49 = vmax.f32 %v806_v39, 0.0  ;;  %v745_v53 = vpop.f32.mrf.mxu0 }
 0x16b   :  { %v810_v54 = vpop.f32.mrf.mxu1  ;;  %889 = vst.msk [vmem:[%s2077_s3] sm:$0xff] %vm218_vm1, %v864_v27  ;;  %v746_v15 = vadd.f32 %v745_v53, %v1864_v20 }
 0x16c   :  { %902 = vst.msk [vmem:[%s2077_s3 + $0x68] sm:$0xff] %vm218_vm1, %v877_v49  ;;  %v811_v28 = vadd.f32 %v810_v54, %v621_v45  ;;  %v999_v31 = vpop.f32.mrf.mxu0  ;;  %v456_v45 = vadd.f32 %v1858_v9, %v1909_v55 }
 0x16d   :  { %v1038_v33 = vpop.f32.mrf.mxu1  ;;  %v865_v59 = vmax.f32 %v746_v15, 0.0 }
 0x16e   :  { %v878_v63 = vmax.f32 %v811_v28, 0.0  ;;  %v750_v1 = vpop.f32.mrf.mxu0  ;;  %v646_v55 = vadd.f32 %v1911_v57, %v456_v45  ;;  %v461_v28 = vadd.f32 %v1858_v9, %v1913_v60 }
 0x16f   :  { %v815_v4 = vpop.f32.mrf.mxu1  ;;  %890 = vst.msk [vmem:[%s2077_s3 + $0x8] sm:$0xff] %vm218_vm1, %v865_v59  ;;  %v751_v20 = vadd.f32 %v750_v1, %v1867_v26  ;;  %v466_v1 = vadd.f32 %v1858_v9, %v1917_v2 }
 0x170   :  { %903 = vst.msk [vmem:[%s2077_s3 + $0x70] sm:$0xff] %vm218_vm1, %v878_v63  ;;  %v816_v6 = vadd.f32 %v815_v4, %v626_v36  ;;  %v1002_v37 = vpop.f32.mrf.mxu0  ;;  %v651_v60 = vadd.f32 %v1915_v61, %v461_v28 }
 0x171   :  { %v1041_v10 = vpop.f32.mrf.mxu1  ;;  %v866_v0 = vmax.f32 %v751_v20, 0.0  ;;  %v656_v2 = vadd.f32 %v1919_v3, %v466_v1 }
 0x172   :  { %v879_v16 = vmax.f32 %v816_v6, 0.0  ;;  %v755_v17 = vpop.f32.mrf.mxu0 }
 0x173   :  { %v820_v22 = vpop.f32.mrf.mxu1  ;;  %891 = vst.msk [vmem:[%s2077_s3 + $0x10] sm:$0xff] %vm218_vm1, %v866_v0  ;;  %v756_v26 = vadd.f32 %v755_v17, %v1870_v32 }
 0x174   :  { %904 = vst.msk [vmem:[%s2077_s3 + $0x78] sm:$0xff] %vm218_vm1, %v879_v16  ;;  %v821_v42 = vadd.f32 %v820_v22, %v631_v41  ;;  %v1005_v23 = vpop.f32.mrf.mxu0 }
 0x175   :  { %v1044_v24 = vpop.f32.mrf.mxu1  ;;  %v867_v30 = vmax.f32 %v756_v26, 0.0  ;;  %v476_v23 = vadd.f32 %v1858_v9, %v1925_v13 }
 0x176   :  { %v880_v34 = vmax.f32 %v821_v42, 0.0  ;;  %v760_v35 = vpop.f32.mrf.mxu0 }
 0x177   :  { %v825_v39 = vpop.f32.mrf.mxu1  ;;  %892 = vst.msk [vmem:[%s2077_s3 + $0x18] sm:$0xff] %vm218_vm1, %v867_v30  ;;  %v761_v32 = vadd.f32 %v760_v35, %v1873_v38  ;;  %v666_v13 = vadd.f32 %v1927_v14, %v476_v23 }
 0x178   :  { %905 = vst.msk [vmem:[%s2077_s3 + $0x80] sm:$0xff] %vm218_vm1, %v880_v34  ;;  %v826_v47 = vadd.f32 %v825_v39, %v636_v46  ;;  %v1008_v40 = vpop.f32.mrf.mxu0  ;;  %v481_v39 = vadd.f32 %v1858_v9, %v1930_v19 }
 0x179   :  { %v1047_v43 = vpop.f32.mrf.mxu1  ;;  %v868_v48 = vmax.f32 %v761_v32, 0.0 }
 0x17a   :  { %v881_v27 = vmax.f32 %v826_v47, 0.0  ;;  %v765_v49 = vpop.f32.mrf.mxu0  ;;  %v671_v9 = vadd.f32 %v1932_v21, %v481_v39 }
 0x17b   :  { %v830_v53 = vpop.f32.mrf.mxu1  ;;  %893 = vst.msk [vmem:[%s2077_s3 + $0x20] sm:$0xff] %vm218_vm1, %v868_v48  ;;  %v766_v38 = vadd.f32 %v765_v49, %v1876_v44 }
 0x17c   :  { %906 = vst.msk [vmem:[%s2077_s3 + $0x88] sm:$0xff] %vm218_vm1, %v881_v27  ;;  %v831_v52 = vadd.f32 %v830_v53, %v641_v51  ;;  %v1011_v54 = vpop.f32.mrf.mxu0 }
 0x17d   :  { %v1050_v15 = vpop.f32.mrf.mxu1  ;;  %v869_v31 = vmax.f32 %v766_v38, 0.0 }
 0x17e   :  { %v882_v33 = vmax.f32 %v831_v52, 0.0  ;;  %v770_v36 = vpop.f32.mrf.mxu0 }
 0x17f   :  { %v835_v58 = vpop.f32.mrf.mxu1  ;;  %894 = vst.msk [vmem:[%s2077_s3 + $0x28] sm:$0xff] %vm218_vm1, %v869_v31  ;;  %v771_v44 = vadd.f32 %v770_v36, %v1879_v50 }
 0x180   :  { %907 = vst.msk [vmem:[%s2077_s3 + $0x90] sm:$0xff] %vm218_vm1, %v882_v33  ;;  %v836_v57 = vadd.f32 %v835_v58, %v646_v55  ;;  %v1014_v59 = vpop.f32.mrf.mxu0 }
 0x181   :  { %v1053_v63 = vpop.f32.mrf.mxu1  ;;  %v870_v4 = vmax.f32 %v771_v44, 0.0 }
 0x182   :  { %v883_v20 = vmax.f32 %v836_v57, 0.0  ;;  %v775_v6 = vpop.f32.mrf.mxu0 }
 0x183   :  { %v840_v37 = vpop.f32.mrf.mxu1  ;;  %895 = vst.msk [vmem:[%s2077_s3 + $0x30] sm:$0xff] %vm218_vm1, %v870_v4  ;;  %v776_v50 = vadd.f32 %v775_v6, %v1882_v56 }
 0x184   :  { %908 = vst.msk [vmem:[%s2077_s3 + $0x98] sm:$0xff] %vm218_vm1, %v883_v20  ;;  %v841_v61 = vadd.f32 %v840_v37, %v651_v60  ;;  %v1017_v10 = vpop.f32.mrf.mxu0 }
 0x185   :  { %v1056_v41 = vpop.f32.mrf.mxu1  ;;  %v871_v0 = vmax.f32 %v776_v50, 0.0 }
 0x186   :  { %v884_v16 = vmax.f32 %v841_v61, 0.0  ;;  %v780_v17 = vpop.f32.mrf.mxu0 }
 0x187   :  { %v845_v22 = vpop.f32.mrf.mxu1  ;;  %896 = vst.msk [vmem:[%s2077_s3 + $0x38] sm:$0xff] %vm218_vm1, %v871_v0  ;;  %v781_v56 = vadd.f32 %v780_v17, %v1885_v62 }
 0x188   :  { %909 = vst.msk [vmem:[%s2077_s3 + $0xa0] sm:$0xff] %vm218_vm1, %v884_v16  ;;  %v846_v3 = vadd.f32 %v845_v22, %v656_v2  ;;  %v1020_v26 = vpop.f32.mrf.mxu0 }
 0x189   :  { %v1059_v42 = vpop.f32.mrf.mxu1  ;;  %v872_v24 = vmax.f32 %v781_v56, 0.0 }
 0x18a   :  { %v885_v46 = vmax.f32 %v846_v3, 0.0  ;;  %v785_v29 = vpop.f32.mrf.mxu0 }
 0x18b   :  { %v850_v30 = vpop.f32.mrf.mxu1  ;;  %897 = vst.msk [vmem:[%s2077_s3 + $0x40] sm:$0xff] %vm218_vm1, %v872_v24  ;;  %v786_v62 = vadd.f32 %v785_v29, %v1888_v5 }
 0x18c   :  { %910 = vst.msk [vmem:[%s2077_s3 + $0xa8] sm:$0xff] %vm218_vm1, %v885_v46  ;;  %v851_v8 = vadd.f32 %v850_v30, %v661_v7  ;;  %v1023_v34 = vpop.f32.mrf.mxu0 }
 0x18d   :  { %v1062_v35 = vpop.f32.mrf.mxu1  ;;  %v873_v32 = vmax.f32 %v786_v62, 0.0 }
 0x18e   :  { %v886_v47 = vmax.f32 %v851_v8, 0.0  ;;  %v790_v40 = vpop.f32.mrf.mxu0 }
 0x18f   :  { %v855_v43 = vpop.f32.mrf.mxu1  ;;  %898 = vst.msk [vmem:[%s2077_s3 + $0x48] sm:$0xff] %vm218_vm1, %v873_v32  ;;  %v791_v5 = vadd.f32 %v790_v40, %v1891_v12 }
 0x190   :  { %911 = vst.msk [vmem:[%s2077_s3 + $0xb0] sm:$0xff] %vm218_vm1, %v886_v47  ;;  %v856_v14 = vadd.f32 %v855_v43, %v666_v13  ;;  %v1026_v51 = vpop.f32.mrf.mxu0 }
 0x191   :  { %v1065_v45 = vpop.f32.mrf.mxu1  ;;  %v874_v19 = vmax.f32 %v791_v5, 0.0 }
 0x192   :  { %v887_v48 = vmax.f32 %v856_v14, 0.0  ;;  %v795_v27 = vpop.f32.mrf.mxu0 }
 0x193   :  { %v860_v49 = vpop.f32.mrf.mxu1  ;;  %899 = vst.msk [vmem:[%s2077_s3 + $0x50] sm:$0xff] %vm218_vm1, %v874_v19  ;;  %v796_v12 = vadd.f32 %v795_v27, %v1894_v18 }
 0x194   :  { %912 = vst.msk [vmem:[%s2077_s3 + $0xb8] sm:$0xff] %vm218_vm1, %v887_v48  ;;  %v861_v53 = vadd.f32 %v860_v49, %v671_v9  ;;  %v1029_v38 = vpop.f32.mrf.mxu0 }
 0x195   :  { %v1068_v21 = vpop.f32.mrf.mxu1  ;;  %v875_v52 = vmax.f32 %v796_v12, 0.0 }
 0x196   :  { %v888_v54 = vmax.f32 %v861_v53, 0.0  ;;  %v800_v15 = vpop.f32.mrf.mxu0 }
 0x197   :  { %900 = vst.msk [vmem:[%s2077_s3 + $0x58] sm:$0xff] %vm218_vm1, %v875_v52  ;;  %v801_v55 = vadd.f32 %v800_v15, %v1897_v25 }
 0x198   :  { %914 = vst.msk [vmem:[%s2077_s3 + $0xc0] sm:$0xf] %vm913_vm2, %v888_v54  ;;  %v1032_v28 = vpop.f32.mrf.mxu0 }
 0x199   :  { %v876_v18 = vmax.f32 %v801_v55, 0.0 }
 0x19b   :  { %901 = vst.msk [vmem:[%s2077_s3 + $0x60] sm:$0xff] %vm218_vm1, %v876_v18 }

// kernel: dann_forward.7
= control target key start
LH: loop header
LB: loop body
LE: loop exit
PB: predicated region body
PF: predicated region fallthrough
CT: control target
= control target key end

     0   :  { %19 = vsyncpa [#allocation4], 0  ;;  %s4187_s0 = inlined_call_operand.vmem [shape: f32[64,576], index: 0, kind: input, shape index: {}]   ;;  %s4188_s1 = inlined_call_operand.vmem [shape: f32[576,64], index: 1, kind: input, shape index: {}]   ;;  %s4189_s2 = inlined_call_operand.vmem [shape: f32[1,64], index: 2, kind: input, shape index: {}]   ;;  %s4190_s3 = inlined_call_operand.vmem [shape: f32[16,64,32], index: 3, kind: input, shape index: {}]   ;;  %s4191_s4 = inlined_call_operand.vmem [shape: f32[1,32], index: 4, kind: input, shape index: {}]   ;;  %s4192_s5 = inlined_call_operand.vmem [shape: f32[32,64], index: 5, kind: input, shape index: {}]   ;;  %s4193_s6 = inlined_call_operand.vmem [shape: f32[1,64], index: 6, kind: input, shape index: {}]   ;;  %s4194_s7 = inlined_call_operand.vmem [shape: f32[64,64], index: 7, kind: input, shape index: {}]   ;;  %s4195_s8 = inlined_call_operand.vmem [shape: f32[1,64], index: 8, kind: input, shape index: {}]   ;;  %s4196_s9 = inlined_call_operand.vmem [shape: f32[64,10], index: 9, kind: input, shape index: {}]   ;;  %s4197_s10 = inlined_call_operand.vmem [shape: f32[1,10], index: 10, kind: input, shape index: {}]   ;;  %s4198_s11 = inlined_call_operand.hbm [shape: f32[4,10], index: 11, kind: output, shape index: {0}]   ;;  %s4199_s12 = inlined_call_operand.vmem [shape: s32[4,1], index: 12, kind: output, shape index: {1}]   ;;  %s4200_s13 = inlined_call_operand.hbm [shape: f32[4,32], index: 13, kind: output, shape index: {2}]  }
   0x1   :  { %v114_v0 = vld [vmem:[%s4188_s1 + $0xf8] sm:$0xff]  ;;  %v113_v2 = vld [vmem:[%s4188_s1 + $0xf0] sm:$0xff]  ;;  %v112_v6 = vld [vmem:[%s4188_s1 + $0xe8] sm:$0xff] }
   0x2   :  { %v98_v1 = vld [vmem:[%s4188_s1 + $0x78] sm:$0xff]  ;;  %2356 = vmatprep.subr.mxu0 %v114_v0  ;;  %v97_v4 = vld [vmem:[%s4188_s1 + $0x70] sm:$0xff]  ;;  %v96_v8 = vld [vmem:[%s4188_s1 + $0x68] sm:$0xff] }
   0x3   :  { %v146_v3 = vld [vmem:[%s4188_s1 + $0x1f8] sm:$0xff]  ;;  %2357 = vmatpush3.msra.mxu0 %v98_v1  ;;  %v145_v7 = vld [vmem:[%s4188_s1 + $0x1f0] sm:$0xff]  ;;  %v144_v10 = vld [vmem:[%s4188_s1 + $0x1e8] sm:$0xff] }
   0x4   :  { %v130_v5 = vld [vmem:[%s4188_s1 + $0x178] sm:$0xff]  ;;  %2412 = vmatprep.subr.mxu1 %v146_v3  ;;  %2358 = vmatprep.subr.mxu0 %v113_v2  ;;  %v129_v9 = vld [vmem:[%s4188_s1 + $0x170] sm:$0xff]  ;;  %v111_v11 = vld [vmem:[%s4188_s1 + $0xe0] sm:$0xff] }
   0x5   :  { %2413 = vmatpush3.msra.mxu1 %v130_v5  ;;  %2359 = vmatpush3.msra.mxu0 %v97_v4  ;;  %v128_v12 = vld [vmem:[%s4188_s1 + $0x168] sm:$0xff]  ;;  %v95_v13 = vld [vmem:[%s4188_s1 + $0x60] sm:$0xff]  ;;  %v110_v15 = vld [vmem:[%s4188_s1 + $0xd8] sm:$0xff] }
   0x6   :  { %2414 = vmatprep.subr.mxu1 %v145_v7  ;;  %2360 = vmatprep.subr.mxu0 %v112_v6  ;;  %v143_v14 = vld [vmem:[%s4188_s1 + $0x1e0] sm:$0xff]  ;;  %v94_v17 = vld [vmem:[%s4188_s1 + $0x58] sm:$0xff]  ;;  %v109_v19 = vld [vmem:[%s4188_s1 + $0xd0] sm:$0xff] }
   0x7   :  { %2415 = vmatpush3.msra.mxu1 %v129_v9  ;;  %2361 = vmatpush3.msra.mxu0 %v96_v8  ;;  %v127_v16 = vld [vmem:[%s4188_s1 + $0x160] sm:$0xff]  ;;  %v142_v18 = vld [vmem:[%s4188_s1 + $0x1d8] sm:$0xff]  ;;  %v93_v21 = vld [vmem:[%s4188_s1 + $0x50] sm:$0xff] }
   0x8   :  { %2416 = vmatprep.subr.mxu1 %v144_v10  ;;  %2362 = vmatprep.subr.mxu0 %v111_v11  ;;  %v126_v20 = vld [vmem:[%s4188_s1 + $0x158] sm:$0xff]  ;;  %v141_v22 = vld [vmem:[%s4188_s1 + $0x1d0] sm:$0xff]  ;;  %v108_v23 = vld [vmem:[%s4188_s1 + $0xc8] sm:$0xff] }
   0x9   :  { %2417 = vmatpush3.msra.mxu1 %v128_v12  ;;  %2363 = vmatpush3.msra.mxu0 %v95_v13  ;;  %v125_v24 = vld [vmem:[%s4188_s1 + $0x150] sm:$0xff]  ;;  %v92_v25 = vld [vmem:[%s4188_s1 + $0x48] sm:$0xff]  ;;  %v107_v27 = vld [vmem:[%s4188_s1 + $0xc0] sm:$0xff] }
   0xa   :  { %2418 = vmatprep.subr.mxu1 %v143_v14  ;;  %2364 = vmatprep.subr.mxu0 %v110_v15  ;;  %v140_v26 = vld [vmem:[%s4188_s1 + $0x1c8] sm:$0xff]  ;;  %v91_v29 = vld [vmem:[%s4188_s1 + $0x40] sm:$0xff]  ;;  %v106_v31 = vld [vmem:[%s4188_s1 + $0xb8] sm:$0xff] }
   0xb   :  { %2419 = vmatpush3.msra.mxu1 %v127_v16  ;;  %2365 = vmatpush3.msra.mxu0 %v94_v17  ;;  %v124_v28 = vld [vmem:[%s4188_s1 + $0x148] sm:$0xff]  ;;  %v139_v30 = vld [vmem:[%s4188_s1 + $0x1c0] sm:$0xff]  ;;  %v90_v33 = vld [vmem:[%s4188_s1 + $0x38] sm:$0xff] }
   0xc   :  { %2420 = vmatprep.subr.mxu1 %v142_v18  ;;  %2366 = vmatprep.subr.mxu0 %v109_v19  ;;  %v123_v32 = vld [vmem:[%s4188_s1 + $0x140] sm:$0xff]  ;;  %v138_v34 = vld [vmem:[%s4188_s1 + $0x1b8] sm:$0xff]  ;;  %v105_v35 = vld [vmem:[%s4188_s1 + $0xb0] sm:$0xff] }
   0xd   :  { %2421 = vmatpush3.msra.mxu1 %v126_v20  ;;  %2367 = vmatpush3.msra.mxu0 %v93_v21  ;;  %v122_v36 = vld [vmem:[%s4188_s1 + $0x138] sm:$0xff]  ;;  %v89_v37 = vld [vmem:[%s4188_s1 + $0x30] sm:$0xff]  ;;  %v104_v39 = vld [vmem:[%s4188_s1 + $0xa8] sm:$0xff] }
   0xe   :  { %2422 = vmatprep.subr.mxu1 %v141_v22  ;;  %2368 = vmatprep.subr.mxu0 %v108_v23  ;;  %v137_v38 = vld [vmem:[%s4188_s1 + $0x1b0] sm:$0xff]  ;;  %v88_v41 = vld [vmem:[%s4188_s1 + $0x28] sm:$0xff]  ;;  %v103_v43 = vld [vmem:[%s4188_s1 + $0xa0] sm:$0xff] }
   0xf   :  { %2423 = vmatpush3.msra.mxu1 %v125_v24  ;;  %2369 = vmatpush3.msra.mxu0 %v92_v25  ;;  %v121_v40 = vld [vmem:[%s4188_s1 + $0x130] sm:$0xff]  ;;  %v136_v42 = vld [vmem:[%s4188_s1 + $0x1a8] sm:$0xff]  ;;  %v87_v45 = vld [vmem:[%s4188_s1 + $0x20] sm:$0xff] }
  0x10   :  { %2424 = vmatprep.subr.mxu1 %v140_v26  ;;  %2370 = vmatprep.subr.mxu0 %v107_v27  ;;  %v120_v44 = vld [vmem:[%s4188_s1 + $0x128] sm:$0xff]  ;;  %v135_v46 = vld [vmem:[%s4188_s1 + $0x1a0] sm:$0xff]  ;;  %v102_v47 = vld [vmem:[%s4188_s1 + $0x98] sm:$0xff] }
  0x11   :  { %2425 = vmatpush3.msra.mxu1 %v124_v28  ;;  %2371 = vmatpush3.msra.mxu0 %v91_v29  ;;  %v119_v48 = vld [vmem:[%s4188_s1 + $0x120] sm:$0xff]  ;;  %v86_v49 = vld [vmem:[%s4188_s1 + $0x18] sm:$0xff]  ;;  %v101_v51 = vld [vmem:[%s4188_s1 + $0x90] sm:$0xff] }
  0x12   :  { %2426 = vmatprep.subr.mxu1 %v139_v30  ;;  %2372 = vmatprep.subr.mxu0 %v106_v31  ;;  %v134_v50 = vld [vmem:[%s4188_s1 + $0x198] sm:$0xff]  ;;  %v85_v53 = vld [vmem:[%s4188_s1 + $0x10] sm:$0xff]  ;;  %v100_v55 = vld [vmem:[%s4188_s1 + $0x88] sm:$0xff] }
  0x13   :  { %2427 = vmatpush3.msra.mxu1 %v123_v32  ;;  %2373 = vmatpush3.msra.mxu0 %v90_v33  ;;  %v118_v52 = vld [vmem:[%s4188_s1 + $0x118] sm:$0xff]  ;;  %v133_v54 = vld [vmem:[%s4188_s1 + $0x190] sm:$0xff]  ;;  %v84_v57 = vld [vmem:[%s4188_s1 + $0x8] sm:$0xff] }
  0x14   :  { %2428 = vmatprep.subr.mxu1 %v138_v34  ;;  %2374 = vmatprep.subr.mxu0 %v105_v35  ;;  %v117_v56 = vld [vmem:[%s4188_s1 + $0x110] sm:$0xff]  ;;  %v132_v58 = vld [vmem:[%s4188_s1 + $0x188] sm:$0xff]  ;;  %v99_v59 = vld [vmem:[%s4188_s1 + $0x80] sm:$0xff] }
  0x15   :  { %2429 = vmatpush3.msra.mxu1 %v122_v36  ;;  %2375 = vmatpush3.msra.mxu0 %v89_v37  ;;  %v44_v60 = vld [vmem:[%s4187_s0 + $0x8] sm:$0xff]  ;;  %v83_v61 = vld [vmem:[%s4188_s1] sm:$0xff]  ;;  %v154_v1 = vld [vmem:[%s4188_s1 + $0x238] sm:$0xff] }
  0x16   :  { %2430 = vmatprep.subr.mxu1 %v137_v38  ;;  %2376 = vmatprep.subr.mxu0 %v104_v39  ;;  %v116_v62 = vld [vmem:[%s4188_s1 + $0x108] sm:$0xff]  ;;  %v43_v63 = vld [vmem:[%s4187_s0] sm:$0xff]  ;;  %v46_v3 = vld [vmem:[%s4187_s0 + $0x18] sm:$0xff] }
  0x17   :  { %2431 = vmatpush3.msra.mxu1 %v121_v40  ;;  %2377 = vmatpush3.msra.mxu0 %v88_v41  ;;  %v131_v0 = vld [vmem:[%s4188_s1 + $0x180] sm:$0xff]  ;;  %v45_v4 = vld [vmem:[%s4187_s0 + $0x10] sm:$0xff]  ;;  %v48_v6 = vld [vmem:[%s4187_s0 + $0x28] sm:$0xff] }
  0x18   :  { %2432 = vmatprep.subr.mxu1 %v136_v42  ;;  %2378 = vmatprep.subr.mxu0 %v103_v43  ;;  %v115_v2 = vld [vmem:[%s4188_s1 + $0x100] sm:$0xff]  ;;  %v49_v5 = vld [vmem:[%s4187_s0 + $0x30] sm:$0xff]  ;;  %v54_v9 = vld [vmem:[%s4187_s0 + $0x58] sm:$0xff] }
  0x19   :  { %2433 = vmatpush3.msra.mxu1 %v120_v44  ;;  %2379 = vmatpush3.msra.mxu0 %v87_v45  ;;  %v153_v7 = vld [vmem:[%s4188_s1 + $0x230] sm:$0xff]  ;;  %v51_v8 = vld [vmem:[%s4187_s0 + $0x40] sm:$0xff]  ;;  %v152_v10 = vld [vmem:[%s4188_s1 + $0x228] sm:$0xff] }
  0x1a   :  { %2434 = vmatprep.subr.mxu1 %v135_v46  ;;  %2380 = vmatprep.subr.mxu0 %v102_v47  ;;  %v50_v11 = vld [vmem:[%s4187_s0 + $0x38] sm:$0xff] }
  0x1b   :  { %2435 = vmatpush3.msra.mxu1 %v119_v48  ;;  %2381 = vmatpush3.msra.mxu0 %v86_v49 }
  0x1c   :  { %2436 = vmatprep.subr.mxu1 %v134_v50  ;;  %2382 = vmatprep.subr.mxu0 %v101_v51 }
  0x1d   :  { %2437 = vmatpush3.msra.mxu1 %v118_v52  ;;  %2383 = vmatpush3.msra.mxu0 %v85_v53 }
  0x1e   :  { %2438 = vmatprep.subr.mxu1 %v133_v54  ;;  %2384 = vmatprep.subr.mxu0 %v100_v55 }
  0x1f   :  { %2439 = vmatpush3.msra.mxu1 %v117_v56  ;;  %2385 = vmatpush3.msra.mxu0 %v84_v57 }
  0x20   :  { %2440 = vmatprep.subr.mxu1 %v132_v58  ;;  %2386 = vmatprep.subr.mxu0 %v99_v59 }
  0x21   :  { %251 = vmatprep.mubr.f32.mxu0 %v44_v60  ;;  %2387 = vmatpush3.msra.mxu0 %v83_v61 }
  0x22   :  { %2441 = vmatpush3.msra.mxu1 %v116_v62  ;;  %252 = vmatmul.mubr.f32.vlgmr.msra.gmra.mxu0 %v43_v63 }
  0x23   :  { %2442 = vmatprep.subr.mxu1 %v131_v0  ;;  %2651 = vmatprep.subr.mxu0 %v154_v1 }
  0x24   :  { %2443 = vmatpush3.msra.mxu1 %v115_v2  ;;  %356 = vmatprep.mubr.f32.mxu1 %v46_v3 }
  0x25   :  { %2652 = vmatpush3.msra.mxu0 %v154_v1  ;;  %357 = vmatmul.mubr.f32.vlgmr.msra.gmra.mxu1 %v45_v4 }
  0x26   :  { %256 = vmatprep.mubr.f32.mxu0 %v49_v5  ;;  %2653 = vmatprep.subr.mxu0 %v153_v7 }
  0x27   :  { %257 = vmatmul.mubr.f32.gmra.mxu0 %v48_v6 }
  0x28   :  { %20 = vsyncpa [#allocation6], 0  ;;  %361 = vmatprep.mubr.f32.mxu1 %v51_v8  ;;  %2654 = vmatpush3.msra.mxu0 %v153_v7  ;;  %v53_v12 = vld [vmem:[%s4187_s0 + $0x50] sm:$0xff]  ;;  %v56_v13 = vld [vmem:[%s4187_s0 + $0x68] sm:$0xff]  ;;  %vm162_vm0 = vcmask 523264   ;;  %v3084_v48 = vmov 0.0  }
  0x29   :  { %261 = vmatprep.mubr.f32.mxu0 %v54_v9  ;;  %2655 = vmatprep.subr.mxu0 %v152_v10  ;;  %v59_v14 = vld [vmem:[%s4187_s0 + $0x80] sm:$0xff]  ;;  %v150_v17 = vld [vmem:[%s4188_s1 + $0x218] sm:$0xff]  ;;  %v61_v19 = vld [vmem:[%s4187_s0 + $0x90] sm:$0xff]  ;;  %vm3085_vm1 = vmmov 0   ;;  %vm1881_vm2 = vcmask 261120   ;;  %vm1868_vm3 = vcmask 257024  }
  0x2a   :  { %v151_v15 = vld [vmem:[%s4188_s1 + $0x220] sm:$0xff]  ;;  %362 = vmatmul.mubr.f32.gmra.mxu1 %v50_v11  ;;  %2656 = vmatpush3.msra.mxu0 %v152_v10  ;;  %v58_v18 = vld [vmem:[%s4187_s0 + $0x78] sm:$0xff]  ;;  %v64_v20 = vld [vmem:[%s4187_s0 + $0xa8] sm:$0xff]  ;;  %vm2133_vm4 = vcmask 76800  }
  0x2b   :  { %262 = vmatmul.mubr.f32.gmra.mxu0 %v53_v12  ;;  %366 = vmatprep.mubr.f32.mxu1 %v56_v13  ;;  %v55_v16 = vld [vmem:[%s4187_s0 + $0x60] sm:$0xff]  ;;  %v149_v21 = vld [vmem:[%s4188_s1 + $0x210] sm:$0xff]  ;;  %v60_v22 = vld [vmem:[%s4187_s0 + $0x88] sm:$0xff] }
  0x2c   :  { %266 = vmatprep.mubr.f32.mxu0 %v59_v14  ;;  %2657 = vmatprep.subr.mxu0 %v151_v15  ;;  %v63_v23 = vld [vmem:[%s4187_s0 + $0xa0] sm:$0xff]  ;;  %v66_v24 = vld [vmem:[%s4187_s0 + $0xb8] sm:$0xff]  ;;  %v69_v25 = vld [vmem:[%s4187_s0 + $0xd0] sm:$0xff] }
  0x2d   :  { %2658 = vmatpush3.msra.mxu0 %v151_v15  ;;  %v148_v26 = vld [vmem:[%s4188_s1 + $0x208] sm:$0xff]  ;;  %v65_v27 = vld [vmem:[%s4187_s0 + $0xb0] sm:$0xff]  ;;  %v147_v28 = vld [vmem:[%s4188_s1 + $0x200] sm:$0xff]  ;;  %2679 = vmatprep.subr.mxu1 %v3084_v48 }
  0x2e   :  { %367 = vmatmul.mubr.f32.gmra.mxu1 %v55_v16  ;;  %2659 = vmatprep.subr.mxu0 %v150_v17  ;;  %v68_v29 = vld [vmem:[%s4187_s0 + $0xc8] sm:$0xff]  ;;  %v71_v30 = vld [vmem:[%s4187_s0 + $0xe0] sm:$0xff]  ;;  %v74_v31 = vld [vmem:[%s4187_s0 + $0xf8] sm:$0xff] }
  0x2f   :  { %267 = vmatmul.mubr.f32.gmra.mxu0 %v58_v18  ;;  %371 = vmatprep.mubr.f32.mxu1 %v61_v19  ;;  %v70_v32 = vld [vmem:[%s4187_s0 + $0xd8] sm:$0xff]  ;;  %v73_v33 = vld [vmem:[%s4187_s0 + $0xf0] sm:$0xff]  ;;  %v76_v34 = vld [vmem:[%s4187_s0 + $0x108] sm:$0xff] }
  0x30   :  { %271 = vmatprep.mubr.f32.mxu0 %v64_v20  ;;  %2660 = vmatpush3.msra.mxu0 %v150_v17  ;;  %v79_v35 = vld [vmem:[%s4187_s0 + $0x120] sm:$0xff]  ;;  %v78_v37 = vld [vmem:[%s4187_s0 + $0x118] sm:$0xff]  ;;  %v81_v38 = vld [vmem:[%s4187_s0 + $0x130] sm:$0xff] }
  0x31   :  { %2661 = vmatprep.subr.mxu0 %v149_v21  ;;  %v75_v36 = vld [vmem:[%s4187_s0 + $0x100] sm:$0xff]  ;;  %v80_v40 = vld [vmem:[%s4187_s0 + $0x128] sm:$0xff]  ;;  %v57_v42 = vld [vmem:[%s4187_s0 + $0x70] sm:$0xff] }
  0x32   :  { %372 = vmatmul.mubr.f32.gmra.mxu1 %v60_v22  ;;  %2662 = vmatpush3.msra.mxu0 %v149_v21  ;;  %v47_v39 = vld [vmem:[%s4187_s0 + $0x20] sm:$0xff]  ;;  %v52_v41 = vld [vmem:[%s4187_s0 + $0x48] sm:$0xff]  ;;  %v62_v43 = vld [vmem:[%s4187_s0 + $0x98] sm:$0xff] }
  0x33   :  { %272 = vmatmul.mubr.f32.gmra.mxu0 %v63_v23  ;;  %376 = vmatprep.mubr.f32.mxu1 %v66_v24  ;;  %v67_v44 = vld [vmem:[%s4187_s0 + $0xc0] sm:$0xff]  ;;  %v72_v45 = vld [vmem:[%s4187_s0 + $0xe8] sm:$0xff]  ;;  %v77_v46 = vld [vmem:[%s4187_s0 + $0x110] sm:$0xff] }
  0x34   :  { %276 = vmatprep.mubr.f32.mxu0 %v69_v25  ;;  %2663 = vmatprep.subr.mxu0 %v148_v26  ;;  %v82_v47 = vld [vmem:[%s4187_s0 + $0x138] sm:$0xff]  ;;  %v2219_v50 = vld [vmem:[%s4190_s3 + $0x70] sm:$0xff]  ;;  %v2218_v51 = vld [vmem:[%s4190_s3 + $0x68] sm:$0xff] }
  0x35   :  { %2664 = vmatpush3.msra.mxu0 %v148_v26  ;;  %v2220_v49 = vld [vmem:[%s4190_s3 + $0x78] sm:$0xff]  ;;  %v2217_v52 = vld [vmem:[%s4190_s3 + $0x60] sm:$0xff]  ;;  %v525_v54 = vld [vmem:[%s4190_s3 + $0x30] sm:$0xff] }
  0x36   :  { %377 = vmatmul.mubr.f32.gmra.mxu1 %v65_v27  ;;  %2665 = vmatprep.subr.mxu0 %v147_v28  ;;  %v526_v53 = vld [vmem:[%s4190_s3 + $0x38] sm:$0xff]  ;;  %v524_v55 = vld [vmem:[%s4190_s3 + $0x28] sm:$0xff]  ;;  %v523_v57 = vld [vmem:[%s4190_s3 + $0x20] sm:$0xff] }
  0x37   :  { %277 = vmatmul.mubr.f32.gmra.mxu0 %v68_v29  ;;  %381 = vmatprep.mubr.f32.mxu1 %v71_v30  ;;  %v2216_v56 = vld [vmem:[%s4190_s3 + $0x58] sm:$0xff]  ;;  %v2215_v59 = vld [vmem:[%s4190_s3 + $0x50] sm:$0xff]  ;;  %v2214_v61 = vld [vmem:[%s4190_s3 + $0x48] sm:$0xff] }
  0x38   :  { %281 = vmatprep.mubr.f32.mxu0 %v74_v31  ;;  %2666 = vmatpush3.msra.mxu0 %v147_v28  ;;  %v522_v58 = vld [vmem:[%s4190_s3 + $0x18] sm:$0xff]  ;;  %v521_v60 = vld [vmem:[%s4190_s3 + $0x10] sm:$0xff]  ;;  %v520_v62 = vld [vmem:[%s4190_s3 + $0x8] sm:$0xff] }
  0x39   :  { %2698 = vmatprep.subr.mxu0 %v3084_v48  ;;  %2680 = vmatpush3.msra.mxu1 %v2220_v49  ;;  %v2213_v63 = vld [vmem:[%s4190_s3 + $0x40] sm:$0xff] }
  0x3a   :  { %382 = vmatmul.mubr.f32.gmra.mxu1 %v70_v32  ;;  %2681 = vmatprep.subr.mxu1 %v3084_v48  ;;  %v519_v0 = vld [vmem:[%s4190_s3] sm:$0xff] }
  0x3b   :  { %282 = vmatmul.mubr.f32.gmra.mxu0 %v73_v33  ;;  %386 = vmatprep.mubr.f32.mxu1 %v76_v34  ;;  %v2204_v28 = vld [vmem:[%s4189_s2] ss:$0 sm:$0xff] }
  0x3c   :  { %286 = vmatprep.mubr.f32.mxu0 %v79_v35  ;;  %2682 = vmatpush3.msra.mxu1 %v2219_v50 }
  0x3d   :  { %2683 = vmatprep.subr.mxu1 %v3084_v48 }
  0x3e   :  { %387 = vmatmul.mubr.f32.gmra.mxu1 %v75_v36 }
  0x3f   :  { %287 = vmatmul.mubr.f32.gmra.mxu0 %v78_v37  ;;  %391 = vmatprep.mubr.f32.mxu1 %v81_v38 }
  0x40   :  { %2667 = vmatprep.mubr.msk.f32.mxu0 %vm162_vm0, %v47_v39  ;;  %2684 = vmatpush3.msra.mxu1 %v2218_v51 }
  0x41   :  { %2685 = vmatprep.subr.mxu1 %v3084_v48 }
  0x42   :  { %392 = vmatmul.mubr.f32.gmra.mxu1 %v80_v40 }
  0x43   :  { %2668 = vmatmul.mubr.msk.f32.vlgmr.msra.gmra.mxu0 %vm162_vm0, %v52_v41  ;;  %2686 = vmatpush3.msra.mxu1 %v2217_v52 }
  0x44   :  { %2670 = vmatprep.mubr.msk.f32.mxu0 %vm162_vm0, %v57_v42  ;;  %2687 = vmatprep.subr.mxu1 %v3084_v48 }
  0x45   :  { %2699 = vmatpush3.msra.mxu0 %v526_v53  ;;  %2688 = vmatpush3.msra.mxu1 %v2216_v56 }
  0x46   :  { %2700 = vmatprep.subr.mxu0 %v3084_v48  ;;  %2689 = vmatprep.subr.mxu1 %v3084_v48 }
  0x47   :  { %2671 = vmatmul.mubr.msk.f32.gmra.mxu0 %vm162_vm0, %v62_v43  ;;  %2690 = vmatpush3.msra.mxu1 %v2215_v59 }
  0x48   :  { %2673 = vmatprep.mubr.msk.f32.mxu0 %vm162_vm0, %v67_v44  ;;  %2701 = vmatpush3.msra.mxu0 %v525_v54 }
  0x49   :  { %2702 = vmatprep.subr.mxu0 %v3084_v48  ;;  %2691 = vmatprep.subr.mxu1 %v3084_v48 }
  0x4a   :  { %2703 = vmatpush3.msra.mxu0 %v524_v55  ;;  %2692 = vmatpush3.msra.mxu1 %v2214_v61 }
  0x4b   :  { %2674 = vmatmul.mubr.msk.f32.gmra.mxu0 %vm162_vm0, %v72_v45  ;;  %2704 = vmatprep.subr.mxu0 %v3084_v48 }
  0x4c   :  { %2676 = vmatprep.mubr.msk.f32.mxu0 %vm162_vm0, %v77_v46  ;;  %2705 = vmatpush3.msra.mxu0 %v523_v57 }
  0x4d   :  { %2706 = vmatprep.subr.mxu0 %v3084_v48  ;;  %2693 = vmatprep.subr.mxu1 %v3084_v48 }
  0x4e   :  { %2707 = vmatpush3.msra.mxu0 %v522_v58  ;;  %2694 = vmatpush3.msra.mxu1 %v2213_v63 }
  0x4f   :  { %2677 = vmatmul.mubr.msk.f32.gmra.mxu0 %vm162_vm0, %v82_v47  ;;  %2708 = vmatprep.subr.mxu0 %v3084_v48 }
  0x50   :  { %2709 = vmatpush3.msra.mxu0 %v521_v60  ;;  %2695 = vmatprep.mubr.msk.f32.mxu1 %vm3085_vm1, %v3084_v48 }
  0x51   :  { %2710 = vmatprep.subr.mxu0 %v3084_v48  ;;  %2714 = vmatprep.mubr.msk.f32.mxu0 %vm3085_vm1, %v3084_v48 }
  0x52   :  { %2711 = vmatpush3.msra.mxu0 %v520_v62  ;;  %2717 = vmatprep.subr.mxu1 %v3084_v48 }
  0x53   :  { %2712 = vmatprep.subr.mxu0 %v3084_v48 }
  0x54   :  { %2713 = vmatpush3.msra.mxu0 %v519_v0 }
  0x55   :  { %2736 = vmatprep.subr.mxu0 %v3084_v48 }
  0xe2   :  { %v2388_v1 = vpop.f32.mrf.mxu0 }
  0xe4   :  { %v2389_v2 = vpop.f32.mrf.mxu0 }
  0xe5   :  { %v2444_v3 = vpop.f32.mrf.mxu1  ;;  %v2390_v26 = vadd.f32 %v2389_v2, %v2388_v1 }
  0xe7   :  { %v2391_v4 = vpop.f32.mrf.mxu0  ;;  %v2445_v5 = vpop.f32.mrf.mxu1  ;;  %v254_v35 = vadd.f32 %v2390_v26, %v2204_v28 }
  0xe8   :  { %v2446_v36 = vadd.f32 %v2445_v5, %v2444_v3 }
  0xe9   :  { %v2392_v6 = vpop.f32.mrf.mxu0 }
  0xea   :  { %v2447_v7 = vpop.f32.mrf.mxu1  ;;  %v2393_v23 = vadd.f32 %v2392_v6, %v2391_v4  ;;  %v359_v51 = vadd.f32 %v2446_v36, %v254_v35  ;;  %v2227_v35 = vld [vmem:[%s4190_s3 + $0xa0] sm:$0xff] }
  0xeb   :  { %v2394_v8 = vpop.f32.mrf.mxu0  ;;  %v2236_v36 = vld [vmem:[%s4190_s3 + $0xe0] sm:$0xff] }
  0xec   :  { %v2448_v9 = vpop.f32.mrf.mxu1  ;;  %v259_v30 = vadd.f32 %v2393_v23, %v2204_v28  ;;  %v2230_v23 = vld [vmem:[%s4190_s3 + $0xb8] sm:$0xff] }
  0xed   :  { %v2395_v10 = vpop.f32.mrf.mxu0  ;;  %v2449_v31 = vadd.f32 %v2448_v9, %v2447_v7 }
  0xee   :  { %v2450_v11 = vpop.f32.mrf.mxu1  ;;  %v2396_v37 = vadd.f32 %v2395_v10, %v2394_v8 }
  0xef   :  { %v2397_v12 = vpop.f32.mrf.mxu0  ;;  %v364_v43 = vadd.f32 %v2449_v31, %v259_v30  ;;  %v2229_v30 = vld [vmem:[%s4190_s3 + $0xb0] sm:$0xff] }
  0xf0   :  { %v2451_v13 = vpop.f32.mrf.mxu1  ;;  %v264_v47 = vadd.f32 %v2396_v37, %v2204_v28  ;;  %v2238_v31 = vld [vmem:[%s4190_s3 + $0xf0] sm:$0xff]  ;;  %v2226_v37 = vld [vmem:[%s4190_s3 + $0x98] sm:$0xff] }
  0xf1   :  { %v2398_v14 = vpop.f32.mrf.mxu0  ;;  %v2452_v49 = vadd.f32 %v2451_v13, %v2450_v11 }
  0xf2   :  { %v2453_v15 = vpop.f32.mrf.mxu1  ;;  %v2399_v32 = vadd.f32 %v2398_v14, %v2397_v12 }
  0xf3   :  { %v2400_v16 = vpop.f32.mrf.mxu0  ;;  %v369_v2 = vadd.f32 %v2452_v49, %v264_v47  ;;  %v2257_v49 = vld [vmem:[%s4190_s3 + $0x178] sm:$0xff] }
  0xf4   :  { %v2454_v17 = vpop.f32.mrf.mxu1  ;;  %v269_v41 = vadd.f32 %v2399_v32, %v2204_v28 }
  0xf5   :  { %v2401_v18 = vpop.f32.mrf.mxu0  ;;  %v2455_v42 = vadd.f32 %v2454_v17, %v2453_v15 }
  0xf6   :  { %v2456_v19 = vpop.f32.mrf.mxu1  ;;  %v2402_v44 = vadd.f32 %v2401_v18, %v2400_v16 }
  0xf7   :  { %v2403_v20 = vpop.f32.mrf.mxu0  ;;  %v374_v58 = vadd.f32 %v2455_v42, %v269_v41  ;;  %v2224_v41 = vld [vmem:[%s4190_s3 + $0x88] sm:$0xff] }
  0xf8   :  { %v2457_v21 = vpop.f32.mrf.mxu1  ;;  %v274_v59 = vadd.f32 %v2402_v44, %v2204_v28  ;;  %v2233_v42 = vld [vmem:[%s4190_s3 + $0xc8] sm:$0xff]  ;;  %v2232_v44 = vld [vmem:[%s4190_s3 + $0xc0] sm:$0xff] }
  0xf9   :  { %v2404_v22 = vpop.f32.mrf.mxu0  ;;  %v2458_v60 = vadd.f32 %v2457_v21, %v2456_v19 }
  0xfa   :  { %v2459_v24 = vpop.f32.mrf.mxu1  ;;  %v2405_v39 = vadd.f32 %v2404_v22, %v2403_v20 }
  0xfb   :  { %v2406_v25 = vpop.f32.mrf.mxu0  ;;  %v379_v10 = vadd.f32 %v2458_v60, %v274_v59  ;;  %v2252_v59 = vld [vmem:[%s4190_s3 + $0x150] sm:$0xff]  ;;  %v2242_v60 = vld [vmem:[%s4190_s3 + $0x108] sm:$0xff] }
  0xfc   :  { %v2460_v27 = vpop.f32.mrf.mxu1  ;;  %v279_v52 = vadd.f32 %v2405_v39, %v2204_v28  ;;  %v2225_v39 = vld [vmem:[%s4190_s3 + $0x90] sm:$0xff] }
  0xfd   :  { %v2407_v29 = vpop.f32.mrf.mxu0  ;;  %v2461_v53 = vadd.f32 %v2460_v27, %v2459_v24  ;;  %v2239_v24 = vld [vmem:[%s4190_s3 + $0xf8] sm:$0xff] }
  0xfe   :  { %v2462_v33 = vpop.f32.mrf.mxu1  ;;  %v2408_v63 = vadd.f32 %v2407_v29, %v2406_v25 }
  0xff   :  { %v2409_v34 = vpop.f32.mrf.mxu0  ;;  %v384_v4 = vadd.f32 %v2461_v53, %v279_v52  ;;  %v2246_v52 = vld [vmem:[%s4190_s3 + $0x128] sm:$0xff] }
 0x100   :  { %v2463_v38 = vpop.f32.mrf.mxu1  ;;  %v284_v11 = vadd.f32 %v2408_v63, %v2204_v28  ;;  %v2255_v53 = vld [vmem:[%s4190_s3 + $0x168] sm:$0xff]  ;;  %v2250_v63 = vld [vmem:[%s4190_s3 + $0x140] sm:$0xff] }
 0x101   :  { %v2410_v40 = vpop.f32.mrf.mxu0  ;;  %v2464_v12 = vadd.f32 %v2463_v38, %v2462_v33  ;;  %v2228_v33 = vld [vmem:[%s4190_s3 + $0xa8] sm:$0xff]  ;;  %v2235_v38 = vld [vmem:[%s4190_s3 + $0xd8] sm:$0xff] }
 0x102   :  { %v2465_v45 = vpop.f32.mrf.mxu1  ;;  %v2411_v55 = vadd.f32 %v2410_v40, %v2409_v34  ;;  %v2237_v34 = vld [vmem:[%s4190_s3 + $0xe8] sm:$0xff]  ;;  %v2234_v40 = vld [vmem:[%s4190_s3 + $0xd0] sm:$0xff] }
 0x103   :  { %v2669_v46 = vpop.f32.mrf.mxu0  ;;  %v389_v22 = vadd.f32 %v2464_v12, %v284_v11  ;;  %v2271_v11 = vld [vmem:[%s4190_s3 + $0x1d8] sm:$0xff]  ;;  %v2261_v12 = vld [vmem:[%s4190_s3 + $0x190] sm:$0xff] }
 0x104   :  { %v469_v50 = vadd.f32 %v2669_v46, %v364_v43  ;;  %v2466_v61 = vpop.f32.mrf.mxu1  ;;  %v289_v5 = vadd.f32 %v2411_v55, %v2204_v28  ;;  %v2223_v43 = vld [vmem:[%s4190_s3 + $0x80] sm:$0xff] }
 0x105   :  { %v463_v54 = vpop.f32.mrf.mxu0  ;;  %v2467_v6 = vadd.f32 %v2466_v61, %v2465_v45  ;;  %v2248_v45 = vld [vmem:[%s4190_s3 + $0x138] sm:$0xff]  ;;  %v2254_v55 = vld [vmem:[%s4190_s3 + $0x160] sm:$0xff]  ;;  %v2251_v61 = vld [vmem:[%s4190_s3 + $0x148] sm:$0xff] }
 0x106   :  { %v503_v56 = vmax.f32 %v469_v50, 0.0  ;;  %v464_v57 = vadd.f32 %v463_v54, %v359_v51  ;;  %v2247_v50 = vld [vmem:[%s4190_s3 + $0x130] sm:$0xff]  ;;  %v2245_v54 = vld [vmem:[%s4190_s3 + $0x120] sm:$0xff] }
 0x107   :  { %v2672_v62 = vpop.f32.mrf.mxu0  ;;  %v394_v18 = vadd.f32 %v2467_v6, %v289_v5  ;;  %v2256_v51 = vld [vmem:[%s4190_s3 + $0x170] sm:$0xff]  ;;  %v2264_v6 = vld [vmem:[%s4190_s3 + $0x1a8] sm:$0xff] }
 0x108   :  { %511 = vst.msk [vmem:[#allocation2 + $0x8] sm:$0xff] %vm162_vm0, %v503_v56  ;;  %v502_v0 = vmax.f32 %v464_v57, 0.0  ;;  %v479_v1 = vadd.f32 %v2672_v62, %v374_v58  ;;  %v2244_v56 = vld [vmem:[%s4190_s3 + $0x118] sm:$0xff]  ;;  %v2243_v58 = vld [vmem:[%s4190_s3 + $0x110] sm:$0xff]  ;;  %v2241_v62 = vld [vmem:[%s4190_s3 + $0x100] sm:$0xff] }
 0x109   :  { %v473_v3 = vpop.f32.mrf.mxu0  ;;  %v2253_v57 = vld [vmem:[%s4190_s3 + $0x158] sm:$0xff]  ;;  %v2274_v5 = vld [vmem:[%s4190_s3 + $0x1f0] sm:$0xff] }
 0x10a   :  { %510 = vst.msk [vmem:[#allocation2] sm:$0xff] %vm162_vm0, %v502_v0  ;;  %v505_v7 = vmax.f32 %v479_v1, 0.0  ;;  %v474_v8 = vadd.f32 %v473_v3, %v369_v2  ;;  %v2266_v0 = vld [vmem:[%s4190_s3 + $0x1b8] sm:$0xff] }
 0x10b   :  { %v2675_v9 = vpop.f32.mrf.mxu0  ;;  %v2275_v3 = vld [vmem:[%s4190_s3 + $0x1f8] sm:$0xff] }
 0x10c   :  { %513 = vst.msk [vmem:[#allocation2 + $0x18] sm:$0xff] %vm162_vm0, %v505_v7  ;;  %v504_v13 = vmax.f32 %v474_v8, 0.0  ;;  %v489_v14 = vadd.f32 %v2675_v9, %v384_v4  ;;  %v2265_v4 = vld [vmem:[%s4190_s3 + $0x1b0] sm:$0xff]  ;;  %v2273_v7 = vld [vmem:[%s4190_s3 + $0x1e8] sm:$0xff]  ;;  %v2263_v8 = vld [vmem:[%s4190_s3 + $0x1a0] sm:$0xff] }
 0x10d   :  { %v483_v15 = vpop.f32.mrf.mxu0  ;;  %v2272_v9 = vld [vmem:[%s4190_s3 + $0x1e0] sm:$0xff] }
 0x10e   :  { %512 = vst.msk [vmem:[#allocation2 + $0x10] sm:$0xff] %vm162_vm0, %v504_v13  ;;  %v507_v16 = vmax.f32 %v489_v14, 0.0  ;;  %v484_v17 = vadd.f32 %v483_v15, %v379_v10  ;;  %v2262_v10 = vld [vmem:[%s4190_s3 + $0x198] sm:$0xff]  ;;  %v2270_v13 = vld [vmem:[%s4190_s3 + $0x1d0] sm:$0xff]  ;;  %v2260_v14 = vld [vmem:[%s4190_s3 + $0x188] sm:$0xff] }
 0x10f   :  { %v2678_v19 = vpop.f32.mrf.mxu0  ;;  %v683_v46 = vld [vmem:[#allocation2 + $0x8] sm:$0xf]  ;;  %v767_v47 = vld [vmem:[#allocation2 + $0xc] sm:$0xf] }
 0x110   :  { %515 = vst.msk [vmem:[#allocation2 + $0x28] sm:$0xff] %vm162_vm0, %v507_v16  ;;  %v506_v20 = vmax.f32 %v484_v17, 0.0  ;;  %v499_v21 = vadd.f32 %v2678_v19, %v394_v18  ;;  %v2269_v15 = vld [vmem:[%s4190_s3 + $0x1c8] sm:$0xff]  ;;  %v2259_v16 = vld [vmem:[%s4190_s3 + $0x180] sm:$0xff]  ;;  %v2284_v18 = vld [vmem:[%s4190_s3 + $0x238] sm:$0xff] }
 0x111   :  { %v493_v25 = vpop.f32.mrf.mxu0  ;;  %v527_v26 = vld [vmem:[#allocation2 + $0x4] sm:$0xf]  ;;  %v518_v27 = vld [vmem:[#allocation2] sm:$0xf] }
 0x112   :  { %514 = vst.msk [vmem:[#allocation2 + $0x20] sm:$0xff] %vm162_vm0, %v506_v20  ;;  %v509_v28 = vmax.f32 %v499_v21, 0.0  ;;  %v494_v29 = vadd.f32 %v493_v25, %v389_v22  ;;  %2696 = vmatmul.mubr.msk.f32.vlgmr.msra.gmra.mxu1 %vm162_vm0, %v527_v26  ;;  %2715 = vmatmul.mubr.msk.f32.vlgmr.msra.gmra.mxu0 %vm162_vm0, %v518_v27  ;;  %v2268_v17 = vld [vmem:[%s4190_s3 + $0x1c0] sm:$0xff]  ;;  %v2293_v21 = vld [vmem:[%s4190_s3 + $0x278] sm:$0xff]  ;;  %v2283_v22 = vld [vmem:[%s4190_s3 + $0x230] sm:$0xff] }
 0x113   :  { %2718 = vmatpush3.msra.mxu1 %v2230_v23  ;;  %2737 = vmatpush3.msra.mxu0 %v2239_v24  ;;  %v1019_v19 = vld [vmem:[#allocation2 + $0x18] sm:$0xf]  ;;  %v1103_v20 = vld [vmem:[#allocation2 + $0x1c] sm:$0xf]  ;;  %v2292_v23 = vld [vmem:[%s4190_s3 + $0x270] sm:$0xff] }
 0x114   :  { %517 = vst.msk [vmem:[#allocation2 + $0x38] sm:$0xff] %vm162_vm0, %v509_v28  ;;  %v508_v32 = vmax.f32 %v494_v29, 0.0  ;;  %2719 = vmatprep.subr.mxu1 %v3084_v48  ;;  %2738 = vmatprep.subr.mxu0 %v3084_v48  ;;  %v2282_v24 = vld [vmem:[%s4190_s3 + $0x228] sm:$0xff]  ;;  %v2281_v26 = vld [vmem:[%s4190_s3 + $0x220] sm:$0xff]  ;;  %v2280_v28 = vld [vmem:[%s4190_s3 + $0x218] sm:$0xff] }
 0x115   :  { %2720 = vmatpush3.msra.mxu1 %v2229_v30  ;;  %2739 = vmatpush3.msra.mxu0 %v2238_v31  ;;  %v851_v1 = vld [vmem:[#allocation2 + $0x10] sm:$0xf]  ;;  %v935_v2 = vld [vmem:[#allocation2 + $0x14] sm:$0xf]  ;;  %v2291_v25 = vld [vmem:[%s4190_s3 + $0x268] sm:$0xff] }
 0x116   :  { %516 = vst.msk [vmem:[#allocation2 + $0x30] sm:$0xff] %vm162_vm0, %v508_v32  ;;  %2721 = vmatprep.subr.mxu1 %v3084_v48  ;;  %2740 = vmatprep.subr.mxu0 %v3084_v48  ;;  %v2290_v27 = vld [vmem:[%s4190_s3 + $0x260] sm:$0xff]  ;;  %v2289_v29 = vld [vmem:[%s4190_s3 + $0x258] sm:$0xff]  ;;  %v2279_v30 = vld [vmem:[%s4190_s3 + $0x210] sm:$0xff] }
 0x117   :  { %2722 = vmatpush3.msra.mxu1 %v2228_v33  ;;  %2741 = vmatpush3.msra.mxu0 %v2237_v34  ;;  %v2288_v31 = vld [vmem:[%s4190_s3 + $0x250] sm:$0xff]  ;;  %v2278_v32 = vld [vmem:[%s4190_s3 + $0x208] sm:$0xff]  ;;  %v2277_v34 = vld [vmem:[%s4190_s3 + $0x200] sm:$0xff] }
 0x118   :  { %2723 = vmatprep.subr.mxu1 %v3084_v48  ;;  %2742 = vmatprep.subr.mxu0 %v3084_v48  ;;  %v2287_v33 = vld [vmem:[%s4190_s3 + $0x248] sm:$0xff] }
 0x119   :  { %2724 = vmatpush3.msra.mxu1 %v2227_v35  ;;  %2743 = vmatpush3.msra.mxu0 %v2236_v36  ;;  %v2286_v35 = vld [vmem:[%s4190_s3 + $0x240] sm:$0xff]  ;;  %v2302_v36 = vld [vmem:[%s4190_s3 + $0x2b8] sm:$0xff] }
 0x11a   :  { %2725 = vmatprep.subr.mxu1 %v3084_v48  ;;  %2744 = vmatprep.subr.mxu0 %v3084_v48 }
 0x11b   :  { %2726 = vmatpush3.msra.mxu1 %v2226_v37  ;;  %2745 = vmatpush3.msra.mxu0 %v2235_v38  ;;  %v1187_v37 = vld [vmem:[#allocation2 + $0x20] sm:$0xf]  ;;  %v1271_v38 = vld [vmem:[#allocation2 + $0x24] sm:$0xf] }
 0x11c   :  { %2727 = vmatprep.subr.mxu1 %v3084_v48  ;;  %2746 = vmatprep.subr.mxu0 %v3084_v48 }
 0x11d   :  { %2728 = vmatpush3.msra.mxu1 %v2225_v39  ;;  %2747 = vmatpush3.msra.mxu0 %v2234_v40  ;;  %v2311_v39 = vld [vmem:[%s4190_s3 + $0x2f8] sm:$0xff]  ;;  %v2301_v40 = vld [vmem:[%s4190_s3 + $0x2b0] sm:$0xff] }
 0x11e   :  { %2729 = vmatprep.subr.mxu1 %v3084_v48  ;;  %2748 = vmatprep.subr.mxu0 %v3084_v48 }
 0x11f   :  { %2730 = vmatpush3.msra.mxu1 %v2224_v41  ;;  %2749 = vmatpush3.msra.mxu0 %v2233_v42  ;;  %v2310_v41 = vld [vmem:[%s4190_s3 + $0x2f0] sm:$0xff]  ;;  %v2300_v42 = vld [vmem:[%s4190_s3 + $0x2a8] sm:$0xff] }
 0x120   :  { %2731 = vmatprep.subr.mxu1 %v3084_v48  ;;  %2750 = vmatprep.subr.mxu0 %v3084_v48 }
 0x121   :  { %2732 = vmatpush3.msra.mxu1 %v2223_v43  ;;  %2733 = vmatprep.mubr.msk.f32.mxu1 %vm3085_vm1, %v3084_v48  ;;  %v2309_v43 = vld [vmem:[%s4190_s3 + $0x2e8] sm:$0xff] }
 0x122   :  { %2751 = vmatpush3.msra.mxu0 %v2232_v44  ;;  %2752 = vmatprep.mubr.msk.f32.mxu0 %vm3085_vm1, %v3084_v48  ;;  %v2299_v44 = vld [vmem:[%s4190_s3 + $0x2a0] sm:$0xff] }
 0x123   :  { %2734 = vmatmul.mubr.msk.f32.vlgmr.msra.gmra.mxu1 %vm162_vm0, %v683_v46  ;;  %2753 = vmatmul.mubr.msk.f32.vlgmr.msra.gmra.mxu0 %vm162_vm0, %v767_v47  ;;  %v2298_v46 = vld [vmem:[%s4190_s3 + $0x298] sm:$0xff] }
 0x124   :  { %2755 = vmatprep.subr.mxu1 %v3084_v48  ;;  %2774 = vmatprep.subr.mxu0 %v3084_v48  ;;  %v2307_v47 = vld [vmem:[%s4190_s3 + $0x2d8] sm:$0xff] }
 0x125   :  { %2756 = vmatpush3.msra.mxu1 %v2248_v45  ;;  %2775 = vmatpush3.msra.mxu0 %v2257_v49  ;;  %v2308_v45 = vld [vmem:[%s4190_s3 + $0x2e0] sm:$0xff]  ;;  %v2297_v49 = vld [vmem:[%s4190_s3 + $0x290] sm:$0xff] }
 0x126   :  { %2757 = vmatprep.subr.mxu1 %v3084_v48  ;;  %2776 = vmatprep.subr.mxu0 %v3084_v48 }
 0x127   :  { %2758 = vmatpush3.msra.mxu1 %v2247_v50  ;;  %2777 = vmatpush3.msra.mxu0 %v2256_v51  ;;  %v2306_v50 = vld [vmem:[%s4190_s3 + $0x2d0] sm:$0xff]  ;;  %v2296_v51 = vld [vmem:[%s4190_s3 + $0x288] sm:$0xff] }
 0x128   :  { %2759 = vmatprep.subr.mxu1 %v3084_v48  ;;  %2778 = vmatprep.subr.mxu0 %v3084_v48 }
 0x129   :  { %2760 = vmatpush3.msra.mxu1 %v2246_v52  ;;  %2779 = vmatpush3.msra.mxu0 %v2255_v53  ;;  %v2305_v52 = vld [vmem:[%s4190_s3 + $0x2c8] sm:$0xff]  ;;  %v2295_v53 = vld [vmem:[%s4190_s3 + $0x280] sm:$0xff] }
 0x12a   :  { %2761 = vmatprep.subr.mxu1 %v3084_v48  ;;  %2780 = vmatprep.subr.mxu0 %v3084_v48 }
 0x12b   :  { %2762 = vmatpush3.msra.mxu1 %v2245_v54  ;;  %2781 = vmatpush3.msra.mxu0 %v2254_v55  ;;  %v2304_v54 = vld [vmem:[%s4190_s3 + $0x2c0] sm:$0xff]  ;;  %v2320_v55 = vld [vmem:[%s4190_s3 + $0x338] sm:$0xff] }
 0x12c   :  { %2763 = vmatprep.subr.mxu1 %v3084_v48  ;;  %2782 = vmatprep.subr.mxu0 %v3084_v48 }
 0x12d   :  { %2764 = vmatpush3.msra.mxu1 %v2244_v56  ;;  %2783 = vmatpush3.msra.mxu0 %v2253_v57  ;;  %v1355_v56 = vld [vmem:[#allocation2 + $0x28] sm:$0xf]  ;;  %v1439_v57 = vld [vmem:[#allocation2 + $0x2c] sm:$0xf] }
 0x12e   :  { %2765 = vmatprep.subr.mxu1 %v3084_v48  ;;  %2784 = vmatprep.subr.mxu0 %v3084_v48 }
 0x12f   :  { %2766 = vmatpush3.msra.mxu1 %v2243_v58  ;;  %2785 = vmatpush3.msra.mxu0 %v2252_v59  ;;  %v2329_v58 = vld [vmem:[%s4190_s3 + $0x378] sm:$0xff]  ;;  %v2319_v59 = vld [vmem:[%s4190_s3 + $0x330] sm:$0xff] }
 0x130   :  { %2767 = vmatprep.subr.mxu1 %v3084_v48  ;;  %2786 = vmatprep.subr.mxu0 %v3084_v48 }
 0x131   :  { %2768 = vmatpush3.msra.mxu1 %v2242_v60  ;;  %2787 = vmatpush3.msra.mxu0 %v2251_v61  ;;  %v2328_v60 = vld [vmem:[%s4190_s3 + $0x370] sm:$0xff]  ;;  %v2318_v61 = vld [vmem:[%s4190_s3 + $0x328] sm:$0xff] }
 0x132   :  { %2769 = vmatprep.subr.mxu1 %v3084_v48  ;;  %2788 = vmatprep.subr.mxu0 %v3084_v48 }
 0x133   :  { %2770 = vmatpush3.msra.mxu1 %v2241_v62  ;;  %2771 = vmatprep.mubr.msk.f32.mxu1 %vm3085_vm1, %v3084_v48  ;;  %v2327_v62 = vld [vmem:[%s4190_s3 + $0x368] sm:$0xff] }
 0x134   :  { %2789 = vmatpush3.msra.mxu0 %v2250_v63  ;;  %2790 = vmatprep.mubr.msk.f32.mxu0 %vm3085_vm1, %v3084_v48  ;;  %v2317_v63 = vld [vmem:[%s4190_s3 + $0x320] sm:$0xff] }
 0x135   :  { %2772 = vmatmul.mubr.msk.f32.vlgmr.msra.gmra.mxu1 %vm162_vm0, %v851_v1  ;;  %2791 = vmatmul.mubr.msk.f32.vlgmr.msra.gmra.mxu0 %vm162_vm0, %v935_v2  ;;  %v2316_v1 = vld [vmem:[%s4190_s3 + $0x318] sm:$0xff] }
 0x136   :  { %2793 = vmatprep.subr.mxu1 %v3084_v48  ;;  %2812 = vmatprep.subr.mxu0 %v3084_v48  ;;  %v2325_v2 = vld [vmem:[%s4190_s3 + $0x358] sm:$0xff] }
 0x137   :  { %2794 = vmatpush3.msra.mxu1 %v2266_v0  ;;  %2813 = vmatpush3.msra.mxu0 %v2275_v3  ;;  %v2326_v0 = vld [vmem:[%s4190_s3 + $0x360] sm:$0xff]  ;;  %v2315_v3 = vld [vmem:[%s4190_s3 + $0x310] sm:$0xff] }
 0x138   :  { %2795 = vmatprep.subr.mxu1 %v3084_v48  ;;  %2814 = vmatprep.subr.mxu0 %v3084_v48 }
 0x139   :  { %2796 = vmatpush3.msra.mxu1 %v2265_v4  ;;  %2815 = vmatpush3.msra.mxu0 %v2274_v5  ;;  %v2324_v4 = vld [vmem:[%s4190_s3 + $0x350] sm:$0xff]  ;;  %v2314_v5 = vld [vmem:[%s4190_s3 + $0x308] sm:$0xff] }
 0x13a   :  { %2797 = vmatprep.subr.mxu1 %v3084_v48  ;;  %2816 = vmatprep.subr.mxu0 %v3084_v48 }
 0x13b   :  { %2798 = vmatpush3.msra.mxu1 %v2264_v6  ;;  %2817 = vmatpush3.msra.mxu0 %v2273_v7  ;;  %v2323_v6 = vld [vmem:[%s4190_s3 + $0x348] sm:$0xff]  ;;  %v2313_v7 = vld [vmem:[%s4190_s3 + $0x300] sm:$0xff] }
 0x13c   :  { %2799 = vmatprep.subr.mxu1 %v3084_v48  ;;  %2818 = vmatprep.subr.mxu0 %v3084_v48 }
 0x13d   :  { %2800 = vmatpush3.msra.mxu1 %v2263_v8  ;;  %2819 = vmatpush3.msra.mxu0 %v2272_v9  ;;  %v2322_v8 = vld [vmem:[%s4190_s3 + $0x340] sm:$0xff]  ;;  %v2338_v9 = vld [vmem:[%s4190_s3 + $0x3b8] sm:$0xff] }
 0x13e   :  { %2801 = vmatprep.subr.mxu1 %v3084_v48  ;;  %2820 = vmatprep.subr.mxu0 %v3084_v48 }
 0x13f   :  { %2802 = vmatpush3.msra.mxu1 %v2262_v10  ;;  %2821 = vmatpush3.msra.mxu0 %v2271_v11  ;;  %v1523_v10 = vld [vmem:[#allocation2 + $0x30] sm:$0xf]  ;;  %v1607_v11 = vld [vmem:[#allocation2 + $0x34] sm:$0xf] }
 0x140   :  { %2803 = vmatprep.subr.mxu1 %v3084_v48  ;;  %2822 = vmatprep.subr.mxu0 %v3084_v48 }
 0x141   :  { %2804 = vmatpush3.msra.mxu1 %v2261_v12  ;;  %2823 = vmatpush3.msra.mxu0 %v2270_v13  ;;  %v2347_v12 = vld [vmem:[%s4190_s3 + $0x3f8] sm:$0xff]  ;;  %v2337_v13 = vld [vmem:[%s4190_s3 + $0x3b0] sm:$0xff] }
 0x142   :  { %2805 = vmatprep.subr.mxu1 %v3084_v48  ;;  %2824 = vmatprep.subr.mxu0 %v3084_v48 }
 0x143   :  { %2806 = vmatpush3.msra.mxu1 %v2260_v14  ;;  %2825 = vmatpush3.msra.mxu0 %v2269_v15  ;;  %v2346_v14 = vld [vmem:[%s4190_s3 + $0x3f0] sm:$0xff]  ;;  %v2336_v15 = vld [vmem:[%s4190_s3 + $0x3a8] sm:$0xff] }
 0x144   :  { %2807 = vmatprep.subr.mxu1 %v3084_v48  ;;  %2826 = vmatprep.subr.mxu0 %v3084_v48 }
 0x145   :  { %2808 = vmatpush3.msra.mxu1 %v2259_v16  ;;  %2809 = vmatprep.mubr.msk.f32.mxu1 %vm3085_vm1, %v3084_v48  ;;  %v2345_v16 = vld [vmem:[%s4190_s3 + $0x3e8] sm:$0xff] }
 0x146   :  { %2827 = vmatpush3.msra.mxu0 %v2268_v17  ;;  %2828 = vmatprep.mubr.msk.f32.mxu0 %vm3085_vm1, %v3084_v48  ;;  %v2335_v17 = vld [vmem:[%s4190_s3 + $0x3a0] sm:$0xff] }
 0x147   :  { %2810 = vmatmul.mubr.msk.f32.vlgmr.msra.gmra.mxu1 %vm162_vm0, %v1019_v19  ;;  %2829 = vmatmul.mubr.msk.f32.vlgmr.msra.gmra.mxu0 %vm162_vm0, %v1103_v20  ;;  %v2334_v19 = vld [vmem:[%s4190_s3 + $0x398] sm:$0xff] }
 0x148   :  { %2831 = vmatprep.subr.mxu1 %v3084_v48  ;;  %2850 = vmatprep.subr.mxu0 %v3084_v48  ;;  %v2343_v20 = vld [vmem:[%s4190_s3 + $0x3d8] sm:$0xff] }
 0x149   :  { %2832 = vmatpush3.msra.mxu1 %v2284_v18  ;;  %2851 = vmatpush3.msra.mxu0 %v2293_v21  ;;  %v2344_v18 = vld [vmem:[%s4190_s3 + $0x3e0] sm:$0xff]  ;;  %v2333_v21 = vld [vmem:[%s4190_s3 + $0x390] sm:$0xff] }
 0x14a   :  { %2833 = vmatprep.subr.mxu1 %v3084_v48  ;;  %2852 = vmatprep.subr.mxu0 %v3084_v48 }
 0x14b   :  { %2834 = vmatpush3.msra.mxu1 %v2283_v22  ;;  %2853 = vmatpush3.msra.mxu0 %v2292_v23  ;;  %v2342_v22 = vld [vmem:[%s4190_s3 + $0x3d0] sm:$0xff]  ;;  %v2332_v23 = vld [vmem:[%s4190_s3 + $0x388] sm:$0xff] }
 0x14c   :  { %2835 = vmatprep.subr.mxu1 %v3084_v48  ;;  %2854 = vmatprep.subr.mxu0 %v3084_v48 }
 0x14d   :  { %2836 = vmatpush3.msra.mxu1 %v2282_v24  ;;  %2855 = vmatpush3.msra.mxu0 %v2291_v25  ;;  %v2341_v24 = vld [vmem:[%s4190_s3 + $0x3c8] sm:$0xff]  ;;  %v2331_v25 = vld [vmem:[%s4190_s3 + $0x380] sm:$0xff] }
 0x14e   :  { %2837 = vmatprep.subr.mxu1 %v3084_v48  ;;  %2856 = vmatprep.subr.mxu0 %v3084_v48 }
 0x14f   :  { %2838 = vmatpush3.msra.mxu1 %v2281_v26  ;;  %2857 = vmatpush3.msra.mxu0 %v2290_v27  ;;  %v2340_v26 = vld [vmem:[%s4190_s3 + $0x3c0] sm:$0xff]  ;;  %v1691_v27 = vld [vmem:[#allocation2 + $0x38] sm:$0xf] }
 0x150   :  { %2839 = vmatprep.subr.mxu1 %v3084_v48  ;;  %2858 = vmatprep.subr.mxu0 %v3084_v48 }
 0x151   :  { %2840 = vmatpush3.msra.mxu1 %v2280_v28  ;;  %2859 = vmatpush3.msra.mxu0 %v2289_v29  ;;  %v1775_v28 = vld [vmem:[#allocation2 + $0x3c] sm:$0xf] }
 0x152   :  { %2841 = vmatprep.subr.mxu1 %v3084_v48  ;;  %2860 = vmatprep.subr.mxu0 %v3084_v48  ;;  %v1873_v29 = vld [vmem:[%s4192_s5 + $0x18] sm:$0xff] }
 0x153   :  { %2842 = vmatpush3.msra.mxu1 %v2279_v30  ;;  %2861 = vmatpush3.msra.mxu0 %v2288_v31 }
 0x154   :  { %2843 = vmatprep.subr.mxu1 %v3084_v48  ;;  %2862 = vmatprep.subr.mxu0 %v3084_v48 }
 0x155   :  { %2844 = vmatpush3.msra.mxu1 %v2278_v32  ;;  %2863 = vmatpush3.msra.mxu0 %v2287_v33  ;;  %v1872_v32 = vld [vmem:[%s4192_s5 + $0x10] sm:$0xff] }
 0x156   :  { %2845 = vmatprep.subr.mxu1 %v3084_v48  ;;  %2864 = vmatprep.subr.mxu0 %v3084_v48 }
 0x157   :  { %2846 = vmatpush3.msra.mxu1 %v2277_v34  ;;  %2847 = vmatprep.mubr.msk.f32.mxu1 %vm3085_vm1, %v3084_v48 }
 0x158   :  { %2865 = vmatpush3.msra.mxu0 %v2286_v35  ;;  %2866 = vmatprep.mubr.msk.f32.mxu0 %vm3085_vm1, %v3084_v48 }
 0x159   :  { %2848 = vmatmul.mubr.msk.f32.vlgmr.msra.gmra.mxu1 %vm162_vm0, %v1187_v37  ;;  %2867 = vmatmul.mubr.msk.f32.vlgmr.msra.gmra.mxu0 %vm162_vm0, %v1271_v38  ;;  %v1870_v37 = vld [vmem:[%s4192_s5] sm:$0xff] }
 0x15a   :  { %2869 = vmatprep.subr.mxu1 %v3084_v48  ;;  %2888 = vmatprep.subr.mxu0 %v3084_v48 }
 0x15b   :  { %2870 = vmatpush3.msra.mxu1 %v2302_v36  ;;  %2889 = vmatpush3.msra.mxu0 %v2311_v39  ;;  %v1871_v36 = vld [vmem:[%s4192_s5 + $0x8] sm:$0xff] }
 0x15c   :  { %2871 = vmatprep.subr.mxu1 %v3084_v48  ;;  %2890 = vmatprep.subr.mxu0 %v3084_v48 }
 0x15d   :  { %2872 = vmatpush3.msra.mxu1 %v2301_v40  ;;  %2891 = vmatpush3.msra.mxu0 %v2310_v41 }
 0x15e   :  { %2873 = vmatprep.subr.mxu1 %v3084_v48  ;;  %2892 = vmatprep.subr.mxu0 %v3084_v48 }
 0x15f   :  { %2874 = vmatpush3.msra.mxu1 %v2300_v42  ;;  %2893 = vmatpush3.msra.mxu0 %v2309_v43 }
 0x160   :  { %2875 = vmatprep.subr.mxu1 %v3084_v48  ;;  %2894 = vmatprep.subr.mxu0 %v3084_v48 }
 0x161   :  { %2876 = vmatpush3.msra.mxu1 %v2299_v44  ;;  %2895 = vmatpush3.msra.mxu0 %v2308_v45 }
 0x162   :  { %2877 = vmatprep.subr.mxu1 %v3084_v48  ;;  %2896 = vmatprep.subr.mxu0 %v3084_v48 }
 0x163   :  { %2878 = vmatpush3.msra.mxu1 %v2298_v46  ;;  %2897 = vmatpush3.msra.mxu0 %v2307_v47 }
 0x164   :  { %2879 = vmatprep.subr.mxu1 %v3084_v48  ;;  %2898 = vmatprep.subr.mxu0 %v3084_v48 }
 0x165   :  { %2880 = vmatpush3.msra.mxu1 %v2297_v49  ;;  %2899 = vmatpush3.msra.mxu0 %v2306_v50 }
 0x166   :  { %2881 = vmatprep.subr.mxu1 %v3084_v48  ;;  %2900 = vmatprep.subr.mxu0 %v3084_v48 }
 0x167   :  { %2882 = vmatpush3.msra.mxu1 %v2296_v51  ;;  %2901 = vmatpush3.msra.mxu0 %v2305_v52 }
 0x168   :  { %2883 = vmatprep.subr.mxu1 %v3084_v48  ;;  %2902 = vmatprep.subr.mxu0 %v3084_v48 }
 0x169   :  { %2884 = vmatpush3.msra.mxu1 %v2295_v53  ;;  %2885 = vmatprep.mubr.msk.f32.mxu1 %vm3085_vm1, %v3084_v48 }
 0x16a   :  { %2903 = vmatpush3.msra.mxu0 %v2304_v54  ;;  %2904 = vmatprep.mubr.msk.f32.mxu0 %vm3085_vm1, %v3084_v48 }
 0x16b   :  { %2886 = vmatmul.mubr.msk.f32.vlgmr.msra.gmra.mxu1 %vm162_vm0, %v1355_v56  ;;  %2905 = vmatmul.mubr.msk.f32.vlgmr.msra.gmra.mxu0 %vm162_vm0, %v1439_v57 }
 0x16c   :  { %2907 = vmatprep.subr.mxu1 %v3084_v48  ;;  %2926 = vmatprep.subr.mxu0 %v3084_v48 }
 0x16d   :  { %2908 = vmatpush3.msra.mxu1 %v2320_v55  ;;  %2927 = vmatpush3.msra.mxu0 %v2329_v58 }
 0x16e   :  { %2909 = vmatprep.subr.mxu1 %v3084_v48  ;;  %2928 = vmatprep.subr.mxu0 %v3084_v48 }
 0x16f   :  { %2910 = vmatpush3.msra.mxu1 %v2319_v59  ;;  %2929 = vmatpush3.msra.mxu0 %v2328_v60 }
 0x170   :  { %2911 = vmatprep.subr.mxu1 %v3084_v48  ;;  %2930 = vmatprep.subr.mxu0 %v3084_v48 }
 0x171   :  { %2912 = vmatpush3.msra.mxu1 %v2318_v61  ;;  %2931 = vmatpush3.msra.mxu0 %v2327_v62 }
 0x172   :  { %2913 = vmatprep.subr.mxu1 %v3084_v48  ;;  %2932 = vmatprep.subr.mxu0 %v3084_v48 }
 0x173   :  { %2914 = vmatpush3.msra.mxu1 %v2317_v63  ;;  %2933 = vmatpush3.msra.mxu0 %v2326_v0 }
 0x174   :  { %2915 = vmatprep.subr.mxu1 %v3084_v48  ;;  %2934 = vmatprep.subr.mxu0 %v3084_v48 }
 0x175   :  { %2916 = vmatpush3.msra.mxu1 %v2316_v1  ;;  %2935 = vmatpush3.msra.mxu0 %v2325_v2 }
 0x176   :  { %2917 = vmatprep.subr.mxu1 %v3084_v48  ;;  %2936 = vmatprep.subr.mxu0 %v3084_v48 }
 0x177   :  { %2918 = vmatpush3.msra.mxu1 %v2315_v3  ;;  %2937 = vmatpush3.msra.mxu0 %v2324_v4 }
 0x178   :  { %2919 = vmatprep.subr.mxu1 %v3084_v48  ;;  %2938 = vmatprep.subr.mxu0 %v3084_v48 }
 0x179   :  { %2920 = vmatpush3.msra.mxu1 %v2314_v5  ;;  %2939 = vmatpush3.msra.mxu0 %v2323_v6 }
 0x17a   :  { %2921 = vmatprep.subr.mxu1 %v3084_v48  ;;  %2940 = vmatprep.subr.mxu0 %v3084_v48 }
 0x17b   :  { %2922 = vmatpush3.msra.mxu1 %v2313_v7  ;;  %2923 = vmatprep.mubr.msk.f32.mxu1 %vm3085_vm1, %v3084_v48 }
 0x17c   :  { %2941 = vmatpush3.msra.mxu0 %v2322_v8  ;;  %2942 = vmatprep.mubr.msk.f32.mxu0 %vm3085_vm1, %v3084_v48 }
 0x17d   :  { %2924 = vmatmul.mubr.msk.f32.vlgmr.msra.gmra.mxu1 %vm162_vm0, %v1523_v10  ;;  %2943 = vmatmul.mubr.msk.f32.vlgmr.msra.gmra.mxu0 %vm162_vm0, %v1607_v11 }
 0x17e   :  { %2945 = vmatprep.subr.mxu1 %v3084_v48  ;;  %2964 = vmatprep.subr.mxu0 %v3084_v48 }
 0x17f   :  { %2946 = vmatpush3.msra.mxu1 %v2338_v9  ;;  %2965 = vmatpush3.msra.mxu0 %v2347_v12 }
 0x180   :  { %2947 = vmatprep.subr.mxu1 %v3084_v48  ;;  %2966 = vmatprep.subr.mxu0 %v3084_v48 }
 0x181   :  { %2948 = vmatpush3.msra.mxu1 %v2337_v13  ;;  %2967 = vmatpush3.msra.mxu0 %v2346_v14  ;;  %v2349_v14 = vld [vmem:[%s4191_s4] ss:$0 sm:$0xff] }
 0x182   :  { %2949 = vmatprep.subr.mxu1 %v3084_v48  ;;  %2968 = vmatprep.subr.mxu0 %v3084_v48 }
 0x183   :  { %2950 = vmatpush3.msra.mxu1 %v2336_v15  ;;  %2969 = vmatpush3.msra.mxu0 %v2345_v16 }
 0x184   :  { %2951 = vmatprep.subr.mxu1 %v3084_v48  ;;  %2970 = vmatprep.subr.mxu0 %v3084_v48 }
 0x185   :  { %2952 = vmatpush3.msra.mxu1 %v2335_v17  ;;  %2971 = vmatpush3.msra.mxu0 %v2344_v18 }
 0x186   :  { %2953 = vmatprep.subr.mxu1 %v3084_v48  ;;  %2972 = vmatprep.subr.mxu0 %v3084_v48 }
 0x187   :  { %2954 = vmatpush3.msra.mxu1 %v2334_v19  ;;  %2973 = vmatpush3.msra.mxu0 %v2343_v20  ;;  %v1963_v20 = vld [vmem:[%s4194_s7 + $0x38] sm:$0xff] }
 0x188   :  { %2955 = vmatprep.subr.mxu1 %v3084_v48  ;;  %2974 = vmatprep.subr.mxu0 %v3084_v48 }
 0x189   :  { %2956 = vmatpush3.msra.mxu1 %v2333_v21  ;;  %2975 = vmatpush3.msra.mxu0 %v2342_v22  ;;  %v1962_v21 = vld [vmem:[%s4194_s7 + $0x30] sm:$0xff]  ;;  %v1961_v22 = vld [vmem:[%s4194_s7 + $0x28] sm:$0xff] }
 0x18a   :  { %2957 = vmatprep.subr.mxu1 %v3084_v48  ;;  %2976 = vmatprep.subr.mxu0 %v3084_v48 }
 0x18b   :  { %2958 = vmatpush3.msra.mxu1 %v2332_v23  ;;  %2977 = vmatpush3.msra.mxu0 %v2341_v24  ;;  %v1960_v23 = vld [vmem:[%s4194_s7 + $0x20] sm:$0xff]  ;;  %v1959_v24 = vld [vmem:[%s4194_s7 + $0x18] sm:$0xff] }
 0x18c   :  { %2959 = vmatprep.subr.mxu1 %v3084_v48  ;;  %2978 = vmatprep.subr.mxu0 %v3084_v48 }
 0x18d   :  { %2960 = vmatpush3.msra.mxu1 %v2331_v25  ;;  %2961 = vmatprep.mubr.msk.f32.mxu1 %vm3085_vm1, %v3084_v48  ;;  %v1958_v25 = vld [vmem:[%s4194_s7 + $0x10] sm:$0xff] }
 0x18e   :  { %2979 = vmatpush3.msra.mxu0 %v2340_v26  ;;  %2980 = vmatprep.mubr.msk.f32.mxu0 %vm3085_vm1, %v3084_v48  ;;  %v1957_v26 = vld [vmem:[%s4194_s7 + $0x8] sm:$0xff] }
 0x18f   :  { %2962 = vmatmul.mubr.msk.f32.vlgmr.msra.gmra.mxu1 %vm162_vm0, %v1691_v27  ;;  %2981 = vmatmul.mubr.msk.f32.vlgmr.msra.gmra.mxu0 %vm162_vm0, %v1775_v28  ;;  %v1956_v27 = vld [vmem:[%s4194_s7] sm:$0xff]  ;;  %v2052_v28 = vld [vmem:[%s4196_s9 + $0x38] sm:$0xff] }
 0x190   :  { %2983 = vmatprep.subr.mxu1 %v3084_v48  ;;  %2991 = vmatprep.mubr.msk.f32.mxu1 %vm3085_vm1, %v3084_v48 }
 0x191   :  { %3013 = vmatprep.subr.mxu0 %v3084_v48  ;;  %3029 = vmatprep.mubr.msk.f32.mxu0 %vm3085_vm1, %v3084_v48 }
 0x192   :  { %2984 = vmatpush3.msra.mxu1 %v1873_v29  ;;  %v2051_v29 = vld [vmem:[%s4196_s9 + $0x30] sm:$0xff]  ;;  %3014 = vmatpush3.msra.mxu0 %v2052_v28 }
 0x193   :  { %2985 = vmatprep.subr.mxu1 %v3084_v48  ;;  %3015 = vmatprep.subr.mxu0 %v3084_v48 }
 0x194   :  { %2986 = vmatpush3.msra.mxu1 %v1872_v32  ;;  %3016 = vmatpush3.msra.mxu0 %v2051_v29  ;;  %v2048_v32 = vld [vmem:[%s4196_s9 + $0x18] sm:$0xff] }
 0x195   :  { %2987 = vmatprep.subr.mxu1 %v3084_v48  ;;  %3017 = vmatprep.subr.mxu0 %v3084_v48 }
 0x196   :  { %2988 = vmatpush3.msra.mxu1 %v1871_v36 }
 0x197   :  { %2989 = vmatprep.subr.mxu1 %v3084_v48 }
 0x198   :  { %2990 = vmatpush3.msra.mxu1 %v1870_v37 }
 0x199   :  { %2994 = vmatprep.subr.mxu1 %v3084_v48 }
 0x1d2   :  { %v606_v30 = vpop.f32.mrf.mxu1  ;;  %v679_v31 = vpop.f32.mrf.mxu0 }
 0x1d3   :  { %v680_v33 = vadd.f32 %v679_v31, %v606_v30  ;;  %v2050_v30 = vld [vmem:[%s4196_s9 + $0x28] sm:$0xff]  ;;  %v2049_v31 = vld [vmem:[%s4196_s9 + $0x20] sm:$0xff] }
 0x1d4   :  { %v2697_v34 = vpop.f32.mrf.mxu1  ;;  %v2716_v35 = vpop.f32.mrf.mxu0  ;;  %3018 = vmatpush3.msra.mxu0 %v2050_v30 }
 0x1d5   :  { %3019 = vmatprep.subr.mxu0 %v3084_v48 }
 0x1d6   :  { %3020 = vmatpush3.msra.mxu0 %v2049_v31 }
 0x1d7   :  { %3021 = vmatprep.subr.mxu0 %v3084_v48 }
 0x1d8   :  { %3022 = vmatpush3.msra.mxu0 %v2048_v32 }
 0x1d9   :  { %3023 = vmatprep.subr.mxu0 %v3084_v48 }
 0x1e3   :  { %v762_v38 = vpop.f32.mrf.mxu1  ;;  %v846_v39 = vpop.f32.mrf.mxu0 }
 0x1e4   :  { %v766_v40 = vadd.f32 %v762_v38, %v680_v33  ;;  %v2350_v33 = vld [vmem:[%s4193_s6] ss:$0 sm:$0xff]  ;;  %v2047_v38 = vld [vmem:[%s4196_s9 + $0x10] sm:$0xff] }
 0x1e5   :  { %v2735_v41 = vpop.f32.mrf.mxu1  ;;  %v2754_v42 = vpop.f32.mrf.mxu0  ;;  %3024 = vmatpush3.msra.mxu0 %v2047_v38 }
 0x1e6   :  { %v850_v43 = vadd.f32 %v846_v39, %v766_v40  ;;  %3025 = vmatprep.subr.mxu0 %v3084_v48  ;;  %v2046_v39 = vld [vmem:[%s4196_s9 + $0x8] sm:$0xff]  ;;  %v2045_v40 = vld [vmem:[%s4196_s9] sm:$0xff] }
 0x1e7   :  { %3026 = vmatpush3.msra.mxu0 %v2046_v39  ;;  %v2352_v41 = vld [vmem:[%s4195_s8] ss:$0 sm:$0xff]  ;;  %s3086_s8 = smov [#allocation3]  }
 0x1e8   :  { %3027 = vmatprep.subr.mxu0 %v3084_v48  ;;  %s2178_s9 = sshll.u32 %s3086_s8, 4  ;;  %s2179_s9 = int_to_ptr.vmem [resolvable:$true] %s2178_s9 }
 0x1e9   :  { %3028 = vmatpush3.msra.mxu0 %v2045_v40  ;;  %s3040_s25 = scalar_lea.vmem %s2179_s9, 64  ;;  %p3045_p1 = scmp.lt.s32.totalorder %s2179_s9, %s2179_s9 }
 0x1ea   :  { %p3041_p0 = scmp.ne.s32.totalorder %s2179_s9, %s3040_s25  ;;  %p3046_p2 = scmp.lt.s32.totalorder %s3040_s25, %s3040_s25 }
 0x1ec   :  { %p3047_p3 = por %p3046_p2, %p3045_p1 }
 0x1ee   :  { %p3048_p4 = pnand %p3047_p3, %p3041_p0 }
 0x1f5   :  { %v930_v44 = vpop.f32.mrf.mxu1  ;;  %v1014_v45 = vpop.f32.mrf.mxu0 }
 0x1f6   :  { %v934_v46 = vadd.f32 %v930_v44, %v850_v43 }
 0x1f7   :  { %v2773_v47 = vpop.f32.mrf.mxu1  ;;  %v2792_v49 = vpop.f32.mrf.mxu0 }
 0x1f8   :  { %v1018_v50 = vadd.f32 %v1014_v45, %v934_v46  ;;  %v2354_v46 = vld [vmem:[%s4197_s10] ss:$0 sm:$0xff]  ;;  %s3087_s10 = smov [#allocation5]  }
 0x1f9   :  { %s2190_s3 = sshll.u32 %s3087_s10, 4  ;;  %s2191_s3 = int_to_ptr.vmem [resolvable:$true] %s2190_s3 }
 0x207   :  { %v1098_v51 = vpop.f32.mrf.mxu1  ;;  %v1182_v52 = vpop.f32.mrf.mxu0 }
 0x208   :  { %v1102_v63 = vadd.f32 %v1098_v51, %v1018_v50 }
 0x209   :  { %v2811_v53 = vpop.f32.mrf.mxu1  ;;  %v2830_v54 = vpop.f32.mrf.mxu0 }
 0x20a   :  { %v1186_v0 = vadd.f32 %v1182_v52, %v1102_v63 }
 0x219   :  { %v1266_v55 = vpop.f32.mrf.mxu1  ;;  %v1350_v56 = vpop.f32.mrf.mxu0 }
 0x21a   :  { %v1270_v3 = vadd.f32 %v1266_v55, %v1186_v0 }
 0x21b   :  { %v2849_v57 = vpop.f32.mrf.mxu1  ;;  %v2868_v58 = vpop.f32.mrf.mxu0 }
 0x21c   :  { %v1354_v6 = vadd.f32 %v1350_v56, %v1270_v3 }
 0x22b   :  { %v1434_v59 = vpop.f32.mrf.mxu1  ;;  %v1518_v60 = vpop.f32.mrf.mxu0 }
 0x22c   :  { %v1438_v7 = vadd.f32 %v1434_v59, %v1354_v6 }
 0x22d   :  { %v2887_v61 = vpop.f32.mrf.mxu1  ;;  %v2906_v62 = vpop.f32.mrf.mxu0 }
 0x22e   :  { %v1522_v8 = vadd.f32 %v1518_v60, %v1438_v7  ;;  %v2151_v62 = vlaneseq }
 0x230   :  { %v2152_v63 = vand.u32 127, %v2151_v62 }
 0x23d   :  { %v1602_v1 = vpop.f32.mrf.mxu1  ;;  %v1686_v2 = vpop.f32.mrf.mxu0 }
 0x23e   :  { %v1606_v9 = vadd.f32 %v1602_v1, %v1522_v8 }
 0x23f   :  { %v2925_v4 = vpop.f32.mrf.mxu1  ;;  %v2944_v5 = vpop.f32.mrf.mxu0 }
 0x240   :  { %v1690_v10 = vadd.f32 %v1686_v2, %v1606_v9 }
 0x24f   :  { %v1770_v11 = vpop.f32.mrf.mxu1  ;;  %v1854_v12 = vpop.f32.mrf.mxu0 }
 0x250   :  { %v1774_v13 = vadd.f32 %v1770_v11, %v1690_v10 }
 0x251   :  { %v2963_v15 = vpop.f32.mrf.mxu1  ;;  %v2982_v16 = vpop.f32.mrf.mxu0 }
 0x252   :  { %v1858_v17 = vadd.f32 %v1854_v12, %v1774_v13 }
 0x254   :  { %v1866_v18 = vadd.f32 %v2349_v14, %v1858_v17 }
 0x256   :  { %v1867_v19 = vmax.f32 %v1866_v18, 0.0 }
 0x258   :  { %2992 = vmatmul.mubr.msk.f32.vlgmr.msra.gmra.mxu1 %vm1881_vm2, %v1867_v19  ;;  %1869 = vst.msk [vmem:[#allocation5] sm:$0xf] %vm1868_vm3, %v1867_v19 }
 0x259   :  { %2995 = vmatpush3.msra.mxu1 %v1963_v20  ;;  %3010 = vmatprep.mubr.msk.f32.mxu1 %vm3085_vm1, %v3084_v48 }
 0x25a   :  { %2996 = vmatprep.subr.mxu1 %v3084_v48 }
 0x25b   :  { %2997 = vmatpush3.msra.mxu1 %v1962_v21 }
 0x25c   :  { %2998 = vmatprep.subr.mxu1 %v3084_v48 }
 0x25d   :  { %2999 = vmatpush3.msra.mxu1 %v1961_v22 }
 0x25e   :  { %3000 = vmatprep.subr.mxu1 %v3084_v48 }
 0x25f   :  { %3001 = vmatpush3.msra.mxu1 %v1960_v23 }
 0x260   :  { %3002 = vmatprep.subr.mxu1 %v3084_v48 }
 0x261   :  { %3003 = vmatpush3.msra.mxu1 %v1959_v24 }
 0x262   :  { %3004 = vmatprep.subr.mxu1 %v3084_v48 }
 0x263   :  { %3005 = vmatpush3.msra.mxu1 %v1958_v25 }
 0x264   :  { %3006 = vmatprep.subr.mxu1 %v3084_v48 }
 0x265   :  { %3007 = vmatpush3.msra.mxu1 %v1957_v26 }
 0x266   :  { %3008 = vmatprep.subr.mxu1 %v3084_v48 }
 0x267   :  { %3009 = vmatpush3.msra.mxu1 %v1956_v27 }
 0x318   :  { %v1951_v34 = vpop.f32.mrf.mxu1 }
 0x319   :  { %v1952_v35 = vadd.f32 %v2350_v33, %v1951_v34 }
 0x31a   :  { %v2993_v36 = vpop.f32.mrf.mxu1 }
 0x31b   :  { %v1955_v37 = vmax.f32 %v1952_v35, 0.0 }
 0x31d   :  { %3011 = vmatmul.mubr.msk.f32.vlgmr.msra.gmra.mxu1 %vm162_vm0, %v1955_v37 }
 0x3dd   :  { %v2040_v42 = vpop.f32.mrf.mxu1 }
 0x3de   :  { %v2041_v43 = vadd.f32 %v2352_v41, %v2040_v42 }
 0x3df   :  { %v3012_v44 = vpop.f32.mrf.mxu1 }
 0x3e0   :  { %v2044_v45 = vmax.f32 %v2041_v43, 0.0 }
 0x3e2   :  { %3030 = vmatmul.mubr.msk.f32.vlgmr.msra.gmra.mxu0 %vm162_vm0, %v2044_v45 }
 0x4a2   :  { %v2129_v48 = vpop.f32.mrf.mxu0 }
 0x4a3   :  { %v2130_v47 = vadd.f32 %v2354_v46, %v2129_v48 }
 0x4a4   :  { %v3031_v49 = vpop.f32.mrf.mxu0 }
 0x4a5   :  { %v2134_v50 = vsel %vm2133_vm4, %v2130_v47, -inf }
 0x4a6   :  { %2135 = vmax.xlane.f32.xlu0 %v2134_v50 }
 0x52f   :  { %v2136_v51 = vpop.xlane.xlu0 %2135 }
 0x530   :  { %v2137_v52 = vsub.f32 %v2130_v47, %v2136_v51 }
 0x532   :  { %v2138_v53 = vmul.f32 1.442695, %v2137_v52 }
 0x534   :  { %3036 = vpow2.f32 %v2138_v53 }
 0x541   :  { %v3037_v54 = vpop.eup %3036 }
 0x542   :  { %v2140_v55 = vsel %vm2133_vm4, %v3037_v54, 0.0 }
 0x543   :  { %2141 = vadd.xlane.f32.xlu0 %v2140_v55 }
 0x5cc   :  { %v2142_v56 = vpop.xlane.xlu0 %2141 }
 0x5cd   :  { %3038 = vlog2.f32 %v2142_v56 }
 0x5da   :  { %v3039_v57 = vpop.eup %3038 }
 0x5db   :  { %v2144_v58 = vmul.f32 0.6931472, %v3039_v57 }
 0x5dd   :  { %v2145_v59 = vadd.f32 %v2144_v58, %v2136_v51 }
 0x5df   :  { %v2146_v60 = vsub.f32 %v2130_v47, %v2145_v59 }
 0x5e1   :  { %v2148_v61 = vsel %vm2133_vm4, %v2146_v60, -inf  ;;  %2147 = vst.msk [vmem:[#allocation3] sm:$0xf] %vm2133_vm4, %v2146_v60 }
 0x5e2   :  { %2149 = vmax.xlane.f32.xlu1 %v2148_v61 }
 0x66b   :  { %v2150_v0 = vpop.xlane.xlu1 %2149 }
 0x66c   :  { %vm2153_vm5 = vcmp.ge.f32.partialorder %v2146_v60, %v2150_v0 }
 0x66d   :  { %v2154_v1 = vsel %vm2153_vm5, %v2152_v63, 10 }
 0x66e   :  { %v2155_v2 = vsel %vm2133_vm4, %v2154_v1, 2147483647 }
 0x66f   :  { %v2157_v3 = vshra.s32 %v2155_v2, 16  ;;  %v2156_v5 = vand.u32 65535, %v2155_v2 }
 0x671   :  { %v2159_v4 = vcvt.s32.f32 %v2157_v3  ;;  %v2158_v7 = vcvt.s32.f32 %v2156_v5 }
 0x673   :  { %2160 = vmin.xlane.f32.xlu1 %v2159_v4 }
 0x6fc   :  { %v2161_v6 = vpop.xlane.xlu1 %2160 }
 0x6fd   :  { %vm2162_vm6 = vcmp.eq.f32.partialorder %v2159_v4, %v2161_v6 }
 0x6fe   :  { %v2163_v8 = vsel %vm2162_vm6, %v2158_v7, inf }
 0x6ff   :  { %2164 = vmin.xlane.f32.xlu0 %v2163_v8 }
 0x700   :  { %3051 = shalt.err (!%p3048_p4)
}
 0x701   :  { %2181 = dma.vmem_to_hbm [thread:$0]  %s2179_s9, 64, %s4198_s11, [#allocation4]  }
 0x702   :  { %s3060_s28 = scalar_lea.vmem %s2191_s3, 64  ;;  %p3065_p6 = scmp.lt.s32.totalorder %s2191_s3, %s2191_s3 }
 0x703   :  { %p3061_p5 = scmp.ne.s32.totalorder %s2191_s3, %s3060_s28  ;;  %p3066_p7 = scmp.lt.s32.totalorder %s3060_s28, %s3060_s28 }
 0x705   :  { %p3067_p8 = por %p3066_p7, %p3065_p6 }
 0x707   :  { %p3068_p9 = pnand %p3067_p8, %p3061_p5 }
 0x709   :  { %3071 = shalt.err (!%p3068_p9)
}
 0x70a   :  { %2193 = dma.vmem_to_hbm [thread:$0]  %s2191_s3, 64, %s4200_s13, [#allocation6]   ;;  %v2167_v9 = vcvt.f32.s32 %v2161_v6  ;;  %vm2170_vm7 = vcmask 3072  }
 0x70c   :  { %v2168_v11 = vshll.u32 %v2167_v9, 16 }
 0x788   :  { %v2165_v10 = vpop.xlane.xlu0 %2164 }
 0x789   :  { %v2166_v12 = vcvt.f32.s32 %v2165_v10 }
 0x78b   :  { %v2169_v13 = vadd.s32 %v2168_v11, %v2166_v12 }
 0x78d   :  { %2171 = vst.msk [vmem:[%s4199_s12] sm:$0xf] %vm2170_vm7, %v2169_v13 }
 0x78e   :  { %3080 = dma.done.wait [#allocation4], 64  }
 0x78f   :  { %3081 = vsyncadd [#allocation4], 4294967232 }
 0x790   :  { %3082 = dma.done.wait [#allocation6], 64  }
 0x791   :  { %3083 = vsyncadd [#allocation6], 4294967232 }
 0x792   :  { %2202 = vsyncpa [#allocation4], 1 }
 0x793   :  { %2203 = vsyncpa [#allocation6], 1 }

</bundles_post_ra>
